<compile_context>
chip_gen: v5e
topology: v5e:2x2
jax: 0.10.0
libtpu: 0.0.40
codegen_flags: <defaults>
</compile_context>

<pallas_src>
import functools

import jax
import jax.numpy as jnp
from jax import lax
from jax.experimental import pallas as pl
from jax.experimental.pallas import tpu as pltpu


# ----------------------------------------------------------------------------
# small helpers
# ----------------------------------------------------------------------------
def _pick_tile(n, prefs=(256, 128)):
    """Largest preferred tile that divides n, else the full extent."""
    for t in prefs:
        if n >= t and n % t == 0:
            return t
    return n


def _vmem_limit_bytes(block_bytes, scratch_bytes=0):
    """Scoped-VMEM budget: double-buffered blocks + persistent scratch + headroom."""
    need = 2 * block_bytes + scratch_bytes + (4 << 20)
    return int(min(100 << 20, max(32 << 20, need)))


# ----------------------------------------------------------------------------
# Pallas kernels
# ----------------------------------------------------------------------------
def _embed_rope_kernel(x_ref, we_ref, be_ref, cos_ref, sin_ref, out_ref):
    """y = x @ We + be, then global RoPE (rotate-half, permuted layout).
    One full-width (lane-dense) store."""
    x = x_ref[0]                                                    # (ts, In) f32
    y = jnp.dot(x.astype(jnp.bfloat16), we_ref[...],
                preferred_element_type=jnp.float32) + be_ref[0:1, :]
    H2 = cos_ref.shape[-1]
    c, s = cos_ref[...], sin_ref[...]
    y1, y2 = y[:, :H2], y[:, H2:]
    out_ref[0] = jnp.concatenate([y1 * c - y2 * s, y2 * c + y1 * s], axis=-1)


def _attn_ln_kernel(num_heads, head_dim, tq,
                    x_ref, wq_ref, bq_ref, wkv_ref, bkv_ref,
                    wo_ref, bo_ref, g_ref, bln_ref, cos_ref, sin_ref,
                    out_ref, kv_ref):
    """Fused self-attention + RoPE + residual add + LayerNorm for one (b, q-tile).

    K/V are computed once per batch element (q_idx == 0) and cached in a bf16 VMEM
    scratch laid out as [K_rot (head-contiguous) | V]; query tiles reuse it.
    """
    S = x_ref.shape[1]
    H = x_ref.shape[2]
    H2 = H // 2
    hd = head_dim
    hd2 = hd // 2
    q_idx = pl.program_id(1)

    # ---- K/V projection + RoPE + head-contiguous repack, once per batch element ----
    @pl.when(q_idx == 0)
    def _():
        xs = x_ref[0]                                               # (S, H) f32
        kv = jnp.dot(xs.astype(jnp.bfloat16), wkv_ref[...],
                     preferred_element_type=jnp.float32) + bkv_ref[0:1, :]
        k, v = kv[:, :H], kv[:, H:]
        ck, sk = cos_ref[...], sin_ref[...]
        k1, k2 = k[:, :H2], k[:, H2:]
        k1r = (k1 * ck - k2 * sk).astype(jnp.bfloat16)
        k2r = (k2 * ck + k1 * sk).astype(jnp.bfloat16)
        pieces = []
        for h in range(num_heads):          # re-pack: each head's rotated dims contiguous
            sl = slice(h * hd2, (h + 1) * hd2)
            pieces += [k1r[:, sl], k2r[:, sl]]
        pieces.append(v.astype(jnp.bfloat16))
        kv_ref[...] = jnp.concatenate(pieces, axis=-1)              # one full-width store

    # ---- query / residual tile ----
    row0 = pl.multiple_of(q_idx * tq, tq)
    xq = x_ref[0, pl.ds(row0, tq), :]                               # (tq, H) f32
    q = jnp.dot(xq.astype(jnp.bfloat16), wq_ref[...],
                preferred_element_type=jnp.float32) + bq_ref[0:1, :]
    cq = cos_ref[pl.ds(row0, tq), :]
    sq = sin_ref[pl.ds(row0, tq), :]
    q1, q2 = q[:, :H2], q[:, H2:]
    q1r = (q1 * cq - q2 * sq).astype(jnp.bfloat16)
    q2r = (q2 * cq + q1 * sq).astype(jnp.bfloat16)

    k_rot = kv_ref[:, :H]                                           # (S, H) bf16
    v_all = kv_ref[:, H:]                                           # (S, H) bf16

    dn = (((1,), (1,)), ((), ()))                                   # a @ b.T
    head_outs = []
    for h in range(num_heads):                                      # small static loop
        sl = slice(h * hd2, (h + 1) * hd2)
        lo = h * hd
        q_h = jnp.concatenate([q1r[:, sl], q2r[:, sl]], axis=-1)    # (tq, hd) bf16
        s = lax.dot_general(q_h, k_rot[:, lo:lo + hd], dn,
                            preferred_element_type=jnp.float32)     # single K=hd dot
        s = s - jnp.max(s, axis=-1, keepdims=True)
        p = jnp.exp(s)
        p = p * pl.reciprocal(jnp.sum(p, axis=-1, keepdims=True), approx=True)
        head_outs.append(jnp.dot(p.astype(jnp.bfloat16), v_all[:, lo:lo + hd],
                                 preferred_element_type=jnp.float32))
    attn = jnp.concatenate(head_outs, axis=-1).astype(jnp.bfloat16)  # (tq, H) in registers

    proj = jnp.dot(attn, wo_ref[...],
                   preferred_element_type=jnp.float32) + bo_ref[0:1, :]

    # fused residual add + LayerNorm epilogue (eps = 1e-5, f32 stats)
    y = xq + proj
    mu = jnp.mean(y, axis=-1, keepdims=True)
    yc = y - mu
    var = jnp.mean(yc * yc, axis=-1, keepdims=True)
    out_ref[0] = yc * lax.rsqrt(var + 1e-5) * g_ref[0:1, :] + bln_ref[0:1, :]


def _ffn_ln_kernel(x_ref, w1_ref, b1_ref, w2_ref, b2_ref, g_ref, bln_ref, out_ref):
    """Un-tiled FFN (w1/w2 fully resident) + fused residual add + LayerNorm."""
    x = x_ref[0]                                                    # (ts, H) f32
    h = jnp.dot(x.astype(jnp.bfloat16), w1_ref[...],
                preferred_element_type=jnp.float32) + b1_ref[0:1, :]
    h = jnp.maximum(h, 0.0)                                         # ReLU
    y = x + jnp.dot(h.astype(jnp.bfloat16), w2_ref[...],
                    preferred_element_type=jnp.float32) + b2_ref[0:1, :]
    mu = jnp.mean(y, axis=-1, keepdims=True)
    yc = y - mu
    var = jnp.mean(yc * yc, axis=-1, keepdims=True)
    out_ref[0] = yc * lax.rsqrt(var + 1e-5) * g_ref[0:1, :] + bln_ref[0:1, :]


def _ffn_ln_kernel_ftiled(x_ref, w1_ref, b1_ref, w2_ref, b2_ref, g_ref, bln_ref,
                          out_ref, acc_ref, xb_ref):
    """Fallback for large FFN widths: tile the 4H dim (reduction axis last)."""
    f = pl.program_id(1)

    @pl.when(f == 0)
    def _():
        acc_ref[...] = jnp.zeros_like(acc_ref)
        xb_ref[...] = x_ref[0].astype(jnp.bfloat16)                 # cache bf16 cast once

    h = jnp.dot(xb_ref[...], w1_ref[...],
                preferred_element_type=jnp.float32) + b1_ref[0:1, :]
    h = jnp.maximum(h, 0.0)
    acc_ref[...] += jnp.dot(h.astype(jnp.bfloat16), w2_ref[...],
                            preferred_element_type=jnp.float32)

    @pl.when(f == pl.num_programs(1) - 1)
    def _():
        y = x_ref[0] + acc_ref[...] + b2_ref[0:1, :]
        mu = jnp.mean(y, axis=-1, keepdims=True)
        yc = y - mu
        var = jnp.mean(yc * yc, axis=-1, keepdims=True)
        out_ref[0] = yc * lax.rsqrt(var + 1e-5) * g_ref[0:1, :] + bln_ref[0:1, :]


def _ln_unperm_kernel(x_ref, g_ref, b_ref, p_ref, out_ref):
    """Final LayerNorm fused with the inverse layout permutation (one-hot on MXU)."""
    x = x_ref[0]
    mu = jnp.mean(x, axis=-1, keepdims=True)
    xc = x - mu
    var = jnp.mean(xc * xc, axis=-1, keepdims=True)
    yn = xc * lax.rsqrt(var + 1e-5)                                 # permutation-invariant
    yo = jnp.dot(yn, p_ref[...], preferred_element_type=jnp.float32)  # un-permute columns
    out_ref[0] = yo * g_ref[0:1, :] + b_ref[0:1, :]                 # gamma/beta: ORIGINAL layout


# ----------------------------------------------------------------------------
# pallas_call wrappers
# ----------------------------------------------------------------------------
def embed_rope_pallas(x, we, be, cos_g, sin_g):
    B, S, In = x.shape
    H = we.shape[1]
    H2 = H // 2
    ts = _pick_tile(S)
    n_s = S // ts
    return pl.pallas_call(
        _embed_rope_kernel,
        out_shape=jax.ShapeDtypeStruct((B, S, H), jnp.float32),
        grid=(B, n_s),
        in_specs=[
            pl.BlockSpec((1, ts, In), lambda b, s: (b, s, 0)),
            pl.BlockSpec((In, H), lambda b, s: (0, 0)),
            pl.BlockSpec((1, H), lambda b, s: (0, 0)),
            pl.BlockSpec((ts, H2), lambda b, s: (s, 0)),
            pl.BlockSpec((ts, H2), lambda b, s: (s, 0)),
        ],
        out_specs=pl.BlockSpec((1, ts, H), lambda b, s: (b, s, 0)),
        compiler_params=pltpu.CompilerParams(
            dimension_semantics=("parallel", "parallel")),
    )(x, we, be, cos_g, sin_g)


def attn_ln_pallas(x, lp, cos_h, sin_h, num_heads):
    B, S, H = x.shape
    assert H % num_heads == 0
    hd = H // num_heads
    assert hd % 2 == 0
    H2 = H // 2
    tq = _pick_tile(S)
    n_q = S // tq
    kernel = functools.partial(_attn_ln_kernel, num_heads, hd, tq)

    blk_bytes = (4 * S * H                                    # x f32 (fetched once per b)
                 + 2 * H * H + 2 * H * 2 * H + 2 * H * H      # wq / wkv / wo (bf16)
                 + 2 * 4 * S * H2                             # cos / sin (f32)
                 + 4 * tq * H)                                # output tile
    scratch_bytes = 2 * S * 2 * H                             # bf16 [K_rot | V] cache
    vmem = _vmem_limit_bytes(blk_bytes, scratch_bytes)

    return pl.pallas_call(
        kernel,
        out_shape=jax.ShapeDtypeStruct((B, S, H), jnp.float32),
        grid=(B, n_q),
        in_specs=[
            # single activation input: index_map independent of q -> DMA'd once per b
            pl.BlockSpec((1, S, H), lambda b, q: (b, 0, 0)),
            pl.BlockSpec((H, H), lambda b, q: (0, 0)),        # wq   (bf16, pre-scaled)
            pl.BlockSpec((1, H), lambda b, q: (0, 0)),        # bq
            pl.BlockSpec((H, 2 * H), lambda b, q: (0, 0)),    # wkv  (bf16)
            pl.BlockSpec((1, 2 * H), lambda b, q: (0, 0)),    # bkv
            pl.BlockSpec((H, H), lambda b, q: (0, 0)),        # wo   (bf16)
            pl.BlockSpec((1, H), lambda b, q: (0, 0)),        # bo
            pl.BlockSpec((1, H), lambda b, q: (0, 0)),        # LN gamma
            pl.BlockSpec((1, H), lambda b, q: (0, 0)),        # LN beta
            pl.BlockSpec((S, H2), lambda b, q: (0, 0)),       # cos (full; q rows sliced)
            pl.BlockSpec((S, H2), lambda b, q: (0, 0)),       # sin
        ],
        out_specs=pl.BlockSpec((1, tq, H), lambda b, q: (b, q, 0)),
        scratch_shapes=[pltpu.VMEM((S, 2 * H), jnp.bfloat16)],
        compiler_params=pltpu.CompilerParams(
            dimension_semantics=("parallel", "arbitrary"),   # scratch carries across q
            vmem_limit_bytes=vmem),
    )(x, lp["wq"], lp["bq"], lp["wkv"], lp["bkv"], lp["wo"], lp["bo"],
      lp["g1"], lp["b1ln"], cos_h, sin_h)


def ffn_ln_pallas(x, lp):
    B, S, H = x.shape
    F = lp["w1"].shape[1]
    weight_bytes = 2 * H * F * 2                               # w1 + w2 in bf16
    ts = _pick_tile(S)
    inter_bytes = 4 * ts * F                                   # (ts, F) f32 intermediate

    if weight_bytes + 2 * inter_bytes <= (24 << 20):
        # Feed-forward dim fits: no F-tiling, no accumulator read-modify-write.
        n_s = S // ts
        vmem = _vmem_limit_bytes(weight_bytes + 8 * ts * H + inter_bytes)
        return pl.pallas_call(
            _ffn_ln_kernel,
            out_shape=jax.ShapeDtypeStruct((B, S, H), jnp.float32),
            grid=(B, n_s),
            in_specs=[
                pl.BlockSpec((1, ts, H), lambda b, s: (b, s, 0)),
                pl.BlockSpec((H, F), lambda b, s: (0, 0)),
                pl.BlockSpec((1, F), lambda b, s: (0, 0)),
                pl.BlockSpec((F, H), lambda b, s: (0, 0)),
                pl.BlockSpec((1, H), lambda b, s: (0, 0)),
                pl.BlockSpec((1, H), lambda b, s: (0, 0)),
                pl.BlockSpec((1, H), lambda b, s: (0, 0)),
            ],
            out_specs=pl.BlockSpec((1, ts, H), lambda b, s: (b, s, 0)),
            compiler_params=pltpu.CompilerParams(
                dimension_semantics=("parallel", "parallel"),
                vmem_limit_bytes=vmem),
        )(x, lp["w1"], lp["b1"], lp["w2"], lp["b2"], lp["g2"], lp["b2ln"])

    # Large FFN widths: tile the 4H dim (reduction axis last).
    f_tile = _pick_tile(F, prefs=(1024, 512, 256, 128))
    n_f = F // f_tile
    blk = 4 * S * H + 2 * H * f_tile + 2 * f_tile * H + 4 * S * H
    scratch = 4 * S * H + 2 * S * H
    vmem = _vmem_limit_bytes(blk, scratch)
    return pl.pallas_call(
        _ffn_ln_kernel_ftiled,
        out_shape=jax.ShapeDtypeStruct((B, S, H), jnp.float32),
        grid=(B, n_f),
        in_specs=[
            pl.BlockSpec((1, S, H), lambda b, f: (b, 0, 0)),
            pl.BlockSpec((H, f_tile), lambda b, f: (0, f)),
            pl.BlockSpec((1, f_tile), lambda b, f: (0, f)),
            pl.BlockSpec((f_tile, H), lambda b, f: (f, 0)),
            pl.BlockSpec((1, H), lambda b, f: (0, 0)),
            pl.BlockSpec((1, H), lambda b, f: (0, 0)),
            pl.BlockSpec((1, H), lambda b, f: (0, 0)),
        ],
        out_specs=pl.BlockSpec((1, S, H), lambda b, f: (b, 0, 0)),
        scratch_shapes=[pltpu.VMEM((S, H), jnp.float32),
                        pltpu.VMEM((S, H), jnp.bfloat16)],
        compiler_params=pltpu.CompilerParams(
            dimension_semantics=("parallel", "arbitrary"),
            vmem_limit_bytes=vmem),
    )(x, lp["w1"], lp["b1"], lp["w2"], lp["b2"], lp["g2"], lp["b2ln"])


def final_ln_unperm_pallas(x, g, b, perm_mat):
    B, S, H = x.shape
    ts = _pick_tile(S)
    n_s = S // ts
    return pl.pallas_call(
        _ln_unperm_kernel,
        out_shape=jax.ShapeDtypeStruct((B, S, H), jnp.float32),
        grid=(B, n_s),
        in_specs=[
            pl.BlockSpec((1, ts, H), lambda bi, si: (bi, si, 0)),
            pl.BlockSpec((1, H), lambda bi, si: (0, 0)),
            pl.BlockSpec((1, H), lambda bi, si: (0, 0)),
            pl.BlockSpec((H, H), lambda bi, si: (0, 0)),
        ],
        out_specs=pl.BlockSpec((1, ts, H), lambda bi, si: (bi, si, 0)),
        compiler_params=pltpu.CompilerParams(
            dimension_semantics=("parallel", "parallel")),
    )(x, g, b, perm_mat)


# ----------------------------------------------------------------------------
# RoPE tables (rotate-half, permuted layout) + layout permutation helpers
# ----------------------------------------------------------------------------
def rope_half_tables(seq_len, rot_dim, n_tile):
    pos = jnp.arange(seq_len, dtype=jnp.float32)[:, None]
    div = jnp.exp(-jnp.log(10000.0) *
                  jnp.arange(0, rot_dim, 2, dtype=jnp.float32) / rot_dim)
    ang = pos * div                                         # (S, rot_dim/2)
    cos, sin = jnp.cos(ang), jnp.sin(ang)
    if n_tile > 1:
        cos = jnp.tile(cos, (1, n_tile))
        sin = jnp.tile(sin, (1, n_tile))
    return cos, sin


def interleave_perm(H):
    # new column j < H/2 holds original column 2j (the "evens"); j >= H/2 the "odds".
    return jnp.concatenate([jnp.arange(0, H, 2), jnp.arange(1, H, 2)])


def prepare_params(params, num_heads, seq_len):
    """Fold layout permutation, QK scaling, KV stacking and RoPE tables into params."""
    we, be = params["embed"]
    H = we.shape[1]
    hd = H // num_heads
    scale = hd ** -0.5
    perm = interleave_perm(H)
    bf16 = jnp.bfloat16
    row = lambda v: v[None, :].astype(jnp.float32)

    cos_g, sin_g = rope_half_tables(seq_len, H, 1)           # global positional RoPE
    cos_h, sin_h = rope_half_tables(seq_len, hd, num_heads)  # per-head RoPE

    pp = {
        "we": we[:, perm].astype(bf16),
        "be": row(be[perm]),
        "layers": [],
        # final LN params stay in the ORIGINAL layout; the inverse permutation is
        # applied inside the final LN kernel via a one-hot f32 matrix on the MXU.
        "gf": row(params["final_ln"][0]),
        "bf": row(params["final_ln"][1]),
        "perm_mat": jax.nn.one_hot(perm, H, dtype=jnp.float32),
        "cos_g": cos_g, "sin_g": sin_g, "cos_h": cos_h, "sin_h": sin_h,
    }
    for lp in params["layers"]:
        wq = (lp["wq"][perm, :][:, perm] * scale).astype(bf16)   # rows+cols permuted, pre-scaled
        bq = row(lp["bq"][perm] * scale)
        wk = lp["wk"][perm, :][:, perm]                          # rows+cols permuted
        wv = lp["wv"][perm, :]                                   # rows permuted only
        wkv = jnp.concatenate([wk, wv], axis=1).astype(bf16)     # (H, 2H)
        bkv = row(jnp.concatenate([lp["bk"][perm], lp["bv"]]))
        pp["layers"].append(dict(
            wq=wq, bq=bq, wkv=wkv, bkv=bkv,
            wo=lp["wo"][:, perm].astype(bf16), bo=row(lp["bo"][perm]),
            g1=row(lp["g1"][perm]), b1ln=row(lp["beta1"][perm]),
            w1=lp["w1"][perm, :].astype(bf16), b1=row(lp["b1"]),
            w2=lp["w2"][:, perm].astype(bf16), b2=row(lp["b2"][perm]),
            g2=row(lp["g2"][perm]), b2ln=row(lp["beta2"][perm]),
        ))
    return pp


# ----------------------------------------------------------------------------
# Full Encoder forward (Pallas version)
# ----------------------------------------------------------------------------
def encoder_pallas(x, pp, num_heads):
    h = embed_rope_pallas(x, pp["we"], pp["be"], pp["cos_g"], pp["sin_g"])
    for lp in pp["layers"]:
        h = attn_ln_pallas(h, lp, pp["cos_h"], pp["sin_h"], num_heads)
        h = ffn_ln_pallas(h, lp)
    return final_ln_unperm_pallas(h, pp["gf"], pp["bf"], pp["perm_mat"])


# ----------------------------------------------------------------------------
# Pure-JAX reference (mirrors the PyTorch forward) for the sanity check
# ----------------------------------------------------------------------------
def _rope_interleaved_ref(x, rot_dim):
    S = x.shape[-2]
    pos = jnp.arange(S, dtype=jnp.float32)[:, None]
    div = jnp.exp(-jnp.log(10000.0) *
                  jnp.arange(0, rot_dim, 2, dtype=jnp.float32) / rot_dim)
    ang = pos * div
    sin, cos = jnp.sin(ang), jnp.cos(ang)
    x1, x2 = x[..., ::2], x[..., 1::2]
    even = x1 * cos - x2 * sin
    odd = x1 * sin + x2 * cos
    return jnp.stack([even, odd], axis=-1).reshape(x.shape)


def _mha_ref(x, lp, num_heads):
    B, S, H = x.shape
    hd = H // num_heads
    q = x @ lp["wq"] + lp["bq"]
    k = x @ lp["wk"] + lp["bk"]
    v = x @ lp["wv"] + lp["bv"]
    split = lambda t: t.reshape(B, S, num_heads, hd).transpose(0, 2, 1, 3)
    q, k, v = split(q), split(k), split(v)
    q = _rope_interleaved_ref(q, hd)
    k = _rope_interleaved_ref(k, hd)
    s = jnp.einsum("bhqd,bhkd->bhqk", q, k) * hd ** -0.5
    a = jax.nn.softmax(s, axis=-1)
    o = jnp.einsum("bhqk,bhkd->bhqd", a, v).transpose(0, 2, 1, 3).reshape(B, S, H)
    return o @ lp["wo"] + lp["bo"]


def _ln_ref(x, g, b):
    mu = x.mean(-1, keepdims=True)
    var = ((x - mu) ** 2).mean(-1, keepdims=True)
    return (x - mu) / jnp.sqrt(var + 1e-5) * g + b


def encoder_ref(x, params, num_heads):
    we, be = params["embed"]
    h = x @ we + be
    h = _rope_interleaved_ref(h, h.shape[-1])
    for lp in params["layers"]:
        h = _ln_ref(h + _mha_ref(h, lp, num_heads), lp["g1"], lp["beta1"])
        f = jnp.maximum(h @ lp["w1"] + lp["b1"], 0.0) @ lp["w2"] + lp["b2"]
        h = _ln_ref(h + f, lp["g2"], lp["beta2"])
    gf, bff = params["final_ln"]
    return _ln_ref(h, gf, bff)


# ----------------------------------------------------------------------------
# Deterministic parameter init (original, un-permuted layout)
# ----------------------------------------------------------------------------
def init_params(key, input_dim, hidden, n_layers):
    def lin(k, din, dout):
        kw, kb = jax.random.split(k)
        w = jax.random.normal(kw, (din, dout), jnp.float32) * (din ** -0.5)
        b = jax.random.normal(kb, (dout,), jnp.float32) * 0.02
        return w, b

    def ln(k):
        kg, kb = jax.random.split(k)
        g = 1.0 + 0.1 * jax.random.normal(kg, (hidden,), jnp.float32)
        b = 0.1 * jax.random.normal(kb, (hidden,), jnp.float32)
        return g, b

    keys = jax.random.split(key, n_layers + 2)
    we, be = lin(keys[0], input_dim, hidden)
    layers = []
    for i in range(n_layers):
        lk = jax.random.split(keys[1 + i], 8)
        wq, bq = lin(lk[0], hidden, hidden)
        wk, bk = lin(lk[1], hidden, hidden)
        wv, bv = lin(lk[2], hidden, hidden)
        wo, bo = lin(lk[3], hidden, hidden)
        w1, b1 = lin(lk[4], hidden, 4 * hidden)
        w2, b2 = lin(lk[5], 4 * hidden, hidden)
        g1, beta1 = ln(lk[6])
        g2, beta2 = ln(lk[7])
        layers.append(dict(wq=wq, bq=bq, wk=wk, bk=bk, wv=wv, bv=bv, wo=wo, bo=bo,
                           w1=w1, b1=b1, w2=w2, b2=b2,
                           g1=g1, beta1=beta1, g2=g2, beta2=beta2))
    gf, bff = ln(keys[n_layers + 1])
    return dict(embed=(we, be), layers=layers, final_ln=(gf, bff))


# ----------------------------------------------------------------------------
if __name__ == "__main__":
    B, SEQ, IN_DIM, HIDDEN, NUM_HEADS, N_LAYERS = 2, 8, 16, 32, 4, 2

    root = jax.random.PRNGKey(0)
    k_x, k_p = jax.random.split(root)
    x = jax.random.normal(k_x, (B, SEQ, IN_DIM), jnp.float32)
    params = init_params(k_p, IN_DIM, HIDDEN, N_LAYERS)
    pp = prepare_params(params, NUM_HEADS, SEQ)

    enc = jax.jit(functools.partial(encoder_pallas, num_heads=NUM_HEADS))
    out = jax.block_until_ready(enc(x, pp))

    ref = encoder_ref(x, params, NUM_HEADS)
    max_err = float(jnp.max(jnp.abs(out - ref)))
    assert out.shape == (B, SEQ, HIDDEN)
    # Error budget: bf16 MXU operands + EUP approx-reciprocal softmax over 2 layers
    # (an all-f32 path reproduces the reference to <1e-4).
    assert max_err < 4e-2, f"mismatch vs reference: {max_err}"

    print("KERNEL_OK")
</pallas_src>

<mosaic_0001>
module attributes {stable_mosaic.version = 11 : i64} {
  func.func @_embed_rope_kernel(%arg0: i32, %arg1: i32, %arg2: memref<1x8x16xf32, #tpu.memory_space<vmem>>, %arg3: memref<16x32xbf16, #tpu.memory_space<vmem>>, %arg4: memref<1x32xf32, #tpu.memory_space<vmem>>, %arg5: memref<8x16xf32, #tpu.memory_space<vmem>>, %arg6: memref<8x16xf32, #tpu.memory_space<vmem>>, %arg7: memref<1x8x32xf32, #tpu.memory_space<vmem>>) attributes {dimension_semantics = [#tpu.dimension_semantics<parallel>, #tpu.dimension_semantics<parallel>], iteration_bounds = array<i64: 2, 1>, scalar_prefetch = 0 : i64, scratch_operands = 0 : i64, tpu.core_type = #tpu.core_type<tc>, window_params = [{transform_indices = @transform_0, window_bounds = array<i64: 1, 8, 16>}, {pipeline_mode = #tpu.pipeline_mode<synchronous>, transform_indices = @transform_1, window_bounds = array<i64: 16, 32>}, {pipeline_mode = #tpu.pipeline_mode<synchronous>, transform_indices = @transform_2, window_bounds = array<i64: 1, 32>}, {transform_indices = @transform_3, window_bounds = array<i64: 8, 16>}, {transform_indices = @transform_4, window_bounds = array<i64: 8, 16>}, {transform_indices = @transform_5, window_bounds = array<i64: 1, 8, 32>}]} {
    %c0 = arith.constant 0 : index
    %c0_0 = arith.constant 0 : index
    %c0_1 = arith.constant 0 : index
    %0 = vector.load %arg2[%c0, %c0_0, %c0_1] : memref<1x8x16xf32, #tpu.memory_space<vmem>>, vector<1x8x16xf32>
    %1 = vector.shape_cast %0 : vector<1x8x16xf32> to vector<8x16xf32>
    %2 = arith.truncf %1 : vector<8x16xf32> to vector<8x16xbf16>
    %c0_2 = arith.constant 0 : index
    %c0_3 = arith.constant 0 : index
    %3 = vector.load %arg3[%c0_2, %c0_3] : memref<16x32xbf16, #tpu.memory_space<vmem>>, vector<16x32xbf16>
    %cst = arith.constant dense<0.000000e+00> : vector<8x32xf32>
    %4 = tpu.matmul %2, %3, %cst {dimension_numbers = #tpu.dot_dimension_numbers<[1], [0], [0], [1], [0, 0, 1, 1], [], []>} : vector<8x16xbf16>, vector<16x32xbf16>, vector<8x32xf32> -> vector<8x32xf32>
    %c0_4 = arith.constant 0 : index
    %c0_5 = arith.constant 0 : index
    %5 = vector.load %arg4[%c0_4, %c0_5] : memref<1x32xf32, #tpu.memory_space<vmem>>, vector<1x32xf32>
    %6 = vector.broadcast %5 : vector<1x32xf32> to vector<8x32xf32>
    %7 = arith.addf %4, %6 : vector<8x32xf32>
    %c0_6 = arith.constant 0 : index
    %c0_7 = arith.constant 0 : index
    %8 = vector.load %arg5[%c0_6, %c0_7] : memref<8x16xf32, #tpu.memory_space<vmem>>, vector<8x16xf32>
    %c0_8 = arith.constant 0 : index
    %c0_9 = arith.constant 0 : index
    %9 = vector.load %arg6[%c0_8, %c0_9] : memref<8x16xf32, #tpu.memory_space<vmem>>, vector<8x16xf32>
    %10 = vector.extract_strided_slice %7 {offsets = [0, 0], sizes = [8, 16], strides = [1, 1]} : vector<8x32xf32> to vector<8x16xf32>
    %11 = vector.extract_strided_slice %7 {offsets = [0, 16], sizes = [8, 16], strides = [1, 1]} : vector<8x32xf32> to vector<8x16xf32>
    %12 = arith.mulf %10, %8 : vector<8x16xf32>
    %13 = arith.mulf %11, %9 : vector<8x16xf32>
    %14 = arith.subf %12, %13 : vector<8x16xf32>
    %15 = arith.mulf %11, %8 : vector<8x16xf32>
    %16 = arith.mulf %10, %9 : vector<8x16xf32>
    %17 = arith.addf %15, %16 : vector<8x16xf32>
    %18 = tpu.concatenate %14, %17 in 1 : vector<8x16xf32>, vector<8x16xf32> -> vector<8x32xf32>
    %c0_10 = arith.constant 0 : index
    %c0_11 = arith.constant 0 : index
    %c0_12 = arith.constant 0 : index
    %19 = vector.load %arg7[%c0_10, %c0_11, %c0_12] : memref<1x8x32xf32, #tpu.memory_space<vmem>>, vector<1x8x32xf32>
    %20 = vector.shape_cast %19 : vector<1x8x32xf32> to vector<8x32xf32>
    %21 = vector.shape_cast %18 : vector<8x32xf32> to vector<1x8x32xf32>
    tpu.vector_store %arg7[%c0_10, %c0_11, %c0_12], %21 {strides = array<i32>} : memref<1x8x32xf32, #tpu.memory_space<vmem>>, vector<1x8x32xf32>,
    return
  }
  func.func @transform_0(%arg0: i32, %arg1: i32) -> (i32, i32, i32) {
    %c0_i32 = arith.constant 0 : i32
    %c0_i32_0 = arith.constant 0 : i32
    return %arg0, %arg1, %c0_i32 : i32, i32, i32
  }
  func.func @transform_1(%arg0: i32, %arg1: i32) -> (i32, i32) {
    %c0_i32 = arith.constant 0 : i32
    %c0_i32_0 = arith.constant 0 : i32
    %c0_i32_1 = arith.constant 0 : i32
    return %c0_i32, %c0_i32_0 : i32, i32
  }
  func.func @transform_2(%arg0: i32, %arg1: i32) -> (i32, i32) {
    %c0_i32 = arith.constant 0 : i32
    %c0_i32_0 = arith.constant 0 : i32
    %c0_i32_1 = arith.constant 0 : i32
    return %c0_i32, %c0_i32_0 : i32, i32
  }
  func.func @transform_3(%arg0: i32, %arg1: i32) -> (i32, i32) {
    %c0_i32 = arith.constant 0 : i32
    %c0_i32_0 = arith.constant 0 : i32
    return %arg1, %c0_i32 : i32, i32
  }
  func.func @transform_4(%arg0: i32, %arg1: i32) -> (i32, i32) {
    %c0_i32 = arith.constant 0 : i32
    %c0_i32_0 = arith.constant 0 : i32
    return %arg1, %c0_i32 : i32, i32
  }
  func.func @transform_5(%arg0: i32, %arg1: i32) -> (i32, i32, i32) {
    %c0_i32 = arith.constant 0 : i32
    %c0_i32_0 = arith.constant 0 : i32
    return %arg0, %arg1, %c0_i32 : i32, i32, i32
  }
}

module attributes {stable_mosaic.version = 11 : i64} {
  func.func @_ffn_ln_kernel(%arg0: i32, %arg1: i32, %arg2: memref<1x8x32xf32, #tpu.memory_space<vmem>>, %arg3: memref<32x128xbf16, #tpu.memory_space<vmem>>, %arg4: memref<1x128xf32, #tpu.memory_space<vmem>>, %arg5: memref<128x32xbf16, #tpu.memory_space<vmem>>, %arg6: memref<1x32xf32, #tpu.memory_space<vmem>>, %arg7: memref<1x32xf32, #tpu.memory_space<vmem>>, %arg8: memref<1x32xf32, #tpu.memory_space<vmem>>, %arg9: memref<1x8x32xf32, #tpu.memory_space<vmem>>) attributes {dimension_semantics = [#tpu.dimension_semantics<parallel>, #tpu.dimension_semantics<parallel>], iteration_bounds = array<i64: 2, 1>, scalar_prefetch = 0 : i64, scratch_operands = 0 : i64, tpu.core_type = #tpu.core_type<tc>, window_params = [{transform_indices = @transform_0, window_bounds = array<i64: 1, 8, 32>}, {pipeline_mode = #tpu.pipeline_mode<synchronous>, transform_indices = @transform_1, window_bounds = array<i64: 32, 128>}, {pipeline_mode = #tpu.pipeline_mode<synchronous>, transform_indices = @transform_2, window_bounds = array<i64: 1, 128>}, {pipeline_mode = #tpu.pipeline_mode<synchronous>, transform_indices = @transform_3, window_bounds = array<i64: 128, 32>}, {pipeline_mode = #tpu.pipeline_mode<synchronous>, transform_indices = @transform_4, window_bounds = array<i64: 1, 32>}, {pipeline_mode = #tpu.pipeline_mode<synchronous>, transform_indices = @transform_5, window_bounds = array<i64: 1, 32>}, {pipeline_mode = #tpu.pipeline_mode<synchronous>, transform_indices = @transform_6, window_bounds = array<i64: 1, 32>}, {transform_indices = @transform_7, window_bounds = array<i64: 1, 8, 32>}]} {
    %c0 = arith.constant 0 : index
    %c0_0 = arith.constant 0 : index
    %c0_1 = arith.constant 0 : index
    %0 = vector.load %arg2[%c0, %c0_0, %c0_1] : memref<1x8x32xf32, #tpu.memory_space<vmem>>, vector<1x8x32xf32>
    %1 = vector.shape_cast %0 : vector<1x8x32xf32> to vector<8x32xf32>
    %2 = arith.truncf %1 : vector<8x32xf32> to vector<8x32xbf16>
    %c0_2 = arith.constant 0 : index
    %c0_3 = arith.constant 0 : index
    %3 = vector.load %arg3[%c0_2, %c0_3] : memref<32x128xbf16, #tpu.memory_space<vmem>>, vector<32x128xbf16>
    %cst = arith.constant dense<0.000000e+00> : vector<8x128xf32>
    %4 = tpu.matmul %2, %3, %cst {dimension_numbers = #tpu.dot_dimension_numbers<[1], [0], [0], [1], [0, 0, 1, 1], [], []>} : vector<8x32xbf16>, vector<32x128xbf16>, vector<8x128xf32> -> vector<8x128xf32>
    %c0_4 = arith.constant 0 : index
    %c0_5 = arith.constant 0 : index
    %5 = vector.load %arg4[%c0_4, %c0_5] : memref<1x128xf32, #tpu.memory_space<vmem>>, vector<1x128xf32>
    %6 = vector.broadcast %5 : vector<1x128xf32> to vector<8x128xf32>
    %7 = arith.addf %4, %6 : vector<8x128xf32>
    %cst_6 = arith.constant 0.000000e+00 : f32
    %8 = vector.broadcast %cst_6 : f32 to vector<8x128xf32>
    %9 = arith.maximumf %7, %8 : vector<8x128xf32>
    %10 = arith.truncf %9 : vector<8x128xf32> to vector<8x128xbf16>
    %c0_7 = arith.constant 0 : index
    %c0_8 = arith.constant 0 : index
    %11 = vector.load %arg5[%c0_7, %c0_8] : memref<128x32xbf16, #tpu.memory_space<vmem>>, vector<128x32xbf16>
    %cst_9 = arith.constant dense<0.000000e+00> : vector<8x32xf32>
    %12 = tpu.matmul %10, %11, %cst_9 {dimension_numbers = #tpu.dot_dimension_numbers<[1], [0], [0], [1], [0, 0, 1, 1], [], []>} : vector<8x128xbf16>, vector<128x32xbf16>, vector<8x32xf32> -> vector<8x32xf32>
    %13 = arith.addf %1, %12 : vector<8x32xf32>
    %c0_10 = arith.constant 0 : index
    %c0_11 = arith.constant 0 : index
    %14 = vector.load %arg6[%c0_10, %c0_11] : memref<1x32xf32, #tpu.memory_space<vmem>>, vector<1x32xf32>
    %15 = vector.broadcast %14 : vector<1x32xf32> to vector<8x32xf32>
    %16 = arith.addf %13, %15 : vector<8x32xf32>
    %cst_12 = arith.constant dense<0.000000e+00> : vector<8xf32>
    %17 = vector.multi_reduction <add>, %16, %cst_12 [1] : vector<8x32xf32> to vector<8xf32>
    %18 = vector.shape_cast %17 : vector<8xf32> to vector<8x1xf32>
    %cst_13 = arith.constant 3.200000e+01 : f32
    %19 = vector.broadcast %cst_13 : f32 to vector<8x1xf32>
    %20 = arith.divf %18, %19 : vector<8x1xf32>
    %21 = vector.broadcast %20 : vector<8x1xf32> to vector<8x32xf32>
    %22 = arith.subf %16, %21 : vector<8x32xf32>
    %23 = arith.mulf %22, %22 : vector<8x32xf32>
    %cst_14 = arith.constant dense<0.000000e+00> : vector<8xf32>
    %24 = vector.multi_reduction <add>, %23, %cst_14 [1] : vector<8x32xf32> to vector<8xf32>
    %25 = vector.shape_cast %24 : vector<8xf32> to vector<8x1xf32>
    %cst_15 = arith.constant 3.200000e+01 : f32
    %26 = vector.broadcast %cst_15 : f32 to vector<8x1xf32>
    %27 = arith.divf %25, %26 : vector<8x1xf32>
    %cst_16 = arith.constant 9.99999974E-6 : f32
    %28 = vector.broadcast %cst_16 : f32 to vector<8x1xf32>
    %29 = arith.addf %27, %28 : vector<8x1xf32>
    %30 = math.rsqrt %29 : vector<8x1xf32>
    %31 = vector.broadcast %30 : vector<8x1xf32> to vector<8x32xf32>
    %32 = arith.mulf %22, %31 : vector<8x32xf32>
    %c0_17 = arith.constant 0 : index
    %c0_18 = arith.constant 0 : index
    %33 = vector.load %arg7[%c0_17, %c0_18] : memref<1x32xf32, #tpu.memory_space<vmem>>, vector<1x32xf32>
    %34 = vector.broadcast %33 : vector<1x32xf32> to vector<8x32xf32>
    %35 = arith.mulf %32, %34 : vector<8x32xf32>
    %c0_19 = arith.constant 0 : index
    %c0_20 = arith.constant 0 : index
    %36 = vector.load %arg8[%c0_19, %c0_20] : memref<1x32xf32, #tpu.memory_space<vmem>>, vector<1x32xf32>
    %37 = vector.broadcast %36 : vector<1x32xf32> to vector<8x32xf32>
    %38 = arith.addf %35, %37 : vector<8x32xf32>
    %c0_21 = arith.constant 0 : index
    %c0_22 = arith.constant 0 : index
    %c0_23 = arith.constant 0 : index
    %39 = vector.load %arg9[%c0_21, %c0_22, %c0_23] : memref<1x8x32xf32, #tpu.memory_space<vmem>>, vector<1x8x32xf32>
    %40 = vector.shape_cast %39 : vector<1x8x32xf32> to vector<8x32xf32>
    %41 = vector.shape_cast %38 : vector<8x32xf32> to vector<1x8x32xf32>
    tpu.vector_store %arg9[%c0_21, %c0_22, %c0_23], %41 {strides = array<i32>} : memref<1x8x32xf32, #tpu.memory_space<vmem>>, vector<1x8x32xf32>,
    return
  }
  func.func @transform_0(%arg0: i32, %arg1: i32) -> (i32, i32, i32) {
    %c0_i32 = arith.constant 0 : i32
    %c0_i32_0 = arith.constant 0 : i32
    return %arg0, %arg1, %c0_i32 : i32, i32, i32
  }
  func.func @transform_1(%arg0: i32, %arg1: i32) -> (i32, i32) {
    %c0_i32 = arith.constant 0 : i32
    %c0_i32_0 = arith.constant 0 : i32
    %c0_i32_1 = arith.constant 0 : i32
    return %c0_i32, %c0_i32_0 : i32, i32
  }
  func.func @transform_2(%arg0: i32, %arg1: i32) -> (i32, i32) {
    %c0_i32 = arith.constant 0 : i32
    %c0_i32_0 = arith.constant 0 : i32
    %c0_i32_1 = arith.constant 0 : i32
    return %c0_i32, %c0_i32_0 : i32, i32
  }
  func.func @transform_3(%arg0: i32, %arg1: i32) -> (i32, i32) {
    %c0_i32 = arith.constant 0 : i32
    %c0_i32_0 = arith.constant 0 : i32
    %c0_i32_1 = arith.constant 0 : i32
    return %c0_i32, %c0_i32_0 : i32, i32
  }
  func.func @transform_4(%arg0: i32, %arg1: i32) -> (i32, i32) {
    %c0_i32 = arith.constant 0 : i32
    %c0_i32_0 = arith.constant 0 : i32
    %c0_i32_1 = arith.constant 0 : i32
    return %c0_i32, %c0_i32_0 : i32, i32
  }
  func.func @transform_5(%arg0: i32, %arg1: i32) -> (i32, i32) {
    %c0_i32 = arith.constant 0 : i32
    %c0_i32_0 = arith.constant 0 : i32
    %c0_i32_1 = arith.constant 0 : i32
    return %c0_i32, %c0_i32_0 : i32, i32
  }
  func.func @transform_6(%arg0: i32, %arg1: i32) -> (i32, i32) {
    %c0_i32 = arith.constant 0 : i32
    %c0_i32_0 = arith.constant 0 : i32
    %c0_i32_1 = arith.constant 0 : i32
    return %c0_i32, %c0_i32_0 : i32, i32
  }
  func.func @transform_7(%arg0: i32, %arg1: i32) -> (i32, i32, i32) {
    %c0_i32 = arith.constant 0 : i32
    %c0_i32_0 = arith.constant 0 : i32
    return %arg0, %arg1, %c0_i32 : i32, i32, i32
  }
}

module attributes {stable_mosaic.version = 11 : i64} {
  func.func @_attn_ln_kernel(%arg0: i32, %arg1: i32, %arg2: memref<1x8x32xf32, #tpu.memory_space<vmem>>, %arg3: memref<32x32xbf16, #tpu.memory_space<vmem>>, %arg4: memref<1x32xf32, #tpu.memory_space<vmem>>, %arg5: memref<32x64xbf16, #tpu.memory_space<vmem>>, %arg6: memref<1x64xf32, #tpu.memory_space<vmem>>, %arg7: memref<32x32xbf16, #tpu.memory_space<vmem>>, %arg8: memref<1x32xf32, #tpu.memory_space<vmem>>, %arg9: memref<1x32xf32, #tpu.memory_space<vmem>>, %arg10: memref<1x32xf32, #tpu.memory_space<vmem>>, %arg11: memref<8x16xf32, #tpu.memory_space<vmem>>, %arg12: memref<8x16xf32, #tpu.memory_space<vmem>>, %arg13: memref<1x8x32xf32, #tpu.memory_space<vmem>>, %arg14: memref<8x64xbf16, #tpu.memory_space<vmem>>) attributes {dimension_semantics = [#tpu.dimension_semantics<parallel>, #tpu.dimension_semantics<arbitrary>], iteration_bounds = array<i64: 2, 1>, scalar_prefetch = 0 : i64, scratch_operands = 1 : i64, tpu.core_type = #tpu.core_type<tc>, window_params = [{transform_indices = @transform_0, window_bounds = array<i64: 1, 8, 32>}, {pipeline_mode = #tpu.pipeline_mode<synchronous>, transform_indices = @transform_1, window_bounds = array<i64: 32, 32>}, {pipeline_mode = #tpu.pipeline_mode<synchronous>, transform_indices = @transform_2, window_bounds = array<i64: 1, 32>}, {pipeline_mode = #tpu.pipeline_mode<synchronous>, transform_indices = @transform_3, window_bounds = array<i64: 32, 64>}, {pipeline_mode = #tpu.pipeline_mode<synchronous>, transform_indices = @transform_4, window_bounds = array<i64: 1, 64>}, {pipeline_mode = #tpu.pipeline_mode<synchronous>, transform_indices = @transform_5, window_bounds = array<i64: 32, 32>}, {pipeline_mode = #tpu.pipeline_mode<synchronous>, transform_indices = @transform_6, window_bounds = array<i64: 1, 32>}, {pipeline_mode = #tpu.pipeline_mode<synchronous>, transform_indices = @transform_7, window_bounds = array<i64: 1, 32>}, {pipeline_mode = #tpu.pipeline_mode<synchronous>, transform_indices = @transform_8, window_bounds = array<i64: 1, 32>}, {pipeline_mode = #tpu.pipeline_mode<synchronous>, transform_indices = @transform_9, window_bounds = array<i64: 8, 16>}, {pipeline_mode = #tpu.pipeline_mode<synchronous>, transform_indices = @transform_10, window_bounds = array<i64: 8, 16>}, {transform_indices = @transform_11, window_bounds = array<i64: 1, 8, 32>}]} {
    %c0_i32 = arith.constant 0 : i32
    %0 = arith.cmpi eq, %arg1, %c0_i32 : i32
    %1 = arith.extui %0 : i1 to i32
    %c0_i32_0 = arith.constant 0 : i32
    %2 = arith.cmpi ne, %1, %c0_i32_0 : i32
    scf.if %2 {
      %c0_44 = arith.constant 0 : index
      %c0_45 = arith.constant 0 : index
      %c0_46 = arith.constant 0 : index
      %135 = vector.load %arg2[%c0_44, %c0_45, %c0_46] : memref<1x8x32xf32, #tpu.memory_space<vmem>>, vector<1x8x32xf32>
      %136 = vector.shape_cast %135 : vector<1x8x32xf32> to vector<8x32xf32>
      %137 = arith.truncf %136 : vector<8x32xf32> to vector<8x32xbf16>
      %c0_47 = arith.constant 0 : index
      %c0_48 = arith.constant 0 : index
      %138 = vector.load %arg5[%c0_47, %c0_48] : memref<32x64xbf16, #tpu.memory_space<vmem>>, vector<32x64xbf16>
      %cst_49 = arith.constant dense<0.000000e+00> : vector<8x64xf32>
      %139 = tpu.matmul %137, %138, %cst_49 {dimension_numbers = #tpu.dot_dimension_numbers<[1], [0], [0], [1], [0, 0, 1, 1], [], []>} : vector<8x32xbf16>, vector<32x64xbf16>, vector<8x64xf32> -> vector<8x64xf32>
      %c0_50 = arith.constant 0 : index
      %c0_51 = arith.constant 0 : index
      %140 = vector.load %arg6[%c0_50, %c0_51] : memref<1x64xf32, #tpu.memory_space<vmem>>, vector<1x64xf32>
      %141 = vector.broadcast %140 : vector<1x64xf32> to vector<8x64xf32>
      %142 = arith.addf %139, %141 : vector<8x64xf32>
      %143 = vector.extract_strided_slice %142 {offsets = [0, 0], sizes = [8, 32], strides = [1, 1]} : vector<8x64xf32> to vector<8x32xf32>
      %144 = vector.extract_strided_slice %142 {offsets = [0, 32], sizes = [8, 32], strides = [1, 1]} : vector<8x64xf32> to vector<8x32xf32>
      %c0_52 = arith.constant 0 : index
      %c0_53 = arith.constant 0 : index
      %145 = vector.load %arg11[%c0_52, %c0_53] : memref<8x16xf32, #tpu.memory_space<vmem>>, vector<8x16xf32>
      %c0_54 = arith.constant 0 : index
      %c0_55 = arith.constant 0 : index
      %146 = vector.load %arg12[%c0_54, %c0_55] : memref<8x16xf32, #tpu.memory_space<vmem>>, vector<8x16xf32>
      %147 = vector.extract_strided_slice %143 {offsets = [0, 0], sizes = [8, 16], strides = [1, 1]} : vector<8x32xf32> to vector<8x16xf32>
      %148 = vector.extract_strided_slice %143 {offsets = [0, 16], sizes = [8, 16], strides = [1, 1]} : vector<8x32xf32> to vector<8x16xf32>
      %149 = arith.mulf %147, %145 : vector<8x16xf32>
      %150 = arith.mulf %148, %146 : vector<8x16xf32>
      %151 = arith.subf %149, %150 : vector<8x16xf32>
      %152 = arith.truncf %151 : vector<8x16xf32> to vector<8x16xbf16>
      %153 = arith.mulf %148, %145 : vector<8x16xf32>
      %154 = arith.mulf %147, %146 : vector<8x16xf32>
      %155 = arith.addf %153, %154 : vector<8x16xf32>
      %156 = arith.truncf %155 : vector<8x16xf32> to vector<8x16xbf16>
      %157 = vector.extract_strided_slice %152 {offsets = [0, 0], sizes = [8, 4], strides = [1, 1]} : vector<8x16xbf16> to vector<8x4xbf16>
      %158 = vector.extract_strided_slice %156 {offsets = [0, 0], sizes = [8, 4], strides = [1, 1]} : vector<8x16xbf16> to vector<8x4xbf16>
      %159 = vector.extract_strided_slice %152 {offsets = [0, 4], sizes = [8, 4], strides = [1, 1]} : vector<8x16xbf16> to vector<8x4xbf16>
      %160 = vector.extract_strided_slice %156 {offsets = [0, 4], sizes = [8, 4], strides = [1, 1]} : vector<8x16xbf16> to vector<8x4xbf16>
      %161 = vector.extract_strided_slice %152 {offsets = [0, 8], sizes = [8, 4], strides = [1, 1]} : vector<8x16xbf16> to vector<8x4xbf16>
      %162 = vector.extract_strided_slice %156 {offsets = [0, 8], sizes = [8, 4], strides = [1, 1]} : vector<8x16xbf16> to vector<8x4xbf16>
      %163 = vector.extract_strided_slice %152 {offsets = [0, 12], sizes = [8, 4], strides = [1, 1]} : vector<8x16xbf16> to vector<8x4xbf16>
      %164 = vector.extract_strided_slice %156 {offsets = [0, 12], sizes = [8, 4], strides = [1, 1]} : vector<8x16xbf16> to vector<8x4xbf16>
      %165 = arith.truncf %144 : vector<8x32xf32> to vector<8x32xbf16>
      %166 = tpu.concatenate %157, %158, %159, %160, %161, %162, %163, %164, %165 in 1 : vector<8x4xbf16>, vector<8x4xbf16>, vector<8x4xbf16>, vector<8x4xbf16>, vector<8x4xbf16>, vector<8x4xbf16>, vector<8x4xbf16>, vector<8x4xbf16>, vector<8x32xbf16> -> vector<8x64xbf16>
      %c0_56 = arith.constant 0 : index
      %c0_57 = arith.constant 0 : index
      %167 = vector.load %arg14[%c0_56, %c0_57] : memref<8x64xbf16, #tpu.memory_space<vmem>>, vector<8x64xbf16>
      tpu.vector_store %arg14[%c0_56, %c0_57], %166 {strides = array<i32>} : memref<8x64xbf16, #tpu.memory_space<vmem>>, vector<8x64xbf16>,
    } else {
    }
    %c8_i32 = arith.constant 8 : i32
    %3 = arith.muli %arg1, %c8_i32 : i32
    %4 = tpu.assume_multiple %3, 8 : i32
    %c0 = arith.constant 0 : index
    %5 = arith.index_cast %4 : i32 to index
    %c0_1 = arith.constant 0 : index
    %6 = vector.load %arg2[%c0, %5, %c0_1] : memref<1x8x32xf32, #tpu.memory_space<vmem>>, vector<1x8x32xf32>
    %7 = vector.shape_cast %6 : vector<1x8x32xf32> to vector<8x32xf32>
    %8 = arith.truncf %7 : vector<8x32xf32> to vector<8x32xbf16>
    %c0_2 = arith.constant 0 : index
    %c0_3 = arith.constant 0 : index
    %9 = vector.load %arg3[%c0_2, %c0_3] : memref<32x32xbf16, #tpu.memory_space<vmem>>, vector<32x32xbf16>
    %cst = arith.constant dense<0.000000e+00> : vector<8x32xf32>
    %10 = tpu.matmul %8, %9, %cst {dimension_numbers = #tpu.dot_dimension_numbers<[1], [0], [0], [1], [0, 0, 1, 1], [], []>} : vector<8x32xbf16>, vector<32x32xbf16>, vector<8x32xf32> -> vector<8x32xf32>
    %c0_4 = arith.constant 0 : index
    %c0_5 = arith.constant 0 : index
    %11 = vector.load %arg4[%c0_4, %c0_5] : memref<1x32xf32, #tpu.memory_space<vmem>>, vector<1x32xf32>
    %12 = vector.broadcast %11 : vector<1x32xf32> to vector<8x32xf32>
    %13 = arith.addf %10, %12 : vector<8x32xf32>
    %14 = arith.index_cast %4 : i32 to index
    %c0_6 = arith.constant 0 : index
    %15 = vector.load %arg11[%14, %c0_6] : memref<8x16xf32, #tpu.memory_space<vmem>>, vector<8x16xf32>
    %16 = arith.index_cast %4 : i32 to index
    %c0_7 = arith.constant 0 : index
    %17 = vector.load %arg12[%16, %c0_7] : memref<8x16xf32, #tpu.memory_space<vmem>>, vector<8x16xf32>
    %18 = vector.extract_strided_slice %13 {offsets = [0, 0], sizes = [8, 16], strides = [1, 1]} : vector<8x32xf32> to vector<8x16xf32>
    %19 = vector.extract_strided_slice %13 {offsets = [0, 16], sizes = [8, 16], strides = [1, 1]} : vector<8x32xf32> to vector<8x16xf32>
    %20 = arith.mulf %18, %15 : vector<8x16xf32>
    %21 = arith.mulf %19, %17 : vector<8x16xf32>
    %22 = arith.subf %20, %21 : vector<8x16xf32>
    %23 = arith.truncf %22 : vector<8x16xf32> to vector<8x16xbf16>
    %24 = arith.mulf %19, %15 : vector<8x16xf32>
    %25 = arith.mulf %18, %17 : vector<8x16xf32>
    %26 = arith.addf %24, %25 : vector<8x16xf32>
    %27 = arith.truncf %26 : vector<8x16xf32> to vector<8x16xbf16>
    %c0_8 = arith.constant 0 : index
    %c0_9 = arith.constant 0 : index
    %28 = vector.load %arg14[%c0_8, %c0_9] : memref<8x64xbf16, #tpu.memory_space<vmem>>, vector<8x32xbf16>
    %c0_10 = arith.constant 0 : index
    %c32 = arith.constant 32 : index
    %29 = vector.load %arg14[%c0_10, %c32] : memref<8x64xbf16, #tpu.memory_space<vmem>>, vector<8x32xbf16>
    %30 = vector.extract_strided_slice %23 {offsets = [0, 0], sizes = [8, 4], strides = [1, 1]} : vector<8x16xbf16> to vector<8x4xbf16>
    %31 = vector.extract_strided_slice %27 {offsets = [0, 0], sizes = [8, 4], strides = [1, 1]} : vector<8x16xbf16> to vector<8x4xbf16>
    %32 = tpu.concatenate %30, %31 in 1 : vector<8x4xbf16>, vector<8x4xbf16> -> vector<8x8xbf16>
    %33 = vector.extract_strided_slice %28 {offsets = [0, 0], sizes = [8, 8], strides = [1, 1]} : vector<8x32xbf16> to vector<8x8xbf16>
    %cst_11 = arith.constant dense<0.000000e+00> : vector<8x8xf32>
    %34 = tpu.matmul %32, %33, %cst_11 {dimension_numbers = #tpu.dot_dimension_numbers<[1], [1], [0], [0], [0, 0, 1, 0], [], []>} : vector<8x8xbf16>, vector<8x8xbf16>, vector<8x8xf32> -> vector<8x8xf32>
    %cst_12 = arith.constant dense<0xFF800000> : vector<8xf32>
    %35 = vector.multi_reduction <maximumf>, %34, %cst_12 [1] : vector<8x8xf32> to vector<8xf32>
    %36 = vector.shape_cast %35 : vector<8xf32> to vector<8x1xf32>
    %37 = vector.broadcast %36 : vector<8x1xf32> to vector<8x8xf32>
    %38 = arith.subf %34, %37 : vector<8x8xf32>
    %39 = math.exp %38 : vector<8x8xf32>
    %cst_13 = arith.constant dense<0.000000e+00> : vector<8xf32>
    %40 = vector.multi_reduction <add>, %39, %cst_13 [1] : vector<8x8xf32> to vector<8xf32>
    %41 = vector.shape_cast %40 : vector<8xf32> to vector<8x1xf32>
    %42 = tpu.reciprocal %41 {approx = true} : vector<8x1xf32> -> vector<8x1xf32>
    %43 = vector.broadcast %42 : vector<8x1xf32> to vector<8x8xf32>
    %44 = arith.mulf %39, %43 : vector<8x8xf32>
    %45 = arith.truncf %44 : vector<8x8xf32> to vector<8x8xbf16>
    %46 = vector.extract_strided_slice %29 {offsets = [0, 0], sizes = [8, 8], strides = [1, 1]} : vector<8x32xbf16> to vector<8x8xbf16>
    %cst_14 = arith.constant dense<0.000000e+00> : vector<8x8xf32>
    %47 = tpu.matmul %45, %46, %cst_14 {dimension_numbers = #tpu.dot_dimension_numbers<[1], [0], [0], [1], [0, 0, 1, 1], [], []>} : vector<8x8xbf16>, vector<8x8xbf16>, vector<8x8xf32> -> vector<8x8xf32>
    %48 = vector.extract_strided_slice %23 {offsets = [0, 4], sizes = [8, 4], strides = [1, 1]} : vector<8x16xbf16> to vector<8x4xbf16>
    %49 = vector.extract_strided_slice %27 {offsets = [0, 4], sizes = [8, 4], strides = [1, 1]} : vector<8x16xbf16> to vector<8x4xbf16>
    %50 = tpu.concatenate %48, %49 in 1 : vector<8x4xbf16>, vector<8x4xbf16> -> vector<8x8xbf16>
    %51 = vector.extract_strided_slice %28 {offsets = [0, 8], sizes = [8, 8], strides = [1, 1]} : vector<8x32xbf16> to vector<8x8xbf16>
    %cst_15 = arith.constant dense<0.000000e+00> : vector<8x8xf32>
    %52 = tpu.matmul %50, %51, %cst_15 {dimension_numbers = #tpu.dot_dimension_numbers<[1], [1], [0], [0], [0, 0, 1, 0], [], []>} : vector<8x8xbf16>, vector<8x8xbf16>, vector<8x8xf32> -> vector<8x8xf32>
    %cst_16 = arith.constant dense<0xFF800000> : vector<8xf32>
    %53 = vector.multi_reduction <maximumf>, %52, %cst_16 [1] : vector<8x8xf32> to vector<8xf32>
    %54 = vector.shape_cast %53 : vector<8xf32> to vector<8x1xf32>
    %55 = vector.broadcast %54 : vector<8x1xf32> to vector<8x8xf32>
    %56 = arith.subf %52, %55 : vector<8x8xf32>
    %57 = math.exp %56 : vector<8x8xf32>
    %cst_17 = arith.constant dense<0.000000e+00> : vector<8xf32>
    %58 = vector.multi_reduction <add>, %57, %cst_17 [1] : vector<8x8xf32> to vector<8xf32>
    %59 = vector.shape_cast %58 : vector<8xf32> to vector<8x1xf32>
    %60 = tpu.reciprocal %59 {approx = true} : vector<8x1xf32> -> vector<8x1xf32>
    %61 = vector.broadcast %60 : vector<8x1xf32> to vector<8x8xf32>
    %62 = arith.mulf %57, %61 : vector<8x8xf32>
    %63 = arith.truncf %62 : vector<8x8xf32> to vector<8x8xbf16>
    %64 = vector.extract_strided_slice %29 {offsets = [0, 8], sizes = [8, 8], strides = [1, 1]} : vector<8x32xbf16> to vector<8x8xbf16>
    %cst_18 = arith.constant dense<0.000000e+00> : vector<8x8xf32>
    %65 = tpu.matmul %63, %64, %cst_18 {dimension_numbers = #tpu.dot_dimension_numbers<[1], [0], [0], [1], [0, 0, 1, 1], [], []>} : vector<8x8xbf16>, vector<8x8xbf16>, vector<8x8xf32> -> vector<8x8xf32>
    %66 = vector.extract_strided_slice %23 {offsets = [0, 8], sizes = [8, 4], strides = [1, 1]} : vector<8x16xbf16> to vector<8x4xbf16>
    %67 = vector.extract_strided_slice %27 {offsets = [0, 8], sizes = [8, 4], strides = [1, 1]} : vector<8x16xbf16> to vector<8x4xbf16>
    %68 = tpu.concatenate %66, %67 in 1 : vector<8x4xbf16>, vector<8x4xbf16> -> vector<8x8xbf16>
    %69 = vector.extract_strided_slice %28 {offsets = [0, 16], sizes = [8, 8], strides = [1, 1]} : vector<8x32xbf16> to vector<8x8xbf16>
    %cst_19 = arith.constant dense<0.000000e+00> : vector<8x8xf32>
    %70 = tpu.matmul %68, %69, %cst_19 {dimension_numbers = #tpu.dot_dimension_numbers<[1], [1], [0], [0], [0, 0, 1, 0], [], []>} : vector<8x8xbf16>, vector<8x8xbf16>, vector<8x8xf32> -> vector<8x8xf32>
    %cst_20 = arith.constant dense<0xFF800000> : vector<8xf32>
    %71 = vector.multi_reduction <maximumf>, %70, %cst_20 [1] : vector<8x8xf32> to vector<8xf32>
    %72 = vector.shape_cast %71 : vector<8xf32> to vector<8x1xf32>
    %73 = vector.broadcast %72 : vector<8x1xf32> to vector<8x8xf32>
    %74 = arith.subf %70, %73 : vector<8x8xf32>
    %75 = math.exp %74 : vector<8x8xf32>
    %cst_21 = arith.constant dense<0.000000e+00> : vector<8xf32>
    %76 = vector.multi_reduction <add>, %75, %cst_21 [1] : vector<8x8xf32> to vector<8xf32>
    %77 = vector.shape_cast %76 : vector<8xf32> to vector<8x1xf32>
    %78 = tpu.reciprocal %77 {approx = true} : vector<8x1xf32> -> vector<8x1xf32>
    %79 = vector.broadcast %78 : vector<8x1xf32> to vector<8x8xf32>
    %80 = arith.mulf %75, %79 : vector<8x8xf32>
    %81 = arith.truncf %80 : vector<8x8xf32> to vector<8x8xbf16>
    %82 = vector.extract_strided_slice %29 {offsets = [0, 16], sizes = [8, 8], strides = [1, 1]} : vector<8x32xbf16> to vector<8x8xbf16>
    %cst_22 = arith.constant dense<0.000000e+00> : vector<8x8xf32>
    %83 = tpu.matmul %81, %82, %cst_22 {dimension_numbers = #tpu.dot_dimension_numbers<[1], [0], [0], [1], [0, 0, 1, 1], [], []>} : vector<8x8xbf16>, vector<8x8xbf16>, vector<8x8xf32> -> vector<8x8xf32>
    %84 = vector.extract_strided_slice %23 {offsets = [0, 12], sizes = [8, 4], strides = [1, 1]} : vector<8x16xbf16> to vector<8x4xbf16>
    %85 = vector.extract_strided_slice %27 {offsets = [0, 12], sizes = [8, 4], strides = [1, 1]} : vector<8x16xbf16> to vector<8x4xbf16>
    %86 = tpu.concatenate %84, %85 in 1 : vector<8x4xbf16>, vector<8x4xbf16> -> vector<8x8xbf16>
    %87 = vector.extract_strided_slice %28 {offsets = [0, 24], sizes = [8, 8], strides = [1, 1]} : vector<8x32xbf16> to vector<8x8xbf16>
    %cst_23 = arith.constant dense<0.000000e+00> : vector<8x8xf32>
    %88 = tpu.matmul %86, %87, %cst_23 {dimension_numbers = #tpu.dot_dimension_numbers<[1], [1], [0], [0], [0, 0, 1, 0], [], []>} : vector<8x8xbf16>, vector<8x8xbf16>, vector<8x8xf32> -> vector<8x8xf32>
    %cst_24 = arith.constant dense<0xFF800000> : vector<8xf32>
    %89 = vector.multi_reduction <maximumf>, %88, %cst_24 [1] : vector<8x8xf32> to vector<8xf32>
    %90 = vector.shape_cast %89 : vector<8xf32> to vector<8x1xf32>
    %91 = vector.broadcast %90 : vector<8x1xf32> to vector<8x8xf32>
    %92 = arith.subf %88, %91 : vector<8x8xf32>
    %93 = math.exp %92 : vector<8x8xf32>
    %cst_25 = arith.constant dense<0.000000e+00> : vector<8xf32>
    %94 = vector.multi_reduction <add>, %93, %cst_25 [1] : vector<8x8xf32> to vector<8xf32>
    %95 = vector.shape_cast %94 : vector<8xf32> to vector<8x1xf32>
    %96 = tpu.reciprocal %95 {approx = true} : vector<8x1xf32> -> vector<8x1xf32>
    %97 = vector.broadcast %96 : vector<8x1xf32> to vector<8x8xf32>
    %98 = arith.mulf %93, %97 : vector<8x8xf32>
    %99 = arith.truncf %98 : vector<8x8xf32> to vector<8x8xbf16>
    %100 = vector.extract_strided_slice %29 {offsets = [0, 24], sizes = [8, 8], strides = [1, 1]} : vector<8x32xbf16> to vector<8x8xbf16>
    %cst_26 = arith.constant dense<0.000000e+00> : vector<8x8xf32>
    %101 = tpu.matmul %99, %100, %cst_26 {dimension_numbers = #tpu.dot_dimension_numbers<[1], [0], [0], [1], [0, 0, 1, 1], [], []>} : vector<8x8xbf16>, vector<8x8xbf16>, vector<8x8xf32> -> vector<8x8xf32>
    %102 = tpu.concatenate %47, %65, %83, %101 in 1 : vector<8x8xf32>, vector<8x8xf32>, vector<8x8xf32>, vector<8x8xf32> -> vector<8x32xf32>
    %103 = arith.truncf %102 : vector<8x32xf32> to vector<8x32xbf16>
    %c0_27 = arith.constant 0 : index
    %c0_28 = arith.constant 0 : index
    %104 = vector.load %arg7[%c0_27, %c0_28] : memref<32x32xbf16, #tpu.memory_space<vmem>>, vector<32x32xbf16>
    %cst_29 = arith.constant dense<0.000000e+00> : vector<8x32xf32>
    %105 = tpu.matmul %103, %104, %cst_29 {dimension_numbers = #tpu.dot_dimension_numbers<[1], [0], [0], [1], [0, 0, 1, 1], [], []>} : vector<8x32xbf16>, vector<32x32xbf16>, vector<8x32xf32> -> vector<8x32xf32>
    %c0_30 = arith.constant 0 : index
    %c0_31 = arith.constant 0 : index
    %106 = vector.load %arg8[%c0_30, %c0_31] : memref<1x32xf32, #tpu.memory_space<vmem>>, vector<1x32xf32>
    %107 = vector.broadcast %106 : vector<1x32xf32> to vector<8x32xf32>
    %108 = arith.addf %105, %107 : vector<8x32xf32>
    %109 = arith.addf %7, %108 : vector<8x32xf32>
    %cst_32 = arith.constant dense<0.000000e+00> : vector<8xf32>
    %110 = vector.multi_reduction <add>, %109, %cst_32 [1] : vector<8x32xf32> to vector<8xf32>
    %111 = vector.shape_cast %110 : vector<8xf32> to vector<8x1xf32>
    %cst_33 = arith.constant 3.200000e+01 : f32
    %112 = vector.broadcast %cst_33 : f32 to vector<8x1xf32>
    %113 = arith.divf %111, %112 : vector<8x1xf32>
    %114 = vector.broadcast %113 : vector<8x1xf32> to vector<8x32xf32>
    %115 = arith.subf %109, %114 : vector<8x32xf32>
    %116 = arith.mulf %115, %115 : vector<8x32xf32>
    %cst_34 = arith.constant dense<0.000000e+00> : vector<8xf32>
    %117 = vector.multi_reduction <add>, %116, %cst_34 [1] : vector<8x32xf32> to vector<8xf32>
    %118 = vector.shape_cast %117 : vector<8xf32> to vector<8x1xf32>
    %cst_35 = arith.constant 3.200000e+01 : f32
    %119 = vector.broadcast %cst_35 : f32 to vector<8x1xf32>
    %120 = arith.divf %118, %119 : vector<8x1xf32>
    %cst_36 = arith.constant 9.99999974E-6 : f32
    %121 = vector.broadcast %cst_36 : f32 to vector<8x1xf32>
    %122 = arith.addf %120, %121 : vector<8x1xf32>
    %123 = math.rsqrt %122 : vector<8x1xf32>
    %124 = vector.broadcast %123 : vector<8x1xf32> to vector<8x32xf32>
    %125 = arith.mulf %115, %124 : vector<8x32xf32>
    %c0_37 = arith.constant 0 : index
    %c0_38 = arith.constant 0 : index
    %126 = vector.load %arg9[%c0_37, %c0_38] : memref<1x32xf32, #tpu.memory_space<vmem>>, vector<1x32xf32>
    %127 = vector.broadcast %126 : vector<1x32xf32> to vector<8x32xf32>
    %128 = arith.mulf %125, %127 : vector<8x32xf32>
    %c0_39 = arith.constant 0 : index
    %c0_40 = arith.constant 0 : index
    %129 = vector.load %arg10[%c0_39, %c0_40] : memref<1x32xf32, #tpu.memory_space<vmem>>, vector<1x32xf32>
    %130 = vector.broadcast %129 : vector<1x32xf32> to vector<8x32xf32>
    %131 = arith.addf %128, %130 : vector<8x32xf32>
    %c0_41 = arith.constant 0 : index
    %c0_42 = arith.constant 0 : index
    %c0_43 = arith.constant 0 : index
    %132 = vector.load %arg13[%c0_41, %c0_42, %c0_43] : memref<1x8x32xf32, #tpu.memory_space<vmem>>, vector<1x8x32xf32>
    %133 = vector.shape_cast %132 : vector<1x8x32xf32> to vector<8x32xf32>
    %134 = vector.shape_cast %131 : vector<8x32xf32> to vector<1x8x32xf32>
    tpu.vector_store %arg13[%c0_41, %c0_42, %c0_43], %134 {strides = array<i32>} : memref<1x8x32xf32, #tpu.memory_space<vmem>>, vector<1x8x32xf32>,
    return
  }
  func.func @transform_0(%arg0: i32, %arg1: i32) -> (i32, i32, i32) {
    %c0_i32 = arith.constant 0 : i32
    %c0_i32_0 = arith.constant 0 : i32
    %c0_i32_1 = arith.constant 0 : i32
    return %arg0, %c0_i32, %c0_i32_0 : i32, i32, i32
  }
  func.func @transform_1(%arg0: i32, %arg1: i32) -> (i32, i32) {
    %c0_i32 = arith.constant 0 : i32
    %c0_i32_0 = arith.constant 0 : i32
    %c0_i32_1 = arith.constant 0 : i32
    return %c0_i32, %c0_i32_0 : i32, i32
  }
  func.func @transform_2(%arg0: i32, %arg1: i32) -> (i32, i32) {
    %c0_i32 = arith.constant 0 : i32
    %c0_i32_0 = arith.constant 0 : i32
    %c0_i32_1 = arith.constant 0 : i32
    return %c0_i32, %c0_i32_0 : i32, i32
  }
  func.func @transform_3(%arg0: i32, %arg1: i32) -> (i32, i32) {
    %c0_i32 = arith.constant 0 : i32
    %c0_i32_0 = arith.constant 0 : i32
    %c0_i32_1 = arith.constant 0 : i32
    return %c0_i32, %c0_i32_0 : i32, i32
  }
  func.func @transform_4(%arg0: i32, %arg1: i32) -> (i32, i32) {
    %c0_i32 = arith.constant 0 : i32
    %c0_i32_0 = arith.constant 0 : i32
    %c0_i32_1 = arith.constant 0 : i32
    return %c0_i32, %c0_i32_0 : i32, i32
  }
  func.func @transform_5(%arg0: i32, %arg1: i32) -> (i32, i32) {
    %c0_i32 = arith.constant 0 : i32
    %c0_i32_0 = arith.constant 0 : i32
    %c0_i32_1 = arith.constant 0 : i32
    return %c0_i32, %c0_i32_0 : i32, i32
  }
  func.func @transform_6(%arg0: i32, %arg1: i32) -> (i32, i32) {
    %c0_i32 = arith.constant 0 : i32
    %c0_i32_0 = arith.constant 0 : i32
    %c0_i32_1 = arith.constant 0 : i32
    return %c0_i32, %c0_i32_0 : i32, i32
  }
  func.func @transform_7(%arg0: i32, %arg1: i32) -> (i32, i32) {
    %c0_i32 = arith.constant 0 : i32
    %c0_i32_0 = arith.constant 0 : i32
    %c0_i32_1 = arith.constant 0 : i32
    return %c0_i32, %c0_i32_0 : i32, i32
  }
  func.func @transform_8(%arg0: i32, %arg1: i32) -> (i32, i32) {
    %c0_i32 = arith.constant 0 : i32
    %c0_i32_0 = arith.constant 0 : i32
    %c0_i32_1 = arith.constant 0 : i32
    return %c0_i32, %c0_i32_0 : i32, i32
  }
  func.func @transform_9(%arg0: i32, %arg1: i32) -> (i32, i32) {
    %c0_i32 = arith.constant 0 : i32
    %c0_i32_0 = arith.constant 0 : i32
    %c0_i32_1 = arith.constant 0 : i32
    return %c0_i32, %c0_i32_0 : i32, i32
  }
  func.func @transform_10(%arg0: i32, %arg1: i32) -> (i32, i32) {
    %c0_i32 = arith.constant 0 : i32
    %c0_i32_0 = arith.constant 0 : i32
    %c0_i32_1 = arith.constant 0 : i32
    return %c0_i32, %c0_i32_0 : i32, i32
  }
  func.func @transform_11(%arg0: i32, %arg1: i32) -> (i32, i32, i32) {
    %c0_i32 = arith.constant 0 : i32
    %c0_i32_0 = arith.constant 0 : i32
    return %arg0, %arg1, %c0_i32 : i32, i32, i32
  }
}

module attributes {stable_mosaic.version = 11 : i64} {
  func.func @_attn_ln_kernel(%arg0: i32, %arg1: i32, %arg2: memref<1x8x32xf32, #tpu.memory_space<vmem>>, %arg3: memref<32x32xbf16, #tpu.memory_space<vmem>>, %arg4: memref<1x32xf32, #tpu.memory_space<vmem>>, %arg5: memref<32x64xbf16, #tpu.memory_space<vmem>>, %arg6: memref<1x64xf32, #tpu.memory_space<vmem>>, %arg7: memref<32x32xbf16, #tpu.memory_space<vmem>>, %arg8: memref<1x32xf32, #tpu.memory_space<vmem>>, %arg9: memref<1x32xf32, #tpu.memory_space<vmem>>, %arg10: memref<1x32xf32, #tpu.memory_space<vmem>>, %arg11: memref<8x16xf32, #tpu.memory_space<vmem>>, %arg12: memref<8x16xf32, #tpu.memory_space<vmem>>, %arg13: memref<1x8x32xf32, #tpu.memory_space<vmem>>, %arg14: memref<8x64xbf16, #tpu.memory_space<vmem>>) attributes {dimension_semantics = [#tpu.dimension_semantics<parallel>, #tpu.dimension_semantics<arbitrary>], iteration_bounds = array<i64: 2, 1>, scalar_prefetch = 0 : i64, scratch_operands = 1 : i64, tpu.core_type = #tpu.core_type<tc>, window_params = [{transform_indices = @transform_0, window_bounds = array<i64: 1, 8, 32>}, {pipeline_mode = #tpu.pipeline_mode<synchronous>, transform_indices = @transform_1, window_bounds = array<i64: 32, 32>}, {pipeline_mode = #tpu.pipeline_mode<synchronous>, transform_indices = @transform_2, window_bounds = array<i64: 1, 32>}, {pipeline_mode = #tpu.pipeline_mode<synchronous>, transform_indices = @transform_3, window_bounds = array<i64: 32, 64>}, {pipeline_mode = #tpu.pipeline_mode<synchronous>, transform_indices = @transform_4, window_bounds = array<i64: 1, 64>}, {pipeline_mode = #tpu.pipeline_mode<synchronous>, transform_indices = @transform_5, window_bounds = array<i64: 32, 32>}, {pipeline_mode = #tpu.pipeline_mode<synchronous>, transform_indices = @transform_6, window_bounds = array<i64: 1, 32>}, {pipeline_mode = #tpu.pipeline_mode<synchronous>, transform_indices = @transform_7, window_bounds = array<i64: 1, 32>}, {pipeline_mode = #tpu.pipeline_mode<synchronous>, transform_indices = @transform_8, window_bounds = array<i64: 1, 32>}, {pipeline_mode = #tpu.pipeline_mode<synchronous>, transform_indices = @transform_9, window_bounds = array<i64: 8, 16>}, {pipeline_mode = #tpu.pipeline_mode<synchronous>, transform_indices = @transform_10, window_bounds = array<i64: 8, 16>}, {transform_indices = @transform_11, window_bounds = array<i64: 1, 8, 32>}]} {
    %c0_i32 = arith.constant 0 : i32
    %0 = arith.cmpi eq, %arg1, %c0_i32 : i32
    %1 = arith.extui %0 : i1 to i32
    %c0_i32_0 = arith.constant 0 : i32
    %2 = arith.cmpi ne, %1, %c0_i32_0 : i32
    scf.if %2 {
      %c0_44 = arith.constant 0 : index
      %c0_45 = arith.constant 0 : index
      %c0_46 = arith.constant 0 : index
      %135 = vector.load %arg2[%c0_44, %c0_45, %c0_46] : memref<1x8x32xf32, #tpu.memory_space<vmem>>, vector<1x8x32xf32>
      %136 = vector.shape_cast %135 : vector<1x8x32xf32> to vector<8x32xf32>
      %137 = arith.truncf %136 : vector<8x32xf32> to vector<8x32xbf16>
      %c0_47 = arith.constant 0 : index
      %c0_48 = arith.constant 0 : index
      %138 = vector.load %arg5[%c0_47, %c0_48] : memref<32x64xbf16, #tpu.memory_space<vmem>>, vector<32x64xbf16>
      %cst_49 = arith.constant dense<0.000000e+00> : vector<8x64xf32>
      %139 = tpu.matmul %137, %138, %cst_49 {dimension_numbers = #tpu.dot_dimension_numbers<[1], [0], [0], [1], [0, 0, 1, 1], [], []>} : vector<8x32xbf16>, vector<32x64xbf16>, vector<8x64xf32> -> vector<8x64xf32>
      %c0_50 = arith.constant 0 : index
      %c0_51 = arith.constant 0 : index
      %140 = vector.load %arg6[%c0_50, %c0_51] : memref<1x64xf32, #tpu.memory_space<vmem>>, vector<1x64xf32>
      %141 = vector.broadcast %140 : vector<1x64xf32> to vector<8x64xf32>
      %142 = arith.addf %139, %141 : vector<8x64xf32>
      %143 = vector.extract_strided_slice %142 {offsets = [0, 0], sizes = [8, 32], strides = [1, 1]} : vector<8x64xf32> to vector<8x32xf32>
      %144 = vector.extract_strided_slice %142 {offsets = [0, 32], sizes = [8, 32], strides = [1, 1]} : vector<8x64xf32> to vector<8x32xf32>
      %c0_52 = arith.constant 0 : index
      %c0_53 = arith.constant 0 : index
      %145 = vector.load %arg11[%c0_52, %c0_53] : memref<8x16xf32, #tpu.memory_space<vmem>>, vector<8x16xf32>
      %c0_54 = arith.constant 0 : index
      %c0_55 = arith.constant 0 : index
      %146 = vector.load %arg12[%c0_54, %c0_55] : memref<8x16xf32, #tpu.memory_space<vmem>>, vector<8x16xf32>
      %147 = vector.extract_strided_slice %143 {offsets = [0, 0], sizes = [8, 16], strides = [1, 1]} : vector<8x32xf32> to vector<8x16xf32>
      %148 = vector.extract_strided_slice %143 {offsets = [0, 16], sizes = [8, 16], strides = [1, 1]} : vector<8x32xf32> to vector<8x16xf32>
      %149 = arith.mulf %147, %145 : vector<8x16xf32>
      %150 = arith.mulf %148, %146 : vector<8x16xf32>
      %151 = arith.subf %149, %150 : vector<8x16xf32>
      %152 = arith.truncf %151 : vector<8x16xf32> to vector<8x16xbf16>
      %153 = arith.mulf %148, %145 : vector<8x16xf32>
      %154 = arith.mulf %147, %146 : vector<8x16xf32>
      %155 = arith.addf %153, %154 : vector<8x16xf32>
      %156 = arith.truncf %155 : vector<8x16xf32> to vector<8x16xbf16>
      %157 = vector.extract_strided_slice %152 {offsets = [0, 0], sizes = [8, 4], strides = [1, 1]} : vector<8x16xbf16> to vector<8x4xbf16>
      %158 = vector.extract_strided_slice %156 {offsets = [0, 0], sizes = [8, 4], strides = [1, 1]} : vector<8x16xbf16> to vector<8x4xbf16>
      %159 = vector.extract_strided_slice %152 {offsets = [0, 4], sizes = [8, 4], strides = [1, 1]} : vector<8x16xbf16> to vector<8x4xbf16>
      %160 = vector.extract_strided_slice %156 {offsets = [0, 4], sizes = [8, 4], strides = [1, 1]} : vector<8x16xbf16> to vector<8x4xbf16>
      %161 = vector.extract_strided_slice %152 {offsets = [0, 8], sizes = [8, 4], strides = [1, 1]} : vector<8x16xbf16> to vector<8x4xbf16>
      %162 = vector.extract_strided_slice %156 {offsets = [0, 8], sizes = [8, 4], strides = [1, 1]} : vector<8x16xbf16> to vector<8x4xbf16>
      %163 = vector.extract_strided_slice %152 {offsets = [0, 12], sizes = [8, 4], strides = [1, 1]} : vector<8x16xbf16> to vector<8x4xbf16>
      %164 = vector.extract_strided_slice %156 {offsets = [0, 12], sizes = [8, 4], strides = [1, 1]} : vector<8x16xbf16> to vector<8x4xbf16>
      %165 = arith.truncf %144 : vector<8x32xf32> to vector<8x32xbf16>
      %166 = tpu.concatenate %157, %158, %159, %160, %161, %162, %163, %164, %165 in 1 : vector<8x4xbf16>, vector<8x4xbf16>, vector<8x4xbf16>, vector<8x4xbf16>, vector<8x4xbf16>, vector<8x4xbf16>, vector<8x4xbf16>, vector<8x4xbf16>, vector<8x32xbf16> -> vector<8x64xbf16>
      %c0_56 = arith.constant 0 : index
      %c0_57 = arith.constant 0 : index
      %167 = vector.load %arg14[%c0_56, %c0_57] : memref<8x64xbf16, #tpu.memory_space<vmem>>, vector<8x64xbf16>
      tpu.vector_store %arg14[%c0_56, %c0_57], %166 {strides = array<i32>} : memref<8x64xbf16, #tpu.memory_space<vmem>>, vector<8x64xbf16>,
    } else {
    }
    %c8_i32 = arith.constant 8 : i32
    %3 = arith.muli %arg1, %c8_i32 : i32
    %4 = tpu.assume_multiple %3, 8 : i32
    %c0 = arith.constant 0 : index
    %5 = arith.index_cast %4 : i32 to index
    %c0_1 = arith.constant 0 : index
    %6 = vector.load %arg2[%c0, %5, %c0_1] : memref<1x8x32xf32, #tpu.memory_space<vmem>>, vector<1x8x32xf32>
    %7 = vector.shape_cast %6 : vector<1x8x32xf32> to vector<8x32xf32>
    %8 = arith.truncf %7 : vector<8x32xf32> to vector<8x32xbf16>
    %c0_2 = arith.constant 0 : index
    %c0_3 = arith.constant 0 : index
    %9 = vector.load %arg3[%c0_2, %c0_3] : memref<32x32xbf16, #tpu.memory_space<vmem>>, vector<32x32xbf16>
    %cst = arith.constant dense<0.000000e+00> : vector<8x32xf32>
    %10 = tpu.matmul %8, %9, %cst {dimension_numbers = #tpu.dot_dimension_numbers<[1], [0], [0], [1], [0, 0, 1, 1], [], []>} : vector<8x32xbf16>, vector<32x32xbf16>, vector<8x32xf32> -> vector<8x32xf32>
    %c0_4 = arith.constant 0 : index
    %c0_5 = arith.constant 0 : index
    %11 = vector.load %arg4[%c0_4, %c0_5] : memref<1x32xf32, #tpu.memory_space<vmem>>, vector<1x32xf32>
    %12 = vector.broadcast %11 : vector<1x32xf32> to vector<8x32xf32>
    %13 = arith.addf %10, %12 : vector<8x32xf32>
    %14 = arith.index_cast %4 : i32 to index
    %c0_6 = arith.constant 0 : index
    %15 = vector.load %arg11[%14, %c0_6] : memref<8x16xf32, #tpu.memory_space<vmem>>, vector<8x16xf32>
    %16 = arith.index_cast %4 : i32 to index
    %c0_7 = arith.constant 0 : index
    %17 = vector.load %arg12[%16, %c0_7] : memref<8x16xf32, #tpu.memory_space<vmem>>, vector<8x16xf32>
    %18 = vector.extract_strided_slice %13 {offsets = [0, 0], sizes = [8, 16], strides = [1, 1]} : vector<8x32xf32> to vector<8x16xf32>
    %19 = vector.extract_strided_slice %13 {offsets = [0, 16], sizes = [8, 16], strides = [1, 1]} : vector<8x32xf32> to vector<8x16xf32>
    %20 = arith.mulf %18, %15 : vector<8x16xf32>
    %21 = arith.mulf %19, %17 : vector<8x16xf32>
    %22 = arith.subf %20, %21 : vector<8x16xf32>
    %23 = arith.truncf %22 : vector<8x16xf32> to vector<8x16xbf16>
    %24 = arith.mulf %19, %15 : vector<8x16xf32>
    %25 = arith.mulf %18, %17 : vector<8x16xf32>
    %26 = arith.addf %24, %25 : vector<8x16xf32>
    %27 = arith.truncf %26 : vector<8x16xf32> to vector<8x16xbf16>
    %c0_8 = arith.constant 0 : index
    %c0_9 = arith.constant 0 : index
    %28 = vector.load %arg14[%c0_8, %c0_9] : memref<8x64xbf16, #tpu.memory_space<vmem>>, vector<8x32xbf16>
    %c0_10 = arith.constant 0 : index
    %c32 = arith.constant 32 : index
    %29 = vector.load %arg14[%c0_10, %c32] : memref<8x64xbf16, #tpu.memory_space<vmem>>, vector<8x32xbf16>
    %30 = vector.extract_strided_slice %23 {offsets = [0, 0], sizes = [8, 4], strides = [1, 1]} : vector<8x16xbf16> to vector<8x4xbf16>
    %31 = vector.extract_strided_slice %27 {offsets = [0, 0], sizes = [8, 4], strides = [1, 1]} : vector<8x16xbf16> to vector<8x4xbf16>
    %32 = tpu.concatenate %30, %31 in 1 : vector<8x4xbf16>, vector<8x4xbf16> -> vector<8x8xbf16>
    %33 = vector.extract_strided_slice %28 {offsets = [0, 0], sizes = [8, 8], strides = [1, 1]} : vector<8x32xbf16> to vector<8x8xbf16>
    %cst_11 = arith.constant dense<0.000000e+00> : vector<8x8xf32>
    %34 = tpu.matmul %32, %33, %cst_11 {dimension_numbers = #tpu.dot_dimension_numbers<[1], [1], [0], [0], [0, 0, 1, 0], [], []>} : vector<8x8xbf16>, vector<8x8xbf16>, vector<8x8xf32> -> vector<8x8xf32>
    %cst_12 = arith.constant dense<0xFF800000> : vector<8xf32>
    %35 = vector.multi_reduction <maximumf>, %34, %cst_12 [1] : vector<8x8xf32> to vector<8xf32>
    %36 = vector.shape_cast %35 : vector<8xf32> to vector<8x1xf32>
    %37 = vector.broadcast %36 : vector<8x1xf32> to vector<8x8xf32>
    %38 = arith.subf %34, %37 : vector<8x8xf32>
    %39 = math.exp %38 : vector<8x8xf32>
    %cst_13 = arith.constant dense<0.000000e+00> : vector<8xf32>
    %40 = vector.multi_reduction <add>, %39, %cst_13 [1] : vector<8x8xf32> to vector<8xf32>
    %41 = vector.shape_cast %40 : vector<8xf32> to vector<8x1xf32>
    %42 = tpu.reciprocal %41 {approx = true} : vector<8x1xf32> -> vector<8x1xf32>
    %43 = vector.broadcast %42 : vector<8x1xf32> to vector<8x8xf32>
    %44 = arith.mulf %39, %43 : vector<8x8xf32>
    %45 = arith.truncf %44 : vector<8x8xf32> to vector<8x8xbf16>
    %46 = vector.extract_strided_slice %29 {offsets = [0, 0], sizes = [8, 8], strides = [1, 1]} : vector<8x32xbf16> to vector<8x8xbf16>
    %cst_14 = arith.constant dense<0.000000e+00> : vector<8x8xf32>
    %47 = tpu.matmul %45, %46, %cst_14 {dimension_numbers = #tpu.dot_dimension_numbers<[1], [0], [0], [1], [0, 0, 1, 1], [], []>} : vector<8x8xbf16>, vector<8x8xbf16>, vector<8x8xf32> -> vector<8x8xf32>
    %48 = vector.extract_strided_slice %23 {offsets = [0, 4], sizes = [8, 4], strides = [1, 1]} : vector<8x16xbf16> to vector<8x4xbf16>
    %49 = vector.extract_strided_slice %27 {offsets = [0, 4], sizes = [8, 4], strides = [1, 1]} : vector<8x16xbf16> to vector<8x4xbf16>
    %50 = tpu.concatenate %48, %49 in 1 : vector<8x4xbf16>, vector<8x4xbf16> -> vector<8x8xbf16>
    %51 = vector.extract_strided_slice %28 {offsets = [0, 8], sizes = [8, 8], strides = [1, 1]} : vector<8x32xbf16> to vector<8x8xbf16>
    %cst_15 = arith.constant dense<0.000000e+00> : vector<8x8xf32>
    %52 = tpu.matmul %50, %51, %cst_15 {dimension_numbers = #tpu.dot_dimension_numbers<[1], [1], [0], [0], [0, 0, 1, 0], [], []>} : vector<8x8xbf16>, vector<8x8xbf16>, vector<8x8xf32> -> vector<8x8xf32>
    %cst_16 = arith.constant dense<0xFF800000> : vector<8xf32>
    %53 = vector.multi_reduction <maximumf>, %52, %cst_16 [1] : vector<8x8xf32> to vector<8xf32>
    %54 = vector.shape_cast %53 : vector<8xf32> to vector<8x1xf32>
    %55 = vector.broadcast %54 : vector<8x1xf32> to vector<8x8xf32>
    %56 = arith.subf %52, %55 : vector<8x8xf32>
    %57 = math.exp %56 : vector<8x8xf32>
    %cst_17 = arith.constant dense<0.000000e+00> : vector<8xf32>
    %58 = vector.multi_reduction <add>, %57, %cst_17 [1] : vector<8x8xf32> to vector<8xf32>
    %59 = vector.shape_cast %58 : vector<8xf32> to vector<8x1xf32>
    %60 = tpu.reciprocal %59 {approx = true} : vector<8x1xf32> -> vector<8x1xf32>
    %61 = vector.broadcast %60 : vector<8x1xf32> to vector<8x8xf32>
    %62 = arith.mulf %57, %61 : vector<8x8xf32>
    %63 = arith.truncf %62 : vector<8x8xf32> to vector<8x8xbf16>
    %64 = vector.extract_strided_slice %29 {offsets = [0, 8], sizes = [8, 8], strides = [1, 1]} : vector<8x32xbf16> to vector<8x8xbf16>
    %cst_18 = arith.constant dense<0.000000e+00> : vector<8x8xf32>
    %65 = tpu.matmul %63, %64, %cst_18 {dimension_numbers = #tpu.dot_dimension_numbers<[1], [0], [0], [1], [0, 0, 1, 1], [], []>} : vector<8x8xbf16>, vector<8x8xbf16>, vector<8x8xf32> -> vector<8x8xf32>
    %66 = vector.extract_strided_slice %23 {offsets = [0, 8], sizes = [8, 4], strides = [1, 1]} : vector<8x16xbf16> to vector<8x4xbf16>
    %67 = vector.extract_strided_slice %27 {offsets = [0, 8], sizes = [8, 4], strides = [1, 1]} : vector<8x16xbf16> to vector<8x4xbf16>
    %68 = tpu.concatenate %66, %67 in 1 : vector<8x4xbf16>, vector<8x4xbf16> -> vector<8x8xbf16>
    %69 = vector.extract_strided_slice %28 {offsets = [0, 16], sizes = [8, 8], strides = [1, 1]} : vector<8x32xbf16> to vector<8x8xbf16>
    %cst_19 = arith.constant dense<0.000000e+00> : vector<8x8xf32>
    %70 = tpu.matmul %68, %69, %cst_19 {dimension_numbers = #tpu.dot_dimension_numbers<[1], [1], [0], [0], [0, 0, 1, 0], [], []>} : vector<8x8xbf16>, vector<8x8xbf16>, vector<8x8xf32> -> vector<8x8xf32>
    %cst_20 = arith.constant dense<0xFF800000> : vector<8xf32>
    %71 = vector.multi_reduction <maximumf>, %70, %cst_20 [1] : vector<8x8xf32> to vector<8xf32>
    %72 = vector.shape_cast %71 : vector<8xf32> to vector<8x1xf32>
    %73 = vector.broadcast %72 : vector<8x1xf32> to vector<8x8xf32>
    %74 = arith.subf %70, %73 : vector<8x8xf32>
    %75 = math.exp %74 : vector<8x8xf32>
    %cst_21 = arith.constant dense<0.000000e+00> : vector<8xf32>
    %76 = vector.multi_reduction <add>, %75, %cst_21 [1] : vector<8x8xf32> to vector<8xf32>
    %77 = vector.shape_cast %76 : vector<8xf32> to vector<8x1xf32>
    %78 = tpu.reciprocal %77 {approx = true} : vector<8x1xf32> -> vector<8x1xf32>
    %79 = vector.broadcast %78 : vector<8x1xf32> to vector<8x8xf32>
    %80 = arith.mulf %75, %79 : vector<8x8xf32>
    %81 = arith.truncf %80 : vector<8x8xf32> to vector<8x8xbf16>
    %82 = vector.extract_strided_slice %29 {offsets = [0, 16], sizes = [8, 8], strides = [1, 1]} : vector<8x32xbf16> to vector<8x8xbf16>
    %cst_22 = arith.constant dense<0.000000e+00> : vector<8x8xf32>
    %83 = tpu.matmul %81, %82, %cst_22 {dimension_numbers = #tpu.dot_dimension_numbers<[1], [0], [0], [1], [0, 0, 1, 1], [], []>} : vector<8x8xbf16>, vector<8x8xbf16>, vector<8x8xf32> -> vector<8x8xf32>
    %84 = vector.extract_strided_slice %23 {offsets = [0, 12], sizes = [8, 4], strides = [1, 1]} : vector<8x16xbf16> to vector<8x4xbf16>
    %85 = vector.extract_strided_slice %27 {offsets = [0, 12], sizes = [8, 4], strides = [1, 1]} : vector<8x16xbf16> to vector<8x4xbf16>
    %86 = tpu.concatenate %84, %85 in 1 : vector<8x4xbf16>, vector<8x4xbf16> -> vector<8x8xbf16>
    %87 = vector.extract_strided_slice %28 {offsets = [0, 24], sizes = [8, 8], strides = [1, 1]} : vector<8x32xbf16> to vector<8x8xbf16>
    %cst_23 = arith.constant dense<0.000000e+00> : vector<8x8xf32>
    %88 = tpu.matmul %86, %87, %cst_23 {dimension_numbers = #tpu.dot_dimension_numbers<[1], [1], [0], [0], [0, 0, 1, 0], [], []>} : vector<8x8xbf16>, vector<8x8xbf16>, vector<8x8xf32> -> vector<8x8xf32>
    %cst_24 = arith.constant dense<0xFF800000> : vector<8xf32>
    %89 = vector.multi_reduction <maximumf>, %88, %cst_24 [1] : vector<8x8xf32> to vector<8xf32>
    %90 = vector.shape_cast %89 : vector<8xf32> to vector<8x1xf32>
    %91 = vector.broadcast %90 : vector<8x1xf32> to vector<8x8xf32>
    %92 = arith.subf %88, %91 : vector<8x8xf32>
    %93 = math.exp %92 : vector<8x8xf32>
    %cst_25 = arith.constant dense<0.000000e+00> : vector<8xf32>
    %94 = vector.multi_reduction <add>, %93, %cst_25 [1] : vector<8x8xf32> to vector<8xf32>
    %95 = vector.shape_cast %94 : vector<8xf32> to vector<8x1xf32>
    %96 = tpu.reciprocal %95 {approx = true} : vector<8x1xf32> -> vector<8x1xf32>
    %97 = vector.broadcast %96 : vector<8x1xf32> to vector<8x8xf32>
    %98 = arith.mulf %93, %97 : vector<8x8xf32>
    %99 = arith.truncf %98 : vector<8x8xf32> to vector<8x8xbf16>
    %100 = vector.extract_strided_slice %29 {offsets = [0, 24], sizes = [8, 8], strides = [1, 1]} : vector<8x32xbf16> to vector<8x8xbf16>
    %cst_26 = arith.constant dense<0.000000e+00> : vector<8x8xf32>
    %101 = tpu.matmul %99, %100, %cst_26 {dimension_numbers = #tpu.dot_dimension_numbers<[1], [0], [0], [1], [0, 0, 1, 1], [], []>} : vector<8x8xbf16>, vector<8x8xbf16>, vector<8x8xf32> -> vector<8x8xf32>
    %102 = tpu.concatenate %47, %65, %83, %101 in 1 : vector<8x8xf32>, vector<8x8xf32>, vector<8x8xf32>, vector<8x8xf32> -> vector<8x32xf32>
    %103 = arith.truncf %102 : vector<8x32xf32> to vector<8x32xbf16>
    %c0_27 = arith.constant 0 : index
    %c0_28 = arith.constant 0 : index
    %104 = vector.load %arg7[%c0_27, %c0_28] : memref<32x32xbf16, #tpu.memory_space<vmem>>, vector<32x32xbf16>
    %cst_29 = arith.constant dense<0.000000e+00> : vector<8x32xf32>
    %105 = tpu.matmul %103, %104, %cst_29 {dimension_numbers = #tpu.dot_dimension_numbers<[1], [0], [0], [1], [0, 0, 1, 1], [], []>} : vector<8x32xbf16>, vector<32x32xbf16>, vector<8x32xf32> -> vector<8x32xf32>
    %c0_30 = arith.constant 0 : index
    %c0_31 = arith.constant 0 : index
    %106 = vector.load %arg8[%c0_30, %c0_31] : memref<1x32xf32, #tpu.memory_space<vmem>>, vector<1x32xf32>
    %107 = vector.broadcast %106 : vector<1x32xf32> to vector<8x32xf32>
    %108 = arith.addf %105, %107 : vector<8x32xf32>
    %109 = arith.addf %7, %108 : vector<8x32xf32>
    %cst_32 = arith.constant dense<0.000000e+00> : vector<8xf32>
    %110 = vector.multi_reduction <add>, %109, %cst_32 [1] : vector<8x32xf32> to vector<8xf32>
    %111 = vector.shape_cast %110 : vector<8xf32> to vector<8x1xf32>
    %cst_33 = arith.constant 3.200000e+01 : f32
    %112 = vector.broadcast %cst_33 : f32 to vector<8x1xf32>
    %113 = arith.divf %111, %112 : vector<8x1xf32>
    %114 = vector.broadcast %113 : vector<8x1xf32> to vector<8x32xf32>
    %115 = arith.subf %109, %114 : vector<8x32xf32>
    %116 = arith.mulf %115, %115 : vector<8x32xf32>
    %cst_34 = arith.constant dense<0.000000e+00> : vector<8xf32>
    %117 = vector.multi_reduction <add>, %116, %cst_34 [1] : vector<8x32xf32> to vector<8xf32>
    %118 = vector.shape_cast %117 : vector<8xf32> to vector<8x1xf32>
    %cst_35 = arith.constant 3.200000e+01 : f32
    %119 = vector.broadcast %cst_35 : f32 to vector<8x1xf32>
    %120 = arith.divf %118, %119 : vector<8x1xf32>
    %cst_36 = arith.constant 9.99999974E-6 : f32
    %121 = vector.broadcast %cst_36 : f32 to vector<8x1xf32>
    %122 = arith.addf %120, %121 : vector<8x1xf32>
    %123 = math.rsqrt %122 : vector<8x1xf32>
    %124 = vector.broadcast %123 : vector<8x1xf32> to vector<8x32xf32>
    %125 = arith.mulf %115, %124 : vector<8x32xf32>
    %c0_37 = arith.constant 0 : index
    %c0_38 = arith.constant 0 : index
    %126 = vector.load %arg9[%c0_37, %c0_38] : memref<1x32xf32, #tpu.memory_space<vmem>>, vector<1x32xf32>
    %127 = vector.broadcast %126 : vector<1x32xf32> to vector<8x32xf32>
    %128 = arith.mulf %125, %127 : vector<8x32xf32>
    %c0_39 = arith.constant 0 : index
    %c0_40 = arith.constant 0 : index
    %129 = vector.load %arg10[%c0_39, %c0_40] : memref<1x32xf32, #tpu.memory_space<vmem>>, vector<1x32xf32>
    %130 = vector.broadcast %129 : vector<1x32xf32> to vector<8x32xf32>
    %131 = arith.addf %128, %130 : vector<8x32xf32>
    %c0_41 = arith.constant 0 : index
    %c0_42 = arith.constant 0 : index
    %c0_43 = arith.constant 0 : index
    %132 = vector.load %arg13[%c0_41, %c0_42, %c0_43] : memref<1x8x32xf32, #tpu.memory_space<vmem>>, vector<1x8x32xf32>
    %133 = vector.shape_cast %132 : vector<1x8x32xf32> to vector<8x32xf32>
    %134 = vector.shape_cast %131 : vector<8x32xf32> to vector<1x8x32xf32>
    tpu.vector_store %arg13[%c0_41, %c0_42, %c0_43], %134 {strides = array<i32>} : memref<1x8x32xf32, #tpu.memory_space<vmem>>, vector<1x8x32xf32>,
    return
  }
  func.func @transform_0(%arg0: i32, %arg1: i32) -> (i32, i32, i32) {
    %c0_i32 = arith.constant 0 : i32
    %c0_i32_0 = arith.constant 0 : i32
    %c0_i32_1 = arith.constant 0 : i32
    return %arg0, %c0_i32, %c0_i32_0 : i32, i32, i32
  }
  func.func @transform_1(%arg0: i32, %arg1: i32) -> (i32, i32) {
    %c0_i32 = arith.constant 0 : i32
    %c0_i32_0 = arith.constant 0 : i32
    %c0_i32_1 = arith.constant 0 : i32
    return %c0_i32, %c0_i32_0 : i32, i32
  }
  func.func @transform_2(%arg0: i32, %arg1: i32) -> (i32, i32) {
    %c0_i32 = arith.constant 0 : i32
    %c0_i32_0 = arith.constant 0 : i32
    %c0_i32_1 = arith.constant 0 : i32
    return %c0_i32, %c0_i32_0 : i32, i32
  }
  func.func @transform_3(%arg0: i32, %arg1: i32) -> (i32, i32) {
    %c0_i32 = arith.constant 0 : i32
    %c0_i32_0 = arith.constant 0 : i32
    %c0_i32_1 = arith.constant 0 : i32
    return %c0_i32, %c0_i32_0 : i32, i32
  }
  func.func @transform_4(%arg0: i32, %arg1: i32) -> (i32, i32) {
    %c0_i32 = arith.constant 0 : i32
    %c0_i32_0 = arith.constant 0 : i32
    %c0_i32_1 = arith.constant 0 : i32
    return %c0_i32, %c0_i32_0 : i32, i32
  }
  func.func @transform_5(%arg0: i32, %arg1: i32) -> (i32, i32) {
    %c0_i32 = arith.constant 0 : i32
    %c0_i32_0 = arith.constant 0 : i32
    %c0_i32_1 = arith.constant 0 : i32
    return %c0_i32, %c0_i32_0 : i32, i32
  }
  func.func @transform_6(%arg0: i32, %arg1: i32) -> (i32, i32) {
    %c0_i32 = arith.constant 0 : i32
    %c0_i32_0 = arith.constant 0 : i32
    %c0_i32_1 = arith.constant 0 : i32
    return %c0_i32, %c0_i32_0 : i32, i32
  }
  func.func @transform_7(%arg0: i32, %arg1: i32) -> (i32, i32) {
    %c0_i32 = arith.constant 0 : i32
    %c0_i32_0 = arith.constant 0 : i32
    %c0_i32_1 = arith.constant 0 : i32
    return %c0_i32, %c0_i32_0 : i32, i32
  }
  func.func @transform_8(%arg0: i32, %arg1: i32) -> (i32, i32) {
    %c0_i32 = arith.constant 0 : i32
    %c0_i32_0 = arith.constant 0 : i32
    %c0_i32_1 = arith.constant 0 : i32
    return %c0_i32, %c0_i32_0 : i32, i32
  }
  func.func @transform_9(%arg0: i32, %arg1: i32) -> (i32, i32) {
    %c0_i32 = arith.constant 0 : i32
    %c0_i32_0 = arith.constant 0 : i32
    %c0_i32_1 = arith.constant 0 : i32
    return %c0_i32, %c0_i32_0 : i32, i32
  }
  func.func @transform_10(%arg0: i32, %arg1: i32) -> (i32, i32) {
    %c0_i32 = arith.constant 0 : i32
    %c0_i32_0 = arith.constant 0 : i32
    %c0_i32_1 = arith.constant 0 : i32
    return %c0_i32, %c0_i32_0 : i32, i32
  }
  func.func @transform_11(%arg0: i32, %arg1: i32) -> (i32, i32, i32) {
    %c0_i32 = arith.constant 0 : i32
    %c0_i32_0 = arith.constant 0 : i32
    return %arg0, %arg1, %c0_i32 : i32, i32, i32
  }
}

module attributes {stable_mosaic.version = 11 : i64} {
  func.func @_ln_unperm_kernel(%arg0: i32, %arg1: i32, %arg2: memref<1x8x32xf32, #tpu.memory_space<vmem>>, %arg3: memref<1x32xf32, #tpu.memory_space<vmem>>, %arg4: memref<1x32xf32, #tpu.memory_space<vmem>>, %arg5: memref<32x32xf32, #tpu.memory_space<vmem>>, %arg6: memref<1x8x32xf32, #tpu.memory_space<vmem>>) attributes {dimension_semantics = [#tpu.dimension_semantics<parallel>, #tpu.dimension_semantics<parallel>], iteration_bounds = array<i64: 2, 1>, scalar_prefetch = 0 : i64, scratch_operands = 0 : i64, tpu.core_type = #tpu.core_type<tc>, window_params = [{transform_indices = @transform_0, window_bounds = array<i64: 1, 8, 32>}, {pipeline_mode = #tpu.pipeline_mode<synchronous>, transform_indices = @transform_1, window_bounds = array<i64: 1, 32>}, {pipeline_mode = #tpu.pipeline_mode<synchronous>, transform_indices = @transform_2, window_bounds = array<i64: 1, 32>}, {pipeline_mode = #tpu.pipeline_mode<synchronous>, transform_indices = @transform_3, window_bounds = array<i64: 32, 32>}, {transform_indices = @transform_4, window_bounds = array<i64: 1, 8, 32>}]} {
    %c0 = arith.constant 0 : index
    %c0_0 = arith.constant 0 : index
    %c0_1 = arith.constant 0 : index
    %0 = vector.load %arg2[%c0, %c0_0, %c0_1] : memref<1x8x32xf32, #tpu.memory_space<vmem>>, vector<1x8x32xf32>
    %1 = vector.shape_cast %0 : vector<1x8x32xf32> to vector<8x32xf32>
    %cst = arith.constant dense<0.000000e+00> : vector<8xf32>
    %2 = vector.multi_reduction <add>, %1, %cst [1] : vector<8x32xf32> to vector<8xf32>
    %3 = vector.shape_cast %2 : vector<8xf32> to vector<8x1xf32>
    %cst_2 = arith.constant 3.200000e+01 : f32
    %4 = vector.broadcast %cst_2 : f32 to vector<8x1xf32>
    %5 = arith.divf %3, %4 : vector<8x1xf32>
    %6 = vector.broadcast %5 : vector<8x1xf32> to vector<8x32xf32>
    %7 = arith.subf %1, %6 : vector<8x32xf32>
    %8 = arith.mulf %7, %7 : vector<8x32xf32>
    %cst_3 = arith.constant dense<0.000000e+00> : vector<8xf32>
    %9 = vector.multi_reduction <add>, %8, %cst_3 [1] : vector<8x32xf32> to vector<8xf32>
    %10 = vector.shape_cast %9 : vector<8xf32> to vector<8x1xf32>
    %cst_4 = arith.constant 3.200000e+01 : f32
    %11 = vector.broadcast %cst_4 : f32 to vector<8x1xf32>
    %12 = arith.divf %10, %11 : vector<8x1xf32>
    %cst_5 = arith.constant 9.99999974E-6 : f32
    %13 = vector.broadcast %cst_5 : f32 to vector<8x1xf32>
    %14 = arith.addf %12, %13 : vector<8x1xf32>
    %15 = math.rsqrt %14 : vector<8x1xf32>
    %16 = vector.broadcast %15 : vector<8x1xf32> to vector<8x32xf32>
    %17 = arith.mulf %7, %16 : vector<8x32xf32>
    %c0_6 = arith.constant 0 : index
    %c0_7 = arith.constant 0 : index
    %18 = vector.load %arg5[%c0_6, %c0_7] : memref<32x32xf32, #tpu.memory_space<vmem>>, vector<32x32xf32>
    %cst_8 = arith.constant dense<0.000000e+00> : vector<8x32xf32>
    %19 = tpu.matmul %17, %18, %cst_8 {dimension_numbers = #tpu.dot_dimension_numbers<[1], [0], [0], [1], [0, 0, 1, 1], [], []>} : vector<8x32xf32>, vector<32x32xf32>, vector<8x32xf32> -> vector<8x32xf32>
    %c0_9 = arith.constant 0 : index
    %c0_10 = arith.constant 0 : index
    %20 = vector.load %arg3[%c0_9, %c0_10] : memref<1x32xf32, #tpu.memory_space<vmem>>, vector<1x32xf32>
    %21 = vector.broadcast %20 : vector<1x32xf32> to vector<8x32xf32>
    %22 = arith.mulf %19, %21 : vector<8x32xf32>
    %c0_11 = arith.constant 0 : index
    %c0_12 = arith.constant 0 : index
    %23 = vector.load %arg4[%c0_11, %c0_12] : memref<1x32xf32, #tpu.memory_space<vmem>>, vector<1x32xf32>
    %24 = vector.broadcast %23 : vector<1x32xf32> to vector<8x32xf32>
    %25 = arith.addf %22, %24 : vector<8x32xf32>
    %c0_13 = arith.constant 0 : index
    %c0_14 = arith.constant 0 : index
    %c0_15 = arith.constant 0 : index
    %26 = vector.load %arg6[%c0_13, %c0_14, %c0_15] : memref<1x8x32xf32, #tpu.memory_space<vmem>>, vector<1x8x32xf32>
    %27 = vector.shape_cast %26 : vector<1x8x32xf32> to vector<8x32xf32>
    %28 = vector.shape_cast %25 : vector<8x32xf32> to vector<1x8x32xf32>
    tpu.vector_store %arg6[%c0_13, %c0_14, %c0_15], %28 {strides = array<i32>} : memref<1x8x32xf32, #tpu.memory_space<vmem>>, vector<1x8x32xf32>,
    return
  }
  func.func @transform_0(%arg0: i32, %arg1: i32) -> (i32, i32, i32) {
    %c0_i32 = arith.constant 0 : i32
    %c0_i32_0 = arith.constant 0 : i32
    return %arg0, %arg1, %c0_i32 : i32, i32, i32
  }
  func.func @transform_1(%arg0: i32, %arg1: i32) -> (i32, i32) {
    %c0_i32 = arith.constant 0 : i32
    %c0_i32_0 = arith.constant 0 : i32
    %c0_i32_1 = arith.constant 0 : i32
    return %c0_i32, %c0_i32_0 : i32, i32
  }
  func.func @transform_2(%arg0: i32, %arg1: i32) -> (i32, i32) {
    %c0_i32 = arith.constant 0 : i32
    %c0_i32_0 = arith.constant 0 : i32
    %c0_i32_1 = arith.constant 0 : i32
    return %c0_i32, %c0_i32_0 : i32, i32
  }
  func.func @transform_3(%arg0: i32, %arg1: i32) -> (i32, i32) {
    %c0_i32 = arith.constant 0 : i32
    %c0_i32_0 = arith.constant 0 : i32
    %c0_i32_1 = arith.constant 0 : i32
    return %c0_i32, %c0_i32_0 : i32, i32
  }
  func.func @transform_4(%arg0: i32, %arg1: i32) -> (i32, i32, i32) {
    %c0_i32 = arith.constant 0 : i32
    %c0_i32_0 = arith.constant 0 : i32
    return %arg0, %arg1, %c0_i32 : i32, i32, i32
  }
}

module attributes {stable_mosaic.version = 11 : i64} {
  func.func @_ffn_ln_kernel(%arg0: i32, %arg1: i32, %arg2: memref<1x8x32xf32, #tpu.memory_space<vmem>>, %arg3: memref<32x128xbf16, #tpu.memory_space<vmem>>, %arg4: memref<1x128xf32, #tpu.memory_space<vmem>>, %arg5: memref<128x32xbf16, #tpu.memory_space<vmem>>, %arg6: memref<1x32xf32, #tpu.memory_space<vmem>>, %arg7: memref<1x32xf32, #tpu.memory_space<vmem>>, %arg8: memref<1x32xf32, #tpu.memory_space<vmem>>, %arg9: memref<1x8x32xf32, #tpu.memory_space<vmem>>) attributes {dimension_semantics = [#tpu.dimension_semantics<parallel>, #tpu.dimension_semantics<parallel>], iteration_bounds = array<i64: 2, 1>, scalar_prefetch = 0 : i64, scratch_operands = 0 : i64, tpu.core_type = #tpu.core_type<tc>, window_params = [{transform_indices = @transform_0, window_bounds = array<i64: 1, 8, 32>}, {pipeline_mode = #tpu.pipeline_mode<synchronous>, transform_indices = @transform_1, window_bounds = array<i64: 32, 128>}, {pipeline_mode = #tpu.pipeline_mode<synchronous>, transform_indices = @transform_2, window_bounds = array<i64: 1, 128>}, {pipeline_mode = #tpu.pipeline_mode<synchronous>, transform_indices = @transform_3, window_bounds = array<i64: 128, 32>}, {pipeline_mode = #tpu.pipeline_mode<synchronous>, transform_indices = @transform_4, window_bounds = array<i64: 1, 32>}, {pipeline_mode = #tpu.pipeline_mode<synchronous>, transform_indices = @transform_5, window_bounds = array<i64: 1, 32>}, {pipeline_mode = #tpu.pipeline_mode<synchronous>, transform_indices = @transform_6, window_bounds = array<i64: 1, 32>}, {transform_indices = @transform_7, window_bounds = array<i64: 1, 8, 32>}]} {
    %c0 = arith.constant 0 : index
    %c0_0 = arith.constant 0 : index
    %c0_1 = arith.constant 0 : index
    %0 = vector.load %arg2[%c0, %c0_0, %c0_1] : memref<1x8x32xf32, #tpu.memory_space<vmem>>, vector<1x8x32xf32>
    %1 = vector.shape_cast %0 : vector<1x8x32xf32> to vector<8x32xf32>
    %2 = arith.truncf %1 : vector<8x32xf32> to vector<8x32xbf16>
    %c0_2 = arith.constant 0 : index
    %c0_3 = arith.constant 0 : index
    %3 = vector.load %arg3[%c0_2, %c0_3] : memref<32x128xbf16, #tpu.memory_space<vmem>>, vector<32x128xbf16>
    %cst = arith.constant dense<0.000000e+00> : vector<8x128xf32>
    %4 = tpu.matmul %2, %3, %cst {dimension_numbers = #tpu.dot_dimension_numbers<[1], [0], [0], [1], [0, 0, 1, 1], [], []>} : vector<8x32xbf16>, vector<32x128xbf16>, vector<8x128xf32> -> vector<8x128xf32>
    %c0_4 = arith.constant 0 : index
    %c0_5 = arith.constant 0 : index
    %5 = vector.load %arg4[%c0_4, %c0_5] : memref<1x128xf32, #tpu.memory_space<vmem>>, vector<1x128xf32>
    %6 = vector.broadcast %5 : vector<1x128xf32> to vector<8x128xf32>
    %7 = arith.addf %4, %6 : vector<8x128xf32>
    %cst_6 = arith.constant 0.000000e+00 : f32
    %8 = vector.broadcast %cst_6 : f32 to vector<8x128xf32>
    %9 = arith.maximumf %7, %8 : vector<8x128xf32>
    %10 = arith.truncf %9 : vector<8x128xf32> to vector<8x128xbf16>
    %c0_7 = arith.constant 0 : index
    %c0_8 = arith.constant 0 : index
    %11 = vector.load %arg5[%c0_7, %c0_8] : memref<128x32xbf16, #tpu.memory_space<vmem>>, vector<128x32xbf16>
    %cst_9 = arith.constant dense<0.000000e+00> : vector<8x32xf32>
    %12 = tpu.matmul %10, %11, %cst_9 {dimension_numbers = #tpu.dot_dimension_numbers<[1], [0], [0], [1], [0, 0, 1, 1], [], []>} : vector<8x128xbf16>, vector<128x32xbf16>, vector<8x32xf32> -> vector<8x32xf32>
    %13 = arith.addf %1, %12 : vector<8x32xf32>
    %c0_10 = arith.constant 0 : index
    %c0_11 = arith.constant 0 : index
    %14 = vector.load %arg6[%c0_10, %c0_11] : memref<1x32xf32, #tpu.memory_space<vmem>>, vector<1x32xf32>
    %15 = vector.broadcast %14 : vector<1x32xf32> to vector<8x32xf32>
    %16 = arith.addf %13, %15 : vector<8x32xf32>
    %cst_12 = arith.constant dense<0.000000e+00> : vector<8xf32>
    %17 = vector.multi_reduction <add>, %16, %cst_12 [1] : vector<8x32xf32> to vector<8xf32>
    %18 = vector.shape_cast %17 : vector<8xf32> to vector<8x1xf32>
    %cst_13 = arith.constant 3.200000e+01 : f32
    %19 = vector.broadcast %cst_13 : f32 to vector<8x1xf32>
    %20 = arith.divf %18, %19 : vector<8x1xf32>
    %21 = vector.broadcast %20 : vector<8x1xf32> to vector<8x32xf32>
    %22 = arith.subf %16, %21 : vector<8x32xf32>
    %23 = arith.mulf %22, %22 : vector<8x32xf32>
    %cst_14 = arith.constant dense<0.000000e+00> : vector<8xf32>
    %24 = vector.multi_reduction <add>, %23, %cst_14 [1] : vector<8x32xf32> to vector<8xf32>
    %25 = vector.shape_cast %24 : vector<8xf32> to vector<8x1xf32>
    %cst_15 = arith.constant 3.200000e+01 : f32
    %26 = vector.broadcast %cst_15 : f32 to vector<8x1xf32>
    %27 = arith.divf %25, %26 : vector<8x1xf32>
    %cst_16 = arith.constant 9.99999974E-6 : f32
    %28 = vector.broadcast %cst_16 : f32 to vector<8x1xf32>
    %29 = arith.addf %27, %28 : vector<8x1xf32>
    %30 = math.rsqrt %29 : vector<8x1xf32>
    %31 = vector.broadcast %30 : vector<8x1xf32> to vector<8x32xf32>
    %32 = arith.mulf %22, %31 : vector<8x32xf32>
    %c0_17 = arith.constant 0 : index
    %c0_18 = arith.constant 0 : index
    %33 = vector.load %arg7[%c0_17, %c0_18] : memref<1x32xf32, #tpu.memory_space<vmem>>, vector<1x32xf32>
    %34 = vector.broadcast %33 : vector<1x32xf32> to vector<8x32xf32>
    %35 = arith.mulf %32, %34 : vector<8x32xf32>
    %c0_19 = arith.constant 0 : index
    %c0_20 = arith.constant 0 : index
    %36 = vector.load %arg8[%c0_19, %c0_20] : memref<1x32xf32, #tpu.memory_space<vmem>>, vector<1x32xf32>
    %37 = vector.broadcast %36 : vector<1x32xf32> to vector<8x32xf32>
    %38 = arith.addf %35, %37 : vector<8x32xf32>
    %c0_21 = arith.constant 0 : index
    %c0_22 = arith.constant 0 : index
    %c0_23 = arith.constant 0 : index
    %39 = vector.load %arg9[%c0_21, %c0_22, %c0_23] : memref<1x8x32xf32, #tpu.memory_space<vmem>>, vector<1x8x32xf32>
    %40 = vector.shape_cast %39 : vector<1x8x32xf32> to vector<8x32xf32>
    %41 = vector.shape_cast %38 : vector<8x32xf32> to vector<1x8x32xf32>
    tpu.vector_store %arg9[%c0_21, %c0_22, %c0_23], %41 {strides = array<i32>} : memref<1x8x32xf32, #tpu.memory_space<vmem>>, vector<1x8x32xf32>,
    return
  }
  func.func @transform_0(%arg0: i32, %arg1: i32) -> (i32, i32, i32) {
    %c0_i32 = arith.constant 0 : i32
    %c0_i32_0 = arith.constant 0 : i32
    return %arg0, %arg1, %c0_i32 : i32, i32, i32
  }
  func.func @transform_1(%arg0: i32, %arg1: i32) -> (i32, i32) {
    %c0_i32 = arith.constant 0 : i32
    %c0_i32_0 = arith.constant 0 : i32
    %c0_i32_1 = arith.constant 0 : i32
    return %c0_i32, %c0_i32_0 : i32, i32
  }
  func.func @transform_2(%arg0: i32, %arg1: i32) -> (i32, i32) {
    %c0_i32 = arith.constant 0 : i32
    %c0_i32_0 = arith.constant 0 : i32
    %c0_i32_1 = arith.constant 0 : i32
    return %c0_i32, %c0_i32_0 : i32, i32
  }
  func.func @transform_3(%arg0: i32, %arg1: i32) -> (i32, i32) {
    %c0_i32 = arith.constant 0 : i32
    %c0_i32_0 = arith.constant 0 : i32
    %c0_i32_1 = arith.constant 0 : i32
    return %c0_i32, %c0_i32_0 : i32, i32
  }
  func.func @transform_4(%arg0: i32, %arg1: i32) -> (i32, i32) {
    %c0_i32 = arith.constant 0 : i32
    %c0_i32_0 = arith.constant 0 : i32
    %c0_i32_1 = arith.constant 0 : i32
    return %c0_i32, %c0_i32_0 : i32, i32
  }
  func.func @transform_5(%arg0: i32, %arg1: i32) -> (i32, i32) {
    %c0_i32 = arith.constant 0 : i32
    %c0_i32_0 = arith.constant 0 : i32
    %c0_i32_1 = arith.constant 0 : i32
    return %c0_i32, %c0_i32_0 : i32, i32
  }
  func.func @transform_6(%arg0: i32, %arg1: i32) -> (i32, i32) {
    %c0_i32 = arith.constant 0 : i32
    %c0_i32_0 = arith.constant 0 : i32
    %c0_i32_1 = arith.constant 0 : i32
    return %c0_i32, %c0_i32_0 : i32, i32
  }
  func.func @transform_7(%arg0: i32, %arg1: i32) -> (i32, i32, i32) {
    %c0_i32 = arith.constant 0 : i32
    %c0_i32_0 = arith.constant 0 : i32
    return %arg0, %arg1, %c0_i32 : i32, i32, i32
  }
}

</mosaic_0001>

<bundles_post_ra>
// kernel: encoder_pallas.6
= control target key start
LH: loop header
LB: loop body
LE: loop exit
PB: predicated region body
PF: predicated region fallthrough
CT: control target
= control target key end

     0   :  { %10 = vsyncpa [#allocation3], 0  ;;  %s902_s0 = inlined_call_operand.hbm [shape: f32[2,8,16], index: 0, kind: input, shape index: {}]   ;;  %s903_s1 = inlined_call_operand.vmem [shape: bf16[16,32], index: 1, kind: input, shape index: {}]   ;;  %s904_s2 = inlined_call_operand.hbm [shape: f32[1,32], index: 2, kind: input, shape index: {}]   ;;  %s905_s3 = inlined_call_operand.hbm [shape: f32[8,16], index: 3, kind: input, shape index: {}]   ;;  %s906_s4 = inlined_call_operand.vmem [shape: f32[8,16], index: 4, kind: input, shape index: {}]   ;;  %s907_s5 = inlined_call_operand.vmem [shape: f32[2,8,32], index: 5, kind: output, shape index: {}]  }
   0x1   :  { %12 = vsyncpa [#allocation3 + $0x1], 0 }
   0x2   :  { %13 = vsyncpa [#allocation5], 0  ;;  %s778_s18 = smov 0   ;;  %s780_s19 = smov 0  }
   0x3   :  { %s782_s20 = smov 0   ;;  %s784_s21 = smov 0  }
   0x4   :  { %s786_s22 = smov 0   ;;  %s788_s23 = smov 0  }
   0x5 LB: > { %s497_s24 = sadd.s32 4294967295, %s742_s23   ;;  %p53_p0 = scmp.ne.s32.totalorder %s726_s19, %s722_s18  ;;  %s742_s23 = sphi %s788_s23, %s19_s23   ;;  %s738_s22 = sphi %s786_s22, %s916_s22   ;;  %s734_s21 = sphi %s784_s21, %s915_s21   ;;  %s730_s20 = sphi %s782_s20, %s914_s20   ;;  %s726_s19 = sphi %s780_s19, %s913_s19   ;;  %s722_s18 = sphi %s778_s18, %s912_s18  }
   0x6   : > { %p808_p1 = scmp.eq.s32.totalorder %s497_s24, 0  ;;  %p499_p2 = scmp.ge.s32.totalorder %s742_s23, 1 }
   0x7   : > { %p186_p3 = scmp.lt.s32.totalorder %s742_s23, 3  ;;  %s201_s29 = sshll.u32 %s904_s2, 4  ;;  %s202_s29 = int_to_ptr.hbm [resolvable:$true] %s201_s29 }
   0x8   : > { %p816_p4 = por %p808_p1, %p53_p0  ;;  %s744_s6 = smov [#allocation4]  }
   0x9   : > { %p823_p5 = pnand %p499_p2, %p186_p3  ;;  %s203_s7 = sshll.u32 %s744_s6, 4  ;;  %s204_s7 = int_to_ptr.vmem [resolvable:$true] %s203_s7 }
   0xa   : > { %s215_s10 = sshll.u32 %s905_s3, 4  ;;  %s745_s11 = smov [#allocation6]   ;;  %s216_s10 = int_to_ptr.hbm [resolvable:$true] %s215_s10 }
   0xb   : > { %p529_p6 = pneg %p823_p5  ;;  %s217_s12 = sshll.u32 %s745_s11, 4  ;;  %s218_s12 = int_to_ptr.vmem [resolvable:$true] %s217_s12 }
   0xc   : > { %s31_s13 = sadd.s32 1, %s738_s22  ;;  %s40_s14 = sadd.s32 1, %s730_s20 }
   0xd   : > { %p530_p7 = pnand %p529_p6, %p808_p1  ;;  %p33_p8 = scmp.ge.s32.totalorder %s31_s13, 2 }
   0xe   : > { %p47_p9 = scmp.ne.s32.totalorder %s730_s20, %s726_s19  ;;  %p48_p10 = scmp.eq.s32.totalorder %s742_s23, 0 }
   0xf   : > { %532 = dma.hbm_to_vmem [thread:$0]  (!%p530_p7), %s202_s29, 16, %s204_s7, [#allocation5]  }
  0x10   : > { %535 = dma.hbm_to_vmem [thread:$0]  (!%p530_p7), %s216_s10, 128, %s218_s12, [#allocation5]  }
  0x11   : > { %p542_p11 = scmp.lt.s32.totalorder %s742_s23, 2  ;;  %s918_s13 = smov (%p33_p8, %s31_s13), 0 }
  0x12   : > { %p842_p12 = por %p48_p10, %p47_p9  ;;  %s235_s16 = sand.u32 1, %s730_s20  }
  0x13   : > { %s35_s17 = ssub.s32 %s738_s22, %s918_s13  ;;  %s504_s18 = sshll.u32 %s235_s16, 3 }
  0x14   : > { %p38_p13 = scmp.eq.s32.totalorder %s35_s17, 0  ;;  %s505_s24 = sshll.u32 %s738_s22, 3 }
  0x15   : > { %s244_s6 = scalar_lea.hbm %s902_s0, %s505_s24  ;;  %s239_s7 = scalar_lea.vmem [#allocation2], %s504_s18 }
  0x16   : > { %s851_s27 = scalar_select %p38_p13, %s730_s20, %s40_s14  }
  0x17   : > { %s248_s8 = sshll.u32 %s239_s7, 4  ;;  %s246_s9 = sshll.u32 %s244_s6, 4  ;;  %s249_s8 = int_to_ptr.vmem [resolvable:$true] %s248_s8  ;;  %s247_s9 = int_to_ptr.hbm [resolvable:$true] %s246_s9 }
  0x18   : > { %p537_p0 = pnand %p542_p11, %p842_p12  ;;  %s236_s10 = scalar_lea.sflag [#allocation3], %s235_s16 }
  0x19   : > { %257 = sbr.rel (%p823_p5) target bundleno = 294 (0x126), region = 40  ;;  %s259_s11 = sand.u32 (!%p823_p5), 1, %s726_s19  }
  0x1a   : > { %539 = dma.hbm_to_vmem [thread:$0]  (!%p537_p0), %s247_s9, 128, %s249_s8, %s236_s10  }
  0x1b   : > { %s507_s12 = sshll.u32 (!%p823_p5), %s259_s11, 3  ;;  %s260_s14 = scalar_lea.sflag (!%p823_p5), [#allocation3], %s259_s11 }
  0x1c   : > { %s263_s17 = scalar_lea.vmem (!%p823_p5), [#allocation2], %s507_s12 }
  0x1e   : > { %713 = dma.done.wait (%p816_p4), %s260_s14, 128  }
  0x1f   : > { %715 = vsyncadd (%p816_p4), %s260_s14, 4294967168 }
  0x20   : > { %717 = dma.done.wait (%p808_p1), [#allocation5], 144  }
  0x21   : > { %719 = vsyncadd (%p808_p1), [#allocation5], 4294967152  ;;  %v518_v0 = vld [vmem:[%s903_s1] sm:$0xff]  ;;  %s746_s24 = smov 16   ;;  %vm333_vm0 = vcmask 130048   ;;  %v350_v4 = vld [vmem:[#allocation6] sm:$0xff] }
  0x22   : > { %v319_v1 = vld [vmem:[%s263_s17] sm:$0xff]  ;;  %344 = vmatpush.bf16.msra.mxu0 %v518_v0  ;;  %v597_v5 = vld [vmem:[#allocation4] ss:$0 sm:$0xff]  ;;  %s747_s25 = smov 112   ;;  %p311_p1 = scmp.lt.s32.totalorder %s734_s21, 1  ;;  %vm375_vm1 = vcmask 261120  }
  0x23   : > { %v351_v2 = vld [vmem:[%s906_s4] sm:$0xff]  ;;  %v320_v3 = vpack.c.bf16 %v319_v1, %v319_v1 }
  0x24   : > { %354 = vrot.lane.b32.xlu0 %v351_v2, %s746_s24  ;;  %s920_s21 = smov (!%p311_p1, %s734_s21), 1 }
  0x25   : > { %515 = vmatmul.msk.bf16.vlgmr.msra.gmra.mxu0 %vm333_vm0, %v320_v3  ;;  %s510_s26 = sshll.u32 %s920_s21, 3 }
  0x26   : > { %s317_s6 = scalar_lea.vmem %s907_s5, %s510_s26 }
  0x2c   : > { %364 = vrot.lane.b32.xlu0 %v350_v4, %s746_s24 }
  0x96   : > { %v355_v8 = vpop.permute.xlu0 %354 }
  0x9e   : > { %v365_v13 = vpop.permute.xlu0 %364 }
  0xa2   : > { %v346_v6 = vpop.f32.mrf.mxu0 }
  0xa3   : > { %v347_v7 = vadd.f32 %v597_v5, %v346_v6 }
  0xa5   : > { %v357_v9 = vmul.f32 %v355_v8, %v347_v7  ;;  %v368_v11 = vmul.f32 %v351_v2, %v347_v7  ;;  %v367_v14 = vmul.f32 %v365_v13, %v347_v7  ;;  %v352_v15 = vmul.f32 %v350_v4, %v347_v7 }
  0xa7   : > { %359 = vrot.lane.b32.xlu1 %v357_v9, %s747_s25 }
  0xaa   : > { %v348_v10 = vpop.f32.mrf.mxu0 }
  0xaf   : > { %370 = vrot.lane.b32.xlu1 %v368_v11, %s746_s24 }
 0x119   : > { %v360_v12 = vpop.permute.xlu1 %359 }
 0x11a   : > { %v362_v17 = vsub.f32 %v352_v15, %v360_v12 }
 0x121   : > { %v371_v16 = vpop.permute.xlu1 %370 }
 0x122   : > { %v373_v18 = vadd.f32 %v371_v16, %v367_v14 }
 0x124   : > { %v374_v19 = vsel %vm333_vm0, %v362_v17, %v373_v18 }
 0x125   : > { %376 = vst.msk [vmem:[%s317_s6] sm:$0xff] %vm375_vm1, %v374_v19 }
 0x126 PF: > { %s19_s23 = sadd.s32 1, %s742_s23   ;;  %s912_s18 = smov %s726_s19 }
 0x127   : > { %p16_p2 = scmp.ge.s32.totalorder %s19_s23, 4   ;;  %s913_s19 = smov %s730_s20 }
 0x128   : > { %s914_s20 = smov %s851_s27  ;;  %s915_s21 = smov %s738_s22 }
 0x129   : > { %s916_s22 = smov %s918_s13  ;;  %18 = sbr.rel (!%p16_p2) target bundleno = 5 (0x5), region = 92 }
 0x12e   :  { %402 = vsyncpa [#allocation3], 1 }
 0x12f   :  { %404 = vsyncpa [#allocation3 + $0x1], 1 }
 0x130   :  { %405 = vsyncpa [#allocation5], 1 }

// kernel: encoder_pallas.8
= control target key start
LH: loop header
LB: loop body
LE: loop exit
PB: predicated region body
PF: predicated region fallthrough
CT: control target
= control target key end

     0   :  { %12 = vsyncpa [#allocation3], 0  ;;  %s1117_s0 = inlined_call_operand.vmem [shape: f32[2,8,32], index: 0, kind: input, shape index: {}]   ;;  %s1118_s1 = inlined_call_operand.vmem [shape: bf16[32,128], index: 1, kind: input, shape index: {}]   ;;  %s1119_s2 = inlined_call_operand.hbm [shape: f32[1,128], index: 2, kind: input, shape index: {}]   ;;  %s1120_s3 = inlined_call_operand.vmem [shape: bf16[128,32], index: 3, kind: input, shape index: {}]   ;;  %s1121_s4 = inlined_call_operand.hbm [shape: f32[1,32], index: 4, kind: input, shape index: {}]   ;;  %s1122_s5 = inlined_call_operand.hbm [shape: f32[1,32], index: 5, kind: input, shape index: {}]   ;;  %s1123_s6 = inlined_call_operand.hbm [shape: f32[1,32], index: 6, kind: input, shape index: {}]   ;;  %s1124_s7 = inlined_call_operand.vmem [shape: f32[2,8,32], index: 7, kind: output, shape index: {}]  }
   0x1   :  { %13 = vsyncpa [#allocation5], 0 }
   0x2   :  { %14 = vsyncpa [#allocation8], 0  ;;  %s988_s24 = smov 0   ;;  %s990_s25 = smov 0  }
   0x3   :  { %s992_s26 = smov 0  }
   0x4 LB: > { %s249_s29 = sshll.u32 %s1121_s4, 4  ;;  %s645_s30 = sadd.s32 4294967295, %s941_s26   ;;  %s941_s26 = sphi %s992_s26, %s20_s26   ;;  %s937_s25 = sphi %s990_s25, %s1129_s25   ;;  %s933_s24 = sphi %s988_s24, %s1128_s24   ;;  %s250_s29 = int_to_ptr.hbm [resolvable:$true] %s249_s29 }
   0x5   : > { %p647_p0 = scmp.ge.s32.totalorder %s941_s26, 1  ;;  %p219_p1 = scmp.lt.s32.totalorder %s941_s26, 3 }
   0x6   : > { %p1009_p2 = scmp.eq.s32.totalorder %s645_s30, 0  ;;  %s943_s10 = smov [#allocation4]  }
   0x7   : > { %p1013_p3 = pnand %p647_p0, %p219_p1  ;;  %s251_s11 = sshll.u32 %s943_s10, 4  ;;  %s252_s11 = int_to_ptr.vmem [resolvable:$true] %s251_s11 }
   0x8   : > { %s32_s13 = sadd.s32 1, %s937_s25  ;;  %s234_s16 = sshll.u32 %s1119_s2, 4  ;;  %s235_s16 = int_to_ptr.hbm [resolvable:$true] %s234_s16 }
   0x9   : > { %p729_p4 = pneg %p1013_p3  ;;  %p34_p6 = scmp.ge.s32.totalorder %s32_s13, 2 }
   0xa   : > { %s261_s19 = sshll.u32 %s1122_s5, 4  ;;  %s944_s20 = smov [#allocation2]   ;;  %s262_s19 = int_to_ptr.hbm [resolvable:$true] %s261_s19 }
   0xb   : > { %p1021_p5 = pnand %p1009_p2, %p729_p4  ;;  %s1131_s13 = smov (%p34_p6, %s32_s13), 0 }
   0xc   : > { %s236_s21 = sshll.u32 %s944_s20, 4  ;;  %s945_s22 = smov [#allocation6]   ;;  %s237_s21 = int_to_ptr.vmem [resolvable:$true] %s236_s21 }
   0xd   : > { %735 = dma.hbm_to_vmem [thread:$0]  (!%p1021_p5), %s250_s29, 16, %s252_s11, [#allocation5]  }
   0xe   : > { %732 = dma.hbm_to_vmem [thread:$0]  (!%p1021_p5), %s235_s16, 16, %s237_s21, [#allocation3]  }
   0xf   : > { %s263_s23 = sshll.u32 %s945_s22, 4  ;;  %s273_s30 = sshll.u32 %s1123_s6, 4  ;;  %s264_s23 = int_to_ptr.vmem [resolvable:$true] %s263_s23  ;;  %s274_s30 = int_to_ptr.hbm [resolvable:$true] %s273_s30 }
  0x10   : > { %738 = dma.hbm_to_vmem [thread:$0]  (!%p1021_p5), %s262_s19, 16, %s264_s23, [#allocation5]  }
  0x11   : > { %s946_s29 = smov [#allocation7]   ;;  %298 = sbr.rel (%p1013_p3) target bundleno = 566 (0x236), region = 48 }
  0x12   : > { %s275_s10 = sshll.u32 %s946_s29, 4  ;;  %s276_s10 = int_to_ptr.vmem [resolvable:$true] %s275_s10 }
  0x13   : > { %741 = dma.hbm_to_vmem [thread:$0]  (!%p1021_p5), %s274_s30, 16, %s276_s10, [#allocation8]  }
  0x16   : > { %920 = dma.done.wait (%p1009_p2), [#allocation3], 16  }
  0x17   : > { %922 = vsyncadd (%p1009_p2), [#allocation3], 4294967280 }
  0x18   : > { %924 = dma.done.wait (%p1009_p2), [#allocation5], 32  }
  0x19   : > { %926 = vsyncadd (%p1009_p2), [#allocation5], 4294967264 }
  0x1a   : > { %928 = dma.done.wait (%p1009_p2), [#allocation8], 16  }
  0x1b   : > { %930 = vsyncadd (%p1009_p2), [#allocation8], 4294967280  ;;  %p350_p7 = scmp.lt.s32.totalorder %s933_s24, 1  ;;  %v704_v0 = vld [vmem:[%s1118_s1 + $0x8] sm:$0xff]  ;;  %v712_v1 = vld [vmem:[%s1120_s3 + $0x38] sm:$0xff]  ;;  %vm387_vm0 = vcmask 261120  }
  0x1c   : > { %397 = vmatpush.bf16.msra.mxu0 %v704_v0  ;;  %v703_v2 = vld [vmem:[%s1118_s1] sm:$0xff]  ;;  %470 = vmatpush.bf16.msra.mxu1 %v712_v1  ;;  %v711_v4 = vld [vmem:[%s1120_s3 + $0x30] sm:$0xff]  ;;  %v710_v6 = vld [vmem:[%s1120_s3 + $0x28] sm:$0xff]  ;;  %v947_v24 = vmov 32.0  }
  0x1d   : > { %s1133_s24 = smov (!%p350_p7, %s933_s24), 1  ;;  %v709_v7 = vld [vmem:[%s1120_s3 + $0x20] sm:$0xff]  ;;  %v708_v8 = vld [vmem:[%s1120_s3 + $0x18] sm:$0xff]  ;;  %v707_v9 = vld [vmem:[%s1120_s3 + $0x10] sm:$0xff]  ;;  %783 = vrcp.f32 %v947_v24 }
  0x1e   : > { %s658_s9 = sshll.u32 %s1133_s24, 3  ;;  %v706_v10 = vld [vmem:[%s1120_s3 + $0x8] sm:$0xff]  ;;  %v705_v11 = vld [vmem:[%s1120_s3] sm:$0xff] }
  0x1f   : > { %s356_s14 = scalar_lea.vmem %s1117_s0, %s658_s9  ;;  %v779_v12 = vld [vmem:[#allocation2] ss:$0 sm:$0xff]  ;;  %v780_v18 = vld [vmem:[#allocation4] ss:$0 sm:$0xff]  ;;  %v781_v45 = vld [vmem:[#allocation6] ss:$0 sm:$0xff]  ;;  %s363_s18 = scalar_lea.vmem %s1124_s7, %s658_s9 }
  0x20   : > { %v365_v3 = vld [vmem:[%s356_s14] sm:$0xff]  ;;  %398 = vmatpush.bf16.msra.mxu0 %v703_v2  ;;  %471 = vmatpush.bf16.msra.mxu1 %v711_v4 }
  0x21   : > { %v366_v5 = vpack.c.bf16 %v365_v3, %v365_v3  ;;  %v782_v47 = vld [vmem:[#allocation7] ss:$0 sm:$0xff] }
  0x23   : > { %668 = vmatmul.msk.bf16.vlgmr.msra.gmra.mxu0 %vm387_vm0, %v366_v5  ;;  %v784_v25 = vpop.eup %783 }
  0x24   : > { %472 = vmatpush.bf16.msra.mxu1 %v710_v6  ;;  %v493_v26 = vmul.f32 32.0, %v784_v25  ;;  %vm497_vm1 = vweird.f32 %v784_v25 }
  0x26   : > { %v494_v27 = vsub.f32 1.0, %v493_v26 }
  0x28   : > { %473 = vmatpush.bf16.msra.mxu1 %v709_v7  ;;  %v495_v28 = vmul.f32 %v784_v25, %v494_v27 }
  0x2a   : > { %v496_v29 = vadd.f32 %v784_v25, %v495_v28 }
  0x2c   : > { %474 = vmatpush.bf16.msra.mxu1 %v708_v8  ;;  %v498_v30 = vsel %vm497_vm1, %v784_v25, %v496_v29 }
  0x30   : > { %475 = vmatpush.bf16.msra.mxu1 %v707_v9 }
  0x34   : > { %476 = vmatpush.bf16.msra.mxu1 %v706_v10 }
  0x38   : > { %477 = vmatpush.bf16.msra.mxu1 %v705_v11 }
  0xa0   : > { %v400_v13 = vpop.f32.mrf.mxu0 }
  0xa1   : > { %v401_v14 = vadd.f32 %v779_v12, %v400_v13 }
  0xa3   : > { %v404_v15 = vmax.f32 %v401_v14, 0.0 }
  0xa5   : > { %v405_v16 = vpack.c.bf16 %v404_v15, %v404_v15 }
  0xa7   : > { %478 = vmatmul.bf16.vlgmr.msra.gmra.mxu1 %v405_v16 }
  0xa8   : > { %v402_v17 = vpop.f32.mrf.mxu0 }
 0x124   : > { %v479_v19 = vpop.f32.mrf.mxu1 }
 0x125   : > { %v483_v20 = vadd.f32 %v479_v19, %v365_v3 }
 0x127   : > { %v488_v21 = vadd.f32 %v780_v18, %v483_v20 }
 0x129   : > { %v489_v22 = vsel %vm387_vm0, %v488_v21, 0.0 }
 0x12a   : > { %490 = vadd.xlane.f32.xlu0 %v489_v22 }
 0x12c   : > { %v481_v23 = vpop.f32.mrf.mxu1 }
 0x19d   : > { %v491_v31 = vpop.xlane.xlu0 %490 }
 0x19e   : > { %v499_v32 = vmul.f32 %v498_v30, %v491_v31 }
 0x1a0   : > { %v500_v33 = vsub.f32 %v488_v21, %v499_v32 }
 0x1a2   : > { %v501_v34 = vmul.f32 %v500_v33, %v500_v33 }
 0x1a4   : > { %v502_v35 = vsel %vm387_vm0, %v501_v34, 0.0 }
 0x1a5   : > { %503 = vadd.xlane.f32.xlu0 %v502_v35 }
 0x218   : > { %v504_v36 = vpop.xlane.xlu0 %503 }
 0x219   : > { %v505_v37 = vmul.f32 %v504_v36, %v498_v30 }
 0x21b   : > { %v506_v38 = vadd.f32 1e-05, %v505_v37 }
 0x21d   : > { %785 = vrsqrt.f32 %v506_v38  ;;  %vm513_vm3 = vweird.f32 %v506_v38 }
 0x223   : > { %v786_v39 = vpop.eup %785 }
 0x224   : > { %v508_v40 = vmul.f32 %v786_v39, %v506_v38  ;;  %vm514_vm2 = vweird.f32 %v786_v39 }
 0x225   : > { %vm515_vm4 = vmor %vm513_vm3, %vm514_vm2 }
 0x226   : > { %v509_v41 = vmul.f32 %v786_v39, %v508_v40 }
 0x228   : > { %v510_v42 = vmul.f32 0.5, %v509_v41 }
 0x22a   : > { %v511_v43 = vsub.f32 1.5, %v510_v42 }
 0x22c   : > { %v512_v44 = vmul.f32 %v786_v39, %v511_v43 }
 0x22e   : > { %v516_v46 = vsel %vm515_vm4, %v786_v39, %v512_v44 }
 0x22f   : > { %v517_v48 = vmul.f32 %v516_v46, %v500_v33 }
 0x231   : > { %v522_v49 = vmul.f32 %v781_v45, %v517_v48 }
 0x233   : > { %v527_v50 = vadd.f32 %v782_v47, %v522_v49 }
 0x235   : > { %528 = vst.msk [vmem:[%s363_s18] sm:$0xff] %vm387_vm0, %v527_v50 }
 0x236 PF: > { %s20_s26 = sadd.s32 1, %s941_s26   ;;  %s1128_s24 = smov %s937_s25 }
 0x237   : > { %p17_p8 = scmp.ge.s32.totalorder %s20_s26, 4   ;;  %s1129_s25 = smov %s1131_s13 }
 0x239   :  { %19 = sbr.rel (!%p17_p8) target bundleno = 4 (0x4), region = 95 }
 0x23e   :  { %554 = vsyncpa [#allocation3], 1 }
 0x23f   :  { %556 = vsyncpa [#allocation3 + $0x1], 1 }
 0x240   :  { %557 = vsyncpa [#allocation5], 1 }
 0x241   :  { %558 = vsyncpa [#allocation8], 1 }

// kernel: encoder_pallas.7
= control target key start
LH: loop header
LB: loop body
LE: loop exit
PB: predicated region body
PF: predicated region fallthrough
CT: control target
= control target key end

     0   :  { %s2176_s0 = inlined_call_operand.vmem [shape: f32[2,8,32], index: 0, kind: input, shape index: {}]   ;;  %s2177_s1 = inlined_call_operand.hbm [shape: bf16[32,32], index: 1, kind: input, shape index: {}]   ;;  %s2178_s2 = inlined_call_operand.hbm [shape: f32[1,32], index: 2, kind: input, shape index: {}]   ;;  %s2179_s3 = inlined_call_operand.hbm [shape: bf16[32,64], index: 3, kind: input, shape index: {}]   ;;  %s2180_s4 = inlined_call_operand.hbm [shape: f32[1,64], index: 4, kind: input, shape index: {}]   ;;  %s2181_s5 = inlined_call_operand.hbm [shape: bf16[32,32], index: 5, kind: input, shape index: {}]   ;;  %s2182_s6 = inlined_call_operand.hbm [shape: f32[1,32], index: 6, kind: input, shape index: {}]   ;;  %s2183_s7 = inlined_call_operand.hbm [shape: f32[1,32], index: 7, kind: input, shape index: {}]   ;;  %s2184_s8 = inlined_call_operand.hbm [shape: f32[1,32], index: 8, kind: input, shape index: {}]   ;;  %s2185_s9 = inlined_call_operand.hbm [shape: f32[8,16], index: 9, kind: input, shape index: {}]   ;;  %s2186_s10 = inlined_call_operand.hbm [shape: f32[8,16], index: 10, kind: input, shape index: {}]   ;;  %s2187_s11 = inlined_call_operand.vmem [shape: f32[2,8,32], index: 11, kind: output, shape index: {}]  }
   0x1   :  { %2188 = sst [smem:[#allocation25_spill]] %s2177_s1 }
   0x2   :  { %2189 = sst [smem:[#allocation26_spill]] %s2178_s2 }
   0x3   :  { %2190 = sst [smem:[#allocation27_spill]] %s2179_s3 }
   0x4   :  { %16 = vsyncpa [#allocation4], 0 }
   0x5   :  { %17 = vsyncpa [#allocation6], 0 }
   0x6   :  { %18 = vsyncpa [#allocation9], 0 }
   0x7   :  { %19 = vsyncpa [#allocation12], 0 }
   0x8   :  { %20 = vsyncpa [#allocation15], 0 }
   0x9   :  { %21 = vsyncpa [#allocation18], 0  ;;  %s1933_s17 = smov 0   ;;  %s1935_s18 = smov 0  }
   0xa   :  { %s1937_s19 = smov 0  }
   0xb LB: > { %s2191_s2 = sld [smem:[#allocation26_spill]]  ;;  %s1259_s23 = sadd.s32 4294967295, %s1843_s19   ;;  %s1843_s19 = sphi %s1937_s19, %s27_s19   ;;  %s1839_s18 = sphi %s1935_s18, %s2198_s18   ;;  %s1835_s17 = sphi %s1933_s17, %s2197_s17  }
   0xc   : > { %p1261_p0 = scmp.ge.s32.totalorder %s1843_s19, 1  ;;  %p308_p1 = scmp.lt.s32.totalorder %s1843_s19, 3 }
   0xd   : > { %p1954_p2 = scmp.eq.s32.totalorder %s1259_s23, 0  ;;  %s1845_s26 = smov [#allocation5]  }
   0xe   : > { %p1958_p3 = pnand %p1261_p0, %p308_p1  ;;  %s336_s27 = sshll.u32 %s1845_s26, 4  ;;  %s337_s27 = int_to_ptr.vmem [resolvable:$true] %s336_s27 }
   0xf   : > { %s360_s30 = sshll.u32 %s2180_s4, 4  ;;  %s386_s14 = sshll.u32 %s2182_s6, 4  ;;  %s361_s30 = int_to_ptr.hbm [resolvable:$true] %s360_s30  ;;  %s387_s14 = int_to_ptr.hbm [resolvable:$true] %s386_s14 }
  0x10   : > { %p1369_p4 = pneg %p1958_p3  ;;  %s1846_s16 = smov [#allocation8]  }
  0x11   : > { %s334_s22 = sshll.u32 %s2191_s2, 4  ;;  %s362_s20 = sshll.u32 %s1846_s16, 4  ;;  %s335_s22 = int_to_ptr.hbm [resolvable:$true] %s334_s22  ;;  %s363_s20 = int_to_ptr.vmem [resolvable:$true] %s362_s20 }
  0x12   : > { %p1972_p5 = pnand %p1954_p2, %p1369_p4  ;;  %s1847_s21 = smov [#allocation11]  }
  0x13   : > { %s388_s23 = sshll.u32 %s1847_s21, 4  ;;  %s410_s29 = sshll.u32 %s2184_s8, 4  ;;  %s389_s23 = int_to_ptr.vmem [resolvable:$true] %s388_s23  ;;  %s411_s29 = int_to_ptr.hbm [resolvable:$true] %s410_s29 }
  0x14   : > { %1375 = dma.hbm_to_vmem [thread:$0]  (!%p1972_p5), %s335_s22, 16, %s337_s27, [#allocation6]  }
  0x15   : > { %1381 = dma.hbm_to_vmem [thread:$0]  (!%p1972_p5), %s361_s30, 16, %s363_s20, [#allocation9]  }
  0x16   : > { %1387 = dma.hbm_to_vmem [thread:$0]  (!%p1972_p5), %s387_s14, 16, %s389_s23, [#allocation12]  }
  0x17   : > { %s1848_s12 = smov [#allocation14]   ;;  %s39_s16 = sadd.s32 1, %s1839_s18 }
  0x18   : > { %s412_s13 = sshll.u32 %s1848_s12, 4  ;;  %p41_p6 = scmp.ge.s32.totalorder %s39_s16, 2  ;;  %s413_s13 = int_to_ptr.vmem [resolvable:$true] %s412_s13 }
  0x19   : > { %1393 = dma.hbm_to_vmem [thread:$0]  (!%p1972_p5), %s411_s29, 16, %s413_s13, [#allocation15]  }
  0x1a   : > { %s2195_s1 = sld [smem:[#allocation25_spill]]  ;;  %s2200_s16 = smov (%p41_p6, %s39_s16), 0 }
  0x1b   : > { %s1849_s20 = smov [#allocation3]   ;;  %s1850_s26 = smov 64  }
  0x1c   : > { %s321_s21 = sshll.u32 %s1849_s20, 4  ;;  %s1851_s14 = smov 4   ;;  %s322_s21 = int_to_ptr.vmem [resolvable:$true] %s321_s21 }
  0x1d   : > { %s2196_s3 = sld [smem:[#allocation27_spill]]  ;;  %s1852_s12 = smov [#allocation7]  }
  0x1e   : > { %s347_s13 = sshll.u32 %s1852_s12, 4  ;;  %s1853_s20 = smov [#allocation10]   ;;  %s348_s13 = int_to_ptr.vmem [resolvable:$true] %s347_s13 }
  0x1f   : > { %s373_s2 = sshll.u32 %s1853_s20, 4  ;;  %s398_s23 = sshll.u32 %s2183_s7, 4  ;;  %s374_s2 = int_to_ptr.vmem [resolvable:$true] %s373_s2  ;;  %s399_s23 = int_to_ptr.hbm [resolvable:$true] %s398_s23 }
  0x20   : > { %s319_s30 = sshll.u32 %s2195_s1, 4  ;;  %s371_s1 = sshll.u32 %s2181_s5, 4  ;;  %s320_s30 = int_to_ptr.hbm [resolvable:$true] %s319_s30  ;;  %s372_s1 = int_to_ptr.hbm [resolvable:$true] %s371_s1 }
  0x21   : > { %1372 = dma.hbm_to_vmem [thread:$0]  (!%p1972_p5), %s320_s30, 256, %s322_s21, [#allocation4], %s1850_s26, %s1850_s26, %s1851_s14  }
  0x22   : > { %1384 = dma.hbm_to_vmem [thread:$0]  (!%p1972_p5), %s372_s1, 256, %s374_s2, [#allocation9], %s1850_s26, %s1850_s26, %s1851_s14  }
  0x23   : > { %s345_s29 = sshll.u32 %s2196_s3, 4  ;;  %s422_s22 = sshll.u32 %s2185_s9, 4  ;;  %s346_s29 = int_to_ptr.hbm [resolvable:$true] %s345_s29  ;;  %s423_s22 = int_to_ptr.hbm [resolvable:$true] %s422_s22 }
  0x24   : > { %1378 = dma.hbm_to_vmem [thread:$0]  (!%p1972_p5), %s346_s29, 256, %s348_s13, [#allocation6], %s1850_s26, %s1850_s26, %s1851_s14  }
  0x25   : > { %s1854_s27 = smov [#allocation13]   ;;  %s1855_s29 = smov [#allocation16]  }
  0x26   : > { %s400_s3 = sshll.u32 %s1854_s27, 4  ;;  %s424_s13 = sshll.u32 %s1855_s29, 4  ;;  %s401_s3 = int_to_ptr.vmem [resolvable:$true] %s400_s3  ;;  %s425_s13 = int_to_ptr.vmem [resolvable:$true] %s424_s13 }
  0x27   : > { %1390 = dma.hbm_to_vmem [thread:$0]  (!%p1972_p5), %s399_s23, 16, %s401_s3, [#allocation12]  }
  0x28   : > { %s434_s21 = sshll.u32 %s2186_s10, 4  ;;  %s1856_s1 = smov [#allocation17]   ;;  %s435_s21 = int_to_ptr.hbm [resolvable:$true] %s434_s21 }
  0x29   : > { %1396 = dma.hbm_to_vmem [thread:$0]  (!%p1972_p5), %s423_s22, 128, %s425_s13, [#allocation15]  }
  0x2a   : > { %s436_s2 = sshll.u32 %s1856_s1, 4  ;;  %456 = sbr.rel (%p1958_p3) target bundleno = 1926 (0x786), region = 64  ;;  %s437_s2 = int_to_ptr.vmem [resolvable:$true] %s436_s2 }
  0x2b   : > { %1399 = dma.hbm_to_vmem [thread:$0]  (!%p1972_p5), %s435_s21, 128, %s437_s2, [#allocation18]  }
  0x2f   : > { %1810 = dma.done.wait (%p1954_p2), [#allocation4], 256  }
  0x30   : > { %1812 = vsyncadd (%p1954_p2), [#allocation4], 4294967040 }
  0x31   : > { %1814 = dma.done.wait (%p1954_p2), [#allocation6], 272  }
  0x32   : > { %1816 = vsyncadd (%p1954_p2), [#allocation6], 4294967024 }
  0x33   : > { %1818 = dma.done.wait (%p1954_p2), [#allocation9], 272  }
  0x34   : > { %1820 = vsyncadd (%p1954_p2), [#allocation9], 4294967024 }
  0x35   : > { %1822 = dma.done.wait (%p1954_p2), [#allocation12], 32  }
  0x36   : > { %1824 = vsyncadd (%p1954_p2), [#allocation12], 4294967264 }
  0x37   : > { %1826 = dma.done.wait (%p1954_p2), [#allocation15], 144  }
  0x38   : > { %1828 = vsyncadd (%p1954_p2), [#allocation15], 4294967152 }
  0x39   : > { %1830 = dma.done.wait (%p1954_p2), [#allocation18], 128  }
  0x3a   : > { %1832 = vsyncadd (%p1954_p2), [#allocation18], 4294967168  ;;  %p543_p7 = scmp.lt.s32.totalorder %s1835_s17, 1  ;;  %v1324_v0 = vld [vmem:[#allocation7 + $0x8] sm:$0xff]  ;;  %v1326_v1 = vld [vmem:[#allocation3 + $0x8] sm:$0xff]  ;;  %s1857_s24 = smov 16  }
  0x3b   : > { %v1323_v2 = vld [vmem:[#allocation7] sm:$0xff]  ;;  %v1325_v3 = vld [vmem:[#allocation3] sm:$0xff]  ;;  %591 = vmatpush.bf16.msra.mxu0 %v1324_v0  ;;  %704 = vmatpush.bf16.msra.mxu1 %v1326_v1  ;;  %vm581_vm0 = vcmask 261120   ;;  %v1473_v9 = vld [vmem:[#allocation5] ss:$0 sm:$0xff]  ;;  %s1858_s14 = smov 112  }
  0x3c   : > { %s2202_s17 = smov (!%p543_p7, %s1835_s17), 1  ;;  %v599_v5 = vld [vmem:[#allocation17] sm:$0xff]  ;;  %v2058_v6 = vld [vmem:[#allocation16] sm:$0xff]  ;;  %s1859_s23 = smov 120   ;;  %vm643_vm1 = vcmask 31744   ;;  %vm647_vm2 = vcmask 64512  }
  0x3d   : > { %s1284_s3 = sshll.u32 %s2202_s17, 3  ;;  %602 = vrot.lane.b32.xlu0 %v599_v5, %s1857_s24  ;;  %728 = vrot.lane.b32.xlu2 %v2058_v6, %s1857_s24  ;;  %v1472_v8 = vld [vmem:[#allocation8] ss:$0 sm:$0xff]  ;;  %s1860_s28 = smov 116   ;;  %vm650_vm3 = vcmask 97280   ;;  %vm653_vm4 = vcmask 130048  }
  0x3e   : > { %s546_s26 = scalar_lea.vmem %s2176_s0, %s1284_s3  ;;  %s1861_s12 = smov 12   ;;  %vm656_vm5 = vcmask 162816   ;;  %vm659_vm6 = vcmask 195584   ;;  %vm662_vm7 = vcmask 228352   ;;  %vm668_vm8 = vcmask 519168  }
  0x3f   : > { %v2056_v4 = vld [vmem:[%s546_s26] sm:$0xff]  ;;  %592 = vmatpush.bf16.msra.mxu0 %v1323_v2  ;;  %705 = vmatpush.bf16.msra.mxu1 %v1325_v3  ;;  %s1862_s22 = smov 8   ;;  %s1863_s27 = smov 4   ;;  %vm788_vm9 = vcmask 1043456  }
  0x40   : > { %v560_v7 = vpack.c.bf16 %v2056_v4, %v2056_v4  ;;  %s1864_s29 = smov 124   ;;  %s1865_s13 = smov 96  }
  0x41   : > { %s1866_s20 = smov 104   ;;  %s1867_s30 = smov 108  }
  0x42   : > { %1294 = vmatmul.msk.bf16.vlgmr.msra.gmra.mxu0 %vm581_vm0, %v560_v7  ;;  %1303 = vmatmul.msk.bf16.vlgmr.msra.gmra.mxu1 %vm581_vm0, %v560_v7  ;;  %s1868_s21 = smov 88   ;;  %s1869_s1 = smov 80  }
  0x43   : > { %s1870_s2 = smov 72   ;;  %s1871_s25 = smov 24  }
  0x45   : > { %613 = vrot.lane.b32.xlu0 %v2058_v6, %s1857_s24 }
  0x4d   : > { %717 = vrot.lane.b32.xlu0 %v599_v5, %s1857_s24 }
  0x97   : > { %v729_v29 = vpop.permute.xlu2 %728 }
  0xaf   : > { %v603_v18 = vpop.permute.xlu0 %602 }
  0xb7   : > { %v614_v20 = vpop.permute.xlu0 %613 }
  0xbf   : > { %v594_v10 = vpop.f32.mrf.mxu0  ;;  %v707_v11 = vpop.f32.mrf.mxu1 }
  0xc0   : > { %v2070_v12 = vadd.f32 %v1472_v8, %v594_v10  ;;  %v2072_v13 = vadd.f32 %v1473_v9, %v707_v11  ;;  %v718_v36 = vpop.permute.xlu0 %717 }
  0xc2   : > { %v732_v14 = vmul.f32 %v2072_v13, %v599_v5  ;;  %v617_v15 = vmul.f32 %v599_v5, %v2070_v12  ;;  %v605_v19 = vmul.f32 %v603_v18, %v2070_v12  ;;  %v616_v21 = vmul.f32 %v614_v20, %v2070_v12 }
  0xc3   : > { %v600_v27 = vmul.f32 %v2058_v6, %v2070_v12  ;;  %v731_v35 = vmul.f32 %v729_v29, %v2072_v13  ;;  %v720_v38 = vmul.f32 %v718_v36, %v2072_v13  ;;  %v624_v53 = vpack.c.bf16 %v2070_v12, %v2070_v12 }
  0xc4   : > { %734 = vrot.lane.b32.xlu2 %v732_v14, %s1857_s24  ;;  %619 = vrot.lane.b32.xlu1 %v617_v15, %s1857_s24  ;;  %v715_v58 = vmul.f32 %v2072_v13, %v2058_v6 }
  0xc7   : > { %v596_v16 = vpop.f32.mrf.mxu0  ;;  %v709_v17 = vpop.f32.mrf.mxu1 }
  0xcc   : > { %607 = vrot.lane.b32.xlu1 %v605_v19, %s1858_s14 }
 0x11e   : > { %v735_v34 = vpop.permute.xlu2 %734 }
 0x11f   : > { %v737_v37 = vadd.f32 %v735_v34, %v731_v35 }
 0x121   : > { %v738_v39 = vpack.c.bf16 %v737_v37, %v737_v37 }
 0x123   : > { %v741_v40 = vunpack.c.l.b16 %v738_v39 }
 0x125   : > { %v2090_v41 = vpack.c.b16 %v741_v40, %v741_v40 }
 0x136   : > { %v620_v22 = vpop.permute.xlu1 %619 }
 0x137   : > { %v622_v23 = vadd.f32 %v620_v22, %v616_v21 }
 0x139   : > { %v623_v24 = vpack.c.bf16 %v622_v23, %v622_v23 }
 0x13b   : > { %v626_v25 = vunpack.c.l.b16 %v623_v24 }
 0x13d   : > { %v627_v26 = vpack.c.b16 %v626_v25, %v626_v25 }
 0x13e   : > { %v608_v28 = vpop.permute.xlu1 %607 }
 0x13f   : > { %v610_v30 = vsub.f32 %v600_v27, %v608_v28  ;;  %635 = vrot.lane.b32.xlu0 %v627_v26, %s1859_s23  ;;  %628 = vrot.lane.b32.xlu1 %v627_v26, %s1860_s28 }
 0x141   : > { %v611_v31 = vpack.c.bf16 %v610_v30, %v610_v30 }
 0x143   : > { %v631_v32 = vunpack.c.l.b16 %v611_v31 }
 0x145   : > { %v632_v33 = vpack.c.b16 %v631_v32, %v631_v32 }
 0x147   : > { %641 = vrot.lane.b32.xlu0 %v632_v33, %s1861_s12  ;;  %637 = vrot.lane.b32.xlu1 %v632_v33, %s1862_s22 }
 0x148   : > { %633 = vrot.lane.b32.xlu2 %v632_v33, %s1863_s27 }
 0x14f   : > { %722 = vrot.lane.b32.xlu1 %v720_v38, %s1858_s14 }
 0x150   : > { %639 = vrot.lane.b32.xlu2 %v627_v26, %s1864_s29 }
 0x158   : > { %743 = vrot.lane.b32.xlu2 %v2090_v41, %s1860_s28 }
 0x1a2   : > { %v634_v42 = vpop.permute.xlu2 %633 }
 0x1aa   : > { %v640_v49 = vpop.permute.xlu2 %639 }
 0x1b1   : > { %v636_v43 = vpop.permute.xlu0 %635  ;;  %v629_v44 = vpop.permute.xlu1 %628 }
 0x1b2   : > { %v646_v45 = vsel %vm643_vm1, %v611_v31, %v629_v44  ;;  %v744_v1 = vpop.permute.xlu2 %743 }
 0x1b3   : > { %v649_v46 = vsel %vm647_vm2, %v646_v45, %v634_v42 }
 0x1b4   : > { %v652_v48 = vsel %vm650_vm3, %v649_v46, %v636_v43 }
 0x1b9   : > { %v638_v47 = vpop.permute.xlu1 %637  ;;  %v642_v51 = vpop.permute.xlu0 %641 }
 0x1ba   : > { %v655_v50 = vsel %vm653_vm4, %v652_v48, %v638_v47 }
 0x1bb   : > { %v658_v52 = vsel %vm656_vm5, %v655_v50, %v640_v49 }
 0x1bc   : > { %v661_v54 = vsel %vm659_vm6, %v658_v52, %v642_v51 }
 0x1bd   : > { %v664_v55 = vsel %vm662_vm7, %v661_v54, %v623_v24 }
 0x1be   : > { %v666_v56 = vsel %vm581_vm0, %v664_v55, %v624_v53 }
 0x1bf   : > { %669 = vst.msk [vmem:[#allocation2] sm:$0xf] %vm668_vm8, %v666_v56 }
 0x1c1   : > { %v723_v57 = vpop.permute.xlu1 %722 }
 0x1c2   : > { %v725_v59 = vsub.f32 %v715_v58, %v723_v57 }
 0x1c4   : > { %v726_v0 = vpack.c.bf16 %v725_v59, %v725_v59 }
 0x1c6   : > { %v739_v60 = vld [vmem:[#allocation2] sm:$0xf]  ;;  %v748_v2 = vsel %vm643_vm1, %v726_v0, %v744_v1  ;;  %v806_v3 = vunpack.c.l.b16 %v726_v0 }
 0x1c7   : > { %v753_v61 = vsel %vm647_vm2, %v739_v60, 0  ;;  %v781_v62 = vunpack.c.l.b16 %v739_v60 }
 0x1c8   : > { %762 = vmatpush.bf16.xpose.msra.mxu2 %v753_v61  ;;  %v807_v5 = vpack.c.b16 %v806_v3, %v806_v3 }
 0x1c9   : > { %v2104_v63 = vpack.c.b16 %v781_v62, %v781_v62 }
 0x1cb   : > { %783 = vrot.lane.b32.xlu2 %v2104_v63, %s1865_s13 }
 0x1cf   : > { %1304 = vmatmul.msk.bf16.vlgmr.msra.gmra.mxu2 %vm647_vm2, %v748_v2 }
 0x1d3   : > { %815 = vrot.lane.b32.xlu2 %v2104_v63, %s1859_s23 }
 0x1db   : > { %808 = vrot.lane.b32.xlu2 %v807_v5, %s1864_s29 }
 0x1e3   : > { %810 = vrot.lane.b32.xlu2 %v2090_v41, %s1858_s14 }
 0x1eb   : > { %875 = vrot.lane.b32.xlu2 %v2104_v63, %s1858_s14 }
 0x1f3   : > { %935 = vrot.lane.b32.xlu2 %v2104_v63, %s1866_s20 }
 0x1fb   : > { %928 = vrot.lane.b32.xlu2 %v807_v5, %s1860_s28 }
 0x203   : > { %930 = vrot.lane.b32.xlu2 %v2090_v41, %s1866_s20 }
 0x225   : > { %v784_v6 = vpop.permute.xlu2 %783 }
 0x226   : > { %v790_v7 = vsel %vm788_vm9, %v784_v6, 0 }
 0x227   : > { %799 = vmatpush.bf16.msra.mxu3 %v790_v7 }
 0x22d   : > { %v816_v8 = vpop.permute.xlu2 %815 }
 0x22e   : > { %v820_v9 = vsel %vm647_vm2, %v816_v8, 0 }
 0x22f   : > { %829 = vmatpush.bf16.xpose.msrb.mxu3 %v820_v9 }
 0x235   : > { %v809_v10 = vpop.permute.xlu2 %808 }
 0x23d   : > { %v811_v11 = vpop.permute.xlu2 %810 }
 0x23e   : > { %v814_v12 = vsel %vm643_vm1, %v809_v10, %v811_v11 }
 0x245   : > { %v876_v13 = vpop.permute.xlu2 %875 }
 0x246   : > { %v880_v14 = vsel %vm647_vm2, %v876_v13, 0 }
 0x247   : > { %889 = vmatpush.bf16.xpose.msrb.mxu1 %v880_v14 }
 0x24d   : > { %v936_v26 = vpop.permute.xlu2 %935 }
 0x24e   : > { %v940_v28 = vsel %vm647_vm2, %v936_v26, 0 }
 0x252   : > { %v764_v15 = vpop.f32.mrf.mxu2 }
 0x253   : > { %v768_v16 = vsel %vm647_vm2, %v764_v15, -inf }
 0x254   : > { %769 = vmax.xlane.f32.xlu0 %v768_v16 }
 0x255   : > { %v929_v32 = vpop.permute.xlu2 %928 }
 0x25a   : > { %v766_v17 = vpop.f32.mrf.mxu2 }
 0x25d   : > { %v931_v33 = vpop.permute.xlu2 %930 }
 0x25e   : > { %v934_v34 = vsel %vm643_vm1, %v929_v32, %v931_v33 }
 0x268   : > { %868 = vrot.lane.b32.xlu0 %v807_v5, %s1859_s23 }
 0x2c7   : > { %v770_v18 = vpop.xlane.xlu0 %769 }
 0x2c8   : > { %v771_v19 = vsub.f32 %v764_v15, %v770_v18 }
 0x2ca   : > { %v772_v20 = vmul.f32 1.442695, %v771_v19 }
 0x2cc   : > { %1477 = vpow2.f32 %v772_v20 }
 0x2d2   : > { %v1478_v21 = vpop.eup %1477 }
 0x2d3   : > { %v774_v22 = vsel %vm647_vm2, %v1478_v21, 0.0 }
 0x2d4   : > { %775 = vadd.xlane.f32.xlu1 %v774_v22  ;;  %v1328_v22 = vld [vmem:[#allocation10 + $0x8] sm:$0xff] }
 0x2d5   : > { %1035 = vmatpush.bf16.msra.mxu1 %v1328_v22 }
 0x2da   : > { %v869_v29 = vpop.permute.xlu0 %868 }
 0x2ed   : > { %870 = vrot.lane.b32.xlu1 %v2090_v41, %s1867_s30 }
 0x347   : > { %v776_v23 = vpop.xlane.xlu1 %775 }
 0x348   : > { %1479 = vrcp.f32 %v776_v23  ;;  %v1327_v23 = vld [vmem:[#allocation10] sm:$0xff] }
 0x349   : > { %1036 = vmatpush.bf16.msra.mxu1 %v1327_v23 }
 0x34e   : > { %v1480_v24 = vpop.eup %1479 }
 0x34f   : > { %v778_v25 = vmul.f32 %v1480_v24, %v1478_v21 }
 0x351   : > { %v779_v27 = vpack.c.bf16 %v778_v25, %v778_v25 }
 0x353   : > { %1305 = vmatmul.msk.bf16.vlgmr.msra.gmra.mxu3 %vm647_vm2, %v779_v27 }
 0x354   : > { %949 = vmatpush.bf16.xpose.msra.mxu3 %v940_v28 }
 0x35f   : > { %v871_v30 = vpop.permute.xlu1 %870 }
 0x360   : > { %v874_v31 = vsel %vm643_vm1, %v869_v29, %v871_v30 }
 0x361   : > { %1308 = vmatmul.msk.bf16.vlgmr.msrb.gmra.mxu1 %vm647_vm2, %v874_v31  ;;  %v1474_v31 = vld [vmem:[#allocation11] ss:$0 sm:$0xff] }
 0x363   : > { %1306 = vmatmul.msk.bf16.vlgmr.msrb.gmra.mxu3 %vm647_vm2, %v814_v12 }
 0x373   : > { %1310 = vmatmul.msk.bf16.vlgmr.msra.gmra.mxu3 %vm647_vm2, %v934_v34 }
 0x3d6   : > { %v2134_v35 = vpop.f32.mrf.mxu3 }
 0x3de   : > { %v803_v36 = vpop.f32.mrf.mxu3  ;;  %v891_v37 = vpop.f32.mrf.mxu1 }
 0x3df   : > { %v895_v38 = vsel %vm647_vm2, %v891_v37, -inf }
 0x3e0   : > { %896 = vmax.xlane.f32.xlu2 %v895_v38  ;;  %v1872_v38 = vmov 32.0  }
 0x3e6   : > { %v831_v39 = vpop.f32.mrf.mxu3  ;;  %v893_v40 = vpop.f32.mrf.mxu1 }
 0x3e7   : > { %v835_v41 = vsel %vm647_vm2, %v831_v39, -inf }
 0x3e8   : > { %836 = vmax.xlane.f32.xlu0 %v835_v41 }
 0x3ee   : > { %v833_v42 = vpop.f32.mrf.mxu3 }
 0x3f6   : > { %v951_v43 = vpop.f32.mrf.mxu3 }
 0x3f7   : > { %v955_v44 = vsel %vm647_vm2, %v951_v43, -inf }
 0x3f8   : > { %847 = vrot.lane.b32.xlu2 %v2104_v63, %s1868_s21  ;;  %956 = vmax.xlane.f32.xlu1 %v955_v44 }
 0x3fe   : > { %v953_v45 = vpop.f32.mrf.mxu3 }
 0x453   : > { %v897_v46 = vpop.xlane.xlu2 %896 }
 0x454   : > { %v898_v47 = vsub.f32 %v891_v37, %v897_v46 }
 0x456   : > { %v899_v48 = vmul.f32 1.442695, %v898_v47 }
 0x458   : > { %1481 = vpow2.f32 %v899_v48 }
 0x45b   : > { %v837_v49 = vpop.xlane.xlu0 %836  ;;  %v848_v50 = vpop.permute.xlu2 %847 }
 0x45c   : > { %v838_v51 = vsub.f32 %v831_v39, %v837_v49  ;;  %v853_v52 = vsel %vm788_vm9, %v848_v50, 0 }
 0x45d   : > { %862 = vmatpush.bf16.msrb.mxu0 %v853_v52 }
 0x45e   : > { %v1482_v53 = vpop.eup %1481  ;;  %v839_v54 = vmul.f32 1.442695, %v838_v51 }
 0x45f   : > { %v901_v55 = vsel %vm647_vm2, %v1482_v53, 0.0 }
 0x460   : > { %1483 = vpow2.f32 %v839_v54  ;;  %902 = vadd.xlane.f32.xlu1 %v901_v55 }
 0x466   : > { %v1484_v56 = vpop.eup %1483 }
 0x467   : > { %v841_v57 = vsel %vm647_vm2, %v1484_v56, 0.0 }
 0x468   : > { %842 = vadd.xlane.f32.xlu0 %v841_v57  ;;  %v1475_v57 = vld [vmem:[#allocation13] ss:$0 sm:$0xff] }
 0x46b   : > { %v957_v58 = vpop.xlane.xlu1 %956 }
 0x46c   : > { %v958_v59 = vsub.f32 %v951_v43, %v957_v58 }
 0x46e   : > { %v959_v60 = vmul.f32 1.442695, %v958_v59  ;;  %v1476_v59 = vld [vmem:[#allocation14] ss:$0 sm:$0xff] }
 0x470   : > { %1485 = vpow2.f32 %v959_v60 }
 0x476   : > { %v1486_v61 = vpop.eup %1485 }
 0x477   : > { %v961_v62 = vsel %vm647_vm2, %v1486_v61, 0.0 }
 0x478   : > { %962 = vadd.xlane.f32.xlu0 %v961_v62 }
 0x479   : > { %907 = vrot.lane.b32.xlu1 %v2104_v63, %s1869_s1 }
 0x48c   : > { %967 = vrot.lane.b32.xlu0 %v2104_v63, %s1870_s2 }
 0x4d3   : > { %v903_v1 = vpop.xlane.xlu1 %902 }
 0x4db   : > { %v843_v0 = vpop.xlane.xlu0 %842 }
 0x4dc   : > { %1487 = vrcp.f32 %v843_v0 }
 0x4dd   : > { %1489 = vrcp.f32 %v903_v1 }
 0x4e2   : > { %v1488_v2 = vpop.eup %1487 }
 0x4e3   : > { %v845_v3 = vmul.f32 %v1488_v2, %v1484_v56  ;;  %v1490_v6 = vpop.eup %1489 }
 0x4e4   : > { %v905_v7 = vmul.f32 %v1490_v6, %v1482_v53 }
 0x4e5   : > { %v846_v5 = vpack.c.bf16 %v845_v3, %v845_v3 }
 0x4e6   : > { %v906_v10 = vpack.c.bf16 %v905_v7, %v905_v7 }
 0x4e7   : > { %1307 = vmatmul.msk.bf16.vlgmr.msrb.gmra.mxu0 %vm647_vm2, %v846_v5 }
 0x4eb   : > { %v908_v8 = vpop.permute.xlu1 %907  ;;  %v963_v11 = vpop.xlane.xlu0 %962 }
 0x4ec   : > { %v913_v9 = vsel %vm788_vm9, %v908_v8, 0  ;;  %1491 = vrcp.f32 %v963_v11 }
 0x4ed   : > { %922 = vmatpush.bf16.msrb.mxu2 %v913_v9  ;;  %1493 = vrcp.f32 %v1872_v38 }
 0x4f0   : > { %1309 = vmatmul.msk.bf16.vlgmr.msrb.gmra.mxu2 %vm647_vm2, %v906_v10 }
 0x4f2   : > { %v1492_v63 = vpop.eup %1491 }
 0x4f3   : > { %v965_v12 = vmul.f32 %v1492_v63, %v1486_v61 }
 0x4f5   : > { %v966_v15 = vpack.c.bf16 %v965_v12, %v965_v12 }
 0x4fe   : > { %v968_v13 = vpop.permute.xlu0 %967 }
 0x4ff   : > { %v973_v14 = vsel %vm788_vm9, %v968_v13, 0 }
 0x500   : > { %982 = vmatpush.bf16.msra.mxu0 %v973_v14 }
 0x503   : > { %1311 = vmatmul.msk.bf16.vlgmr.msra.gmra.mxu0 %vm647_vm2, %v966_v15 }
 0x564   : > { %v864_v16 = vpop.f32.mrf.mxu0 }
 0x565   : > { %989 = vrot.lane.b32.xlu2 %v864_v16, %s1862_s22 }
 0x56c   : > { %v866_v17 = vpop.f32.mrf.mxu0 }
 0x573   : > { %v924_v18 = vpop.f32.mrf.mxu2 }
 0x574   : > { %993 = vrot.lane.b32.xlu2 %v924_v18, %s1857_s24  ;;  %s553_s24 = scalar_lea.vmem %s2187_s11, %s1284_s3 }
 0x57b   : > { %v926_v19 = vpop.f32.mrf.mxu2 }
 0x580   : > { %v984_v20 = vpop.f32.mrf.mxu0 }
 0x581   : > { %997 = vrot.lane.b32.xlu0 %v984_v20, %s1871_s25 }
 0x588   : > { %v986_v21 = vpop.f32.mrf.mxu0 }
 0x5bf   : > { %v990_v24 = vpop.permute.xlu2 %989 }
 0x5c0   : > { %v1000_v26 = vsel %vm647_vm2, %v2134_v35, %v990_v24  ;;  %v1494_v35 = vpop.eup %1493 }
 0x5c1   : > { %v1047_v39 = vmul.f32 32.0, %v1494_v35  ;;  %vm1051_vm10 = vweird.f32 %v1494_v35 }
 0x5c3   : > { %v1048_v40 = vsub.f32 1.0, %v1047_v39 }
 0x5c5   : > { %v1049_v41 = vmul.f32 %v1494_v35, %v1048_v40 }
 0x5c7   : > { %v1050_v42 = vadd.f32 %v1494_v35, %v1049_v41 }
 0x5c9   : > { %v1052_v43 = vsel %vm1051_vm10, %v1494_v35, %v1050_v42 }
 0x5ce   : > { %v994_v25 = vpop.permute.xlu2 %993 }
 0x5cf   : > { %v1002_v27 = vsel %vm653_vm4, %v1000_v26, %v994_v25 }
 0x5f3   : > { %v998_v28 = vpop.permute.xlu0 %997 }
 0x5f4   : > { %v1004_v29 = vsel %vm659_vm6, %v1002_v27, %v998_v28 }
 0x5f5   : > { %v1005_v30 = vpack.c.bf16 %v1004_v29, %v1004_v29 }
 0x5f7   : > { %1320 = vmatmul.msk.bf16.vlgmr.msra.gmra.mxu1 %vm581_vm0, %v1005_v30 }
 0x674   : > { %v1038_v32 = vpop.f32.mrf.mxu1 }
 0x675   : > { %v1039_v33 = vadd.f32 %v1474_v31, %v1038_v32 }
 0x677   : > { %v1042_v34 = vadd.f32 %v1039_v33, %v2056_v4 }
 0x679   : > { %v1043_v36 = vsel %vm581_vm0, %v1042_v34, 0.0 }
 0x67a   : > { %1044 = vadd.xlane.f32.xlu1 %v1043_v36 }
 0x67c   : > { %v1040_v37 = vpop.f32.mrf.mxu1 }
 0x6ed   : > { %v1045_v44 = vpop.xlane.xlu1 %1044 }
 0x6ee   : > { %v1053_v45 = vmul.f32 %v1052_v43, %v1045_v44 }
 0x6f0   : > { %v1054_v46 = vsub.f32 %v1042_v34, %v1053_v45 }
 0x6f2   : > { %v1055_v47 = vmul.f32 %v1054_v46, %v1054_v46 }
 0x6f4   : > { %v1056_v48 = vsel %vm581_vm0, %v1055_v47, 0.0 }
 0x6f5   : > { %1057 = vadd.xlane.f32.xlu2 %v1056_v48 }
 0x768   : > { %v1058_v4 = vpop.xlane.xlu2 %1057 }
 0x769   : > { %v1059_v49 = vmul.f32 %v1058_v4, %v1052_v43 }
 0x76b   : > { %v1060_v50 = vadd.f32 1e-05, %v1059_v49 }
 0x76d   : > { %1495 = vrsqrt.f32 %v1060_v50  ;;  %vm1067_vm12 = vweird.f32 %v1060_v50 }
 0x773   : > { %v1496_v51 = vpop.eup %1495 }
 0x774   : > { %v1062_v52 = vmul.f32 %v1496_v51, %v1060_v50  ;;  %vm1068_vm11 = vweird.f32 %v1496_v51 }
 0x775   : > { %vm1069_vm13 = vmor %vm1067_vm12, %vm1068_vm11 }
 0x776   : > { %v1063_v53 = vmul.f32 %v1496_v51, %v1062_v52 }
 0x778   : > { %v1064_v54 = vmul.f32 0.5, %v1063_v53 }
 0x77a   : > { %v1065_v55 = vsub.f32 1.5, %v1064_v54 }
 0x77c   : > { %v1066_v56 = vmul.f32 %v1496_v51, %v1065_v55 }
 0x77e   : > { %v1070_v58 = vsel %vm1069_vm13, %v1496_v51, %v1066_v56 }
 0x77f   : > { %v1071_v60 = vmul.f32 %v1070_v58, %v1054_v46 }
 0x781   : > { %v1076_v61 = vmul.f32 %v1475_v57, %v1071_v60 }
 0x783   : > { %v1081_v62 = vadd.f32 %v1476_v59, %v1076_v61 }
 0x785   : > { %1082 = vst.msk [vmem:[%s553_s24] sm:$0xff] %vm581_vm0, %v1081_v62 }
 0x786 PF: > { %s27_s19 = sadd.s32 1, %s1843_s19   ;;  %s2197_s17 = smov %s1839_s18 }
 0x787   : > { %p24_p8 = scmp.ge.s32.totalorder %s27_s19, 4   ;;  %s2198_s18 = smov %s2200_s16 }
 0x789   :  { %26 = sbr.rel (!%p24_p8) target bundleno = 11 (0xb), region = 142 }
 0x78e   :  { %1108 = vsyncpa [#allocation4], 1 }
 0x78f   :  { %1110 = vsyncpa [#allocation4 + $0x1], 1 }
 0x790   :  { %1111 = vsyncpa [#allocation6], 1 }
 0x791   :  { %1112 = vsyncpa [#allocation9], 1 }
 0x792   :  { %1113 = vsyncpa [#allocation12], 1 }
 0x793   :  { %1114 = vsyncpa [#allocation15], 1 }
 0x794   :  { %1115 = vsyncpa [#allocation18], 1 }

// kernel: encoder_pallas.9
= control target key start
LH: loop header
LB: loop body
LE: loop exit
PB: predicated region body
PF: predicated region fallthrough
CT: control target
= control target key end

     0   :  { %s1951_s0 = inlined_call_operand.vmem [shape: f32[2,8,32], index: 0, kind: input, shape index: {}]   ;;  %s1952_s1 = inlined_call_operand.vmem [shape: bf16[32,32], index: 1, kind: input, shape index: {}]   ;;  %s1953_s2 = inlined_call_operand.hbm [shape: f32[1,32], index: 2, kind: input, shape index: {}]   ;;  %s1954_s3 = inlined_call_operand.vmem [shape: bf16[32,64], index: 3, kind: input, shape index: {}]   ;;  %s1955_s4 = inlined_call_operand.hbm [shape: f32[1,64], index: 4, kind: input, shape index: {}]   ;;  %s1956_s5 = inlined_call_operand.vmem [shape: bf16[32,32], index: 5, kind: input, shape index: {}]   ;;  %s1957_s6 = inlined_call_operand.hbm [shape: f32[1,32], index: 6, kind: input, shape index: {}]   ;;  %s1958_s7 = inlined_call_operand.hbm [shape: f32[1,32], index: 7, kind: input, shape index: {}]   ;;  %s1959_s8 = inlined_call_operand.hbm [shape: f32[1,32], index: 8, kind: input, shape index: {}]   ;;  %s1960_s9 = inlined_call_operand.hbm [shape: f32[8,16], index: 9, kind: input, shape index: {}]   ;;  %s1961_s10 = inlined_call_operand.hbm [shape: f32[8,16], index: 10, kind: input, shape index: {}]   ;;  %s1962_s11 = inlined_call_operand.vmem [shape: f32[2,8,32], index: 11, kind: output, shape index: {}]  }
   0x1   :  { %1963 = sst [smem:[#allocation18_spill]] %s1953_s2 }
   0x2   :  { %16 = vsyncpa [#allocation4], 0 }
   0x3   :  { %17 = vsyncpa [#allocation6], 0 }
   0x4   :  { %18 = vsyncpa [#allocation9], 0 }
   0x5   :  { %19 = vsyncpa [#allocation12], 0  ;;  %s1713_s17 = smov 0   ;;  %s1715_s18 = smov 0  }
   0x6   :  { %s1717_s19 = smov 0  }
   0x7 LB: > { %s336_s22 = sshll.u32 %s1955_s4, 4  ;;  %s1180_s23 = sadd.s32 4294967295, %s1628_s19   ;;  %s1628_s19 = sphi %s1717_s19, %s25_s19   ;;  %s1624_s18 = sphi %s1715_s18, %s1969_s18   ;;  %s1620_s17 = sphi %s1713_s17, %s1968_s17   ;;  %s337_s22 = int_to_ptr.hbm [resolvable:$true] %s336_s22 }
   0x8   : > { %p1182_p0 = scmp.ge.s32.totalorder %s1628_s19, 1  ;;  %p306_p1 = scmp.lt.s32.totalorder %s1628_s19, 3 }
   0x9   : > { %p1734_p2 = scmp.eq.s32.totalorder %s1180_s23, 0  ;;  %s1630_s26 = smov [#allocation5]  }
   0xa   : > { %p1738_p3 = pnand %p1182_p0, %p306_p1  ;;  %s338_s27 = sshll.u32 %s1630_s26, 4  ;;  %s339_s27 = int_to_ptr.vmem [resolvable:$true] %s338_s27 }
   0xb   : > { %s363_s30 = sshll.u32 %s1958_s7, 4  ;;  %s387_s14 = sshll.u32 %s1960_s9, 4  ;;  %s364_s30 = int_to_ptr.hbm [resolvable:$true] %s363_s30  ;;  %s388_s14 = int_to_ptr.hbm [resolvable:$true] %s387_s14 }
   0xc   : > { %p1272_p4 = pneg %p1738_p3  ;;  %s1631_s16 = smov [#allocation8]  }
   0xd   : > { %s365_s20 = sshll.u32 %s1631_s16, 4  ;;  %s1632_s21 = smov [#allocation11]   ;;  %s366_s20 = int_to_ptr.vmem [resolvable:$true] %s365_s20 }
   0xe   : > { %p1752_p5 = pnand %p1734_p2, %p1272_p4  ;;  %s389_s23 = sshll.u32 %s1632_s21, 4  ;;  %s390_s23 = int_to_ptr.vmem [resolvable:$true] %s389_s23 }
   0xf   : > { %s37_s26 = sadd.s32 1, %s1624_s18  ;;  %s1967_s2 = sld [smem:[#allocation18_spill]] }
  0x10   : > { %1278 = dma.hbm_to_vmem [thread:$0]  (!%p1752_p5), %s337_s22, 16, %s339_s27, [#allocation6]  }
  0x11   : > { %1284 = dma.hbm_to_vmem [thread:$0]  (!%p1752_p5), %s364_s30, 16, %s366_s20, [#allocation9]  }
  0x12   : > { %1290 = dma.hbm_to_vmem [thread:$0]  (!%p1752_p5), %s388_s14, 128, %s390_s23, [#allocation12]  }
  0x13   : > { %p39_p6 = scmp.ge.s32.totalorder %s37_s26, 2  ;;  %s351_s22 = sshll.u32 %s1957_s6, 4  ;;  %s352_s22 = int_to_ptr.hbm [resolvable:$true] %s351_s22 }
  0x14   : > { %s1633_s27 = smov [#allocation3]   ;;  %s1634_s14 = smov [#allocation7]  }
  0x15   : > { %s321_s12 = sshll.u32 %s1967_s2, 4  ;;  %s1971_s26 = smov (%p39_p6, %s37_s26), 0  ;;  %s322_s12 = int_to_ptr.hbm [resolvable:$true] %s321_s12 }
  0x16   : > { %s323_s30 = sshll.u32 %s1633_s27, 4  ;;  %s353_s20 = sshll.u32 %s1634_s14, 4  ;;  %s324_s30 = int_to_ptr.vmem [resolvable:$true] %s323_s30  ;;  %s354_s20 = int_to_ptr.vmem [resolvable:$true] %s353_s20 }
  0x17   : > { %1275 = dma.hbm_to_vmem [thread:$0]  (!%p1752_p5), %s322_s12, 16, %s324_s30, [#allocation4]  }
  0x18   : > { %s375_s28 = sshll.u32 %s1959_s8, 4  ;;  %s399_s16 = sshll.u32 %s1961_s10, 4  ;;  %s376_s28 = int_to_ptr.hbm [resolvable:$true] %s375_s28  ;;  %s400_s16 = int_to_ptr.hbm [resolvable:$true] %s399_s16 }
  0x19   : > { %1281 = dma.hbm_to_vmem [thread:$0]  (!%p1752_p5), %s352_s22, 16, %s354_s20, [#allocation6]  }
  0x1a   : > { %s1635_s27 = smov [#allocation10]   ;;  %s1636_s12 = smov [#allocation13]  }
  0x1b   : > { %s377_s2 = sshll.u32 %s1635_s27, 4  ;;  %s401_s30 = sshll.u32 %s1636_s12, 4  ;;  %s378_s2 = int_to_ptr.vmem [resolvable:$true] %s377_s2  ;;  %s402_s30 = int_to_ptr.vmem [resolvable:$true] %s401_s30 }
  0x1c   : > { %1287 = dma.hbm_to_vmem [thread:$0]  (!%p1752_p5), %s376_s28, 16, %s378_s2, [#allocation9]  }
  0x1d   : > { %1293 = dma.hbm_to_vmem [thread:$0]  (!%p1752_p5), %s400_s16, 128, %s402_s30, [#allocation12]  }
  0x1e   : > { %421 = sbr.rel (%p1738_p3) target bundleno = 1910 (0x776), region = 64 }
  0x23   : > { %1603 = dma.done.wait (%p1734_p2), [#allocation4], 16  }
  0x24   : > { %1605 = vsyncadd (%p1734_p2), [#allocation4], 4294967280 }
  0x25   : > { %1607 = dma.done.wait (%p1734_p2), [#allocation6], 32  }
  0x26   : > { %1609 = vsyncadd (%p1734_p2), [#allocation6], 4294967264 }
  0x27   : > { %1611 = dma.done.wait (%p1734_p2), [#allocation9], 32  }
  0x28   : > { %1613 = vsyncadd (%p1734_p2), [#allocation9], 4294967264 }
  0x29   : > { %1615 = dma.done.wait (%p1734_p2), [#allocation12], 256  }
  0x2a   : > { %1617 = vsyncadd (%p1734_p2), [#allocation12], 4294967040  ;;  %p493_p7 = scmp.lt.s32.totalorder %s1620_s17, 1  ;;  %v1239_v0 = vld [vmem:[%s1954_s3 + $0x8] sm:$0xff]  ;;  %v1238_v2 = vld [vmem:[%s1954_s3] sm:$0xff]  ;;  %s1637_s16 = smov 16  }
  0x2b   : > { %v1241_v1 = vld [vmem:[%s1952_s1 + $0x8] sm:$0xff]  ;;  %v1240_v3 = vld [vmem:[%s1952_s1] sm:$0xff]  ;;  %v549_v5 = vld [vmem:[#allocation13] sm:$0xff]  ;;  %541 = vmatpush.bf16.msra.mxu0 %v1239_v0  ;;  %vm531_vm0 = vcmask 261120   ;;  %s1638_s27 = smov 112   ;;  %s1639_s12 = smov 120  }
  0x2c   : > { %s1973_s17 = smov (!%p493_p7, %s1620_s17), 1  ;;  %654 = vmatpush.bf16.msra.mxu1 %v1241_v1  ;;  %v1827_v6 = vld [vmem:[#allocation11] sm:$0xff]  ;;  %552 = vrot.lane.b32.xlu0 %v549_v5, %s1637_s16  ;;  %v1355_v8 = vld [vmem:[#allocation5] ss:$0 sm:$0xff]  ;;  %v1356_v9 = vld [vmem:[#allocation3] ss:$0 sm:$0xff] }
  0x2d   : > { %s1199_s2 = sshll.u32 %s1973_s17, 3  ;;  %678 = vrot.lane.b32.xlu2 %v1827_v6, %s1637_s16  ;;  %s1640_s30 = smov 116   ;;  %vm593_vm1 = vcmask 31744   ;;  %vm597_vm2 = vcmask 64512   ;;  %vm600_vm3 = vcmask 97280   ;;  %vm603_vm4 = vcmask 130048  }
  0x2e   : > { %s496_s22 = scalar_lea.vmem %s1951_s0, %s1199_s2  ;;  %s1641_s25 = smov 12   ;;  %vm606_vm5 = vcmask 162816   ;;  %vm609_vm6 = vcmask 195584   ;;  %vm612_vm7 = vcmask 228352   ;;  %vm618_vm8 = vcmask 519168  }
  0x2f   : > { %v1825_v4 = vld [vmem:[%s496_s22] sm:$0xff]  ;;  %542 = vmatpush.bf16.msra.mxu0 %v1238_v2  ;;  %s1642_s15 = smov 8   ;;  %s1643_s22 = smov 4   ;;  %vm738_vm9 = vcmask 1043456  }
  0x30   : > { %v510_v7 = vpack.c.bf16 %v1825_v4, %v1825_v4  ;;  %655 = vmatpush.bf16.msra.mxu1 %v1240_v3  ;;  %s1644_s14 = smov 124   ;;  %s1645_s20 = smov 96  }
  0x31   : > { %s1646_s21 = smov 104   ;;  %s1647_s24 = smov 108  }
  0x32   : > { %1209 = vmatmul.msk.bf16.vlgmr.msra.gmra.mxu0 %vm531_vm0, %v510_v7  ;;  %s1648_s23 = smov 88   ;;  %s1649_s28 = smov 80  }
  0x33   : > { %1218 = vmatmul.msk.bf16.vlgmr.msra.gmra.mxu1 %vm531_vm0, %v510_v7  ;;  %s1650_s29 = smov 72   ;;  %s1651_s13 = smov 24  }
  0x34   : > { %563 = vrot.lane.b32.xlu0 %v1827_v6, %s1637_s16 }
  0x3c   : > { %667 = vrot.lane.b32.xlu0 %v549_v5, %s1637_s16 }
  0x87   : > { %v679_v29 = vpop.permute.xlu2 %678 }
  0x9e   : > { %v553_v18 = vpop.permute.xlu0 %552 }
  0xa6   : > { %v564_v20 = vpop.permute.xlu0 %563 }
  0xae   : > { %v668_v36 = vpop.permute.xlu0 %667 }
  0xaf   : > { %v544_v10 = vpop.f32.mrf.mxu0 }
  0xb0   : > { %v657_v11 = vpop.f32.mrf.mxu1  ;;  %v1839_v12 = vadd.f32 %v1355_v8, %v544_v10 }
  0xb1   : > { %v1841_v13 = vadd.f32 %v1356_v9, %v657_v11 }
  0xb2   : > { %v567_v15 = vmul.f32 %v549_v5, %v1839_v12  ;;  %v555_v19 = vmul.f32 %v553_v18, %v1839_v12  ;;  %v566_v21 = vmul.f32 %v564_v20, %v1839_v12  ;;  %v550_v27 = vmul.f32 %v1827_v6, %v1839_v12 }
  0xb3   : > { %v682_v14 = vmul.f32 %v1841_v13, %v549_v5  ;;  %v681_v35 = vmul.f32 %v679_v29, %v1841_v13  ;;  %v670_v38 = vmul.f32 %v668_v36, %v1841_v13  ;;  %v574_v53 = vpack.c.bf16 %v1839_v12, %v1839_v12 }
  0xb4   : > { %569 = vrot.lane.b32.xlu1 %v567_v15, %s1637_s16  ;;  %v665_v58 = vmul.f32 %v1841_v13, %v1827_v6 }
  0xb5   : > { %684 = vrot.lane.b32.xlu2 %v682_v14, %s1637_s16 }
  0xb7   : > { %v546_v16 = vpop.f32.mrf.mxu0 }
  0xb8   : > { %v659_v17 = vpop.f32.mrf.mxu1 }
  0xbc   : > { %557 = vrot.lane.b32.xlu1 %v555_v19, %s1638_s27 }
 0x10f   : > { %v685_v34 = vpop.permute.xlu2 %684 }
 0x110   : > { %v687_v37 = vadd.f32 %v685_v34, %v681_v35 }
 0x112   : > { %v688_v39 = vpack.c.bf16 %v687_v37, %v687_v37 }
 0x114   : > { %v691_v40 = vunpack.c.l.b16 %v688_v39 }
 0x116   : > { %v1859_v41 = vpack.c.b16 %v691_v40, %v691_v40 }
 0x126   : > { %v570_v22 = vpop.permute.xlu1 %569 }
 0x127   : > { %v572_v23 = vadd.f32 %v570_v22, %v566_v21 }
 0x129   : > { %v573_v24 = vpack.c.bf16 %v572_v23, %v572_v23 }
 0x12b   : > { %v576_v25 = vunpack.c.l.b16 %v573_v24 }
 0x12d   : > { %v577_v26 = vpack.c.b16 %v576_v25, %v576_v25 }
 0x12e   : > { %v558_v28 = vpop.permute.xlu1 %557 }
 0x12f   : > { %v560_v30 = vsub.f32 %v550_v27, %v558_v28  ;;  %585 = vrot.lane.b32.xlu0 %v577_v26, %s1639_s12  ;;  %578 = vrot.lane.b32.xlu1 %v577_v26, %s1640_s30 }
 0x131   : > { %v561_v31 = vpack.c.bf16 %v560_v30, %v560_v30 }
 0x133   : > { %v581_v32 = vunpack.c.l.b16 %v561_v31 }
 0x135   : > { %v582_v33 = vpack.c.b16 %v581_v32, %v581_v32 }
 0x137   : > { %591 = vrot.lane.b32.xlu0 %v582_v33, %s1641_s25  ;;  %587 = vrot.lane.b32.xlu1 %v582_v33, %s1642_s15 }
 0x138   : > { %583 = vrot.lane.b32.xlu2 %v582_v33, %s1643_s22  ;;  %s503_s22 = scalar_lea.vmem %s1962_s11, %s1199_s2 }
 0x13f   : > { %672 = vrot.lane.b32.xlu1 %v670_v38, %s1638_s27 }
 0x140   : > { %589 = vrot.lane.b32.xlu2 %v577_v26, %s1644_s14 }
 0x148   : > { %693 = vrot.lane.b32.xlu2 %v1859_v41, %s1640_s30 }
 0x192   : > { %v584_v42 = vpop.permute.xlu2 %583 }
 0x19a   : > { %v590_v49 = vpop.permute.xlu2 %589 }
 0x1a1   : > { %v586_v43 = vpop.permute.xlu0 %585  ;;  %v579_v44 = vpop.permute.xlu1 %578 }
 0x1a2   : > { %v596_v45 = vsel %vm593_vm1, %v561_v31, %v579_v44  ;;  %v694_v1 = vpop.permute.xlu2 %693 }
 0x1a3   : > { %v599_v46 = vsel %vm597_vm2, %v596_v45, %v584_v42 }
 0x1a4   : > { %v602_v48 = vsel %vm600_vm3, %v599_v46, %v586_v43 }
 0x1a9   : > { %v588_v47 = vpop.permute.xlu1 %587  ;;  %v592_v51 = vpop.permute.xlu0 %591 }
 0x1aa   : > { %v605_v50 = vsel %vm603_vm4, %v602_v48, %v588_v47 }
 0x1ab   : > { %v608_v52 = vsel %vm606_vm5, %v605_v50, %v590_v49 }
 0x1ac   : > { %v611_v54 = vsel %vm609_vm6, %v608_v52, %v592_v51 }
 0x1ad   : > { %v614_v55 = vsel %vm612_vm7, %v611_v54, %v573_v24 }
 0x1ae   : > { %v616_v56 = vsel %vm531_vm0, %v614_v55, %v574_v53 }
 0x1af   : > { %619 = vst.msk [vmem:[#allocation2] sm:$0xf] %vm618_vm8, %v616_v56 }
 0x1b1   : > { %v673_v57 = vpop.permute.xlu1 %672 }
 0x1b2   : > { %v675_v59 = vsub.f32 %v665_v58, %v673_v57 }
 0x1b4   : > { %v676_v0 = vpack.c.bf16 %v675_v59, %v675_v59 }
 0x1b6   : > { %v689_v60 = vld [vmem:[#allocation2] sm:$0xf]  ;;  %v698_v2 = vsel %vm593_vm1, %v676_v0, %v694_v1  ;;  %v756_v3 = vunpack.c.l.b16 %v676_v0 }
 0x1b7   : > { %v703_v61 = vsel %vm597_vm2, %v689_v60, 0  ;;  %v731_v62 = vunpack.c.l.b16 %v689_v60 }
 0x1b8   : > { %712 = vmatpush.bf16.xpose.msra.mxu2 %v703_v61  ;;  %v757_v5 = vpack.c.b16 %v756_v3, %v756_v3 }
 0x1b9   : > { %v1873_v63 = vpack.c.b16 %v731_v62, %v731_v62 }
 0x1bb   : > { %733 = vrot.lane.b32.xlu2 %v1873_v63, %s1645_s20 }
 0x1bf   : > { %1219 = vmatmul.msk.bf16.vlgmr.msra.gmra.mxu2 %vm597_vm2, %v698_v2 }
 0x1c3   : > { %765 = vrot.lane.b32.xlu2 %v1873_v63, %s1639_s12 }
 0x1cb   : > { %758 = vrot.lane.b32.xlu2 %v757_v5, %s1644_s14 }
 0x1d3   : > { %760 = vrot.lane.b32.xlu2 %v1859_v41, %s1638_s27 }
 0x1db   : > { %825 = vrot.lane.b32.xlu2 %v1873_v63, %s1638_s27 }
 0x1e3   : > { %885 = vrot.lane.b32.xlu2 %v1873_v63, %s1646_s21 }
 0x1eb   : > { %878 = vrot.lane.b32.xlu2 %v757_v5, %s1640_s30 }
 0x1f3   : > { %880 = vrot.lane.b32.xlu2 %v1859_v41, %s1646_s21 }
 0x215   : > { %v734_v6 = vpop.permute.xlu2 %733 }
 0x216   : > { %v740_v7 = vsel %vm738_vm9, %v734_v6, 0 }
 0x217   : > { %749 = vmatpush.bf16.msra.mxu3 %v740_v7 }
 0x21d   : > { %v766_v8 = vpop.permute.xlu2 %765 }
 0x21e   : > { %v770_v9 = vsel %vm597_vm2, %v766_v8, 0 }
 0x21f   : > { %779 = vmatpush.bf16.xpose.msrb.mxu3 %v770_v9 }
 0x225   : > { %v759_v10 = vpop.permute.xlu2 %758 }
 0x22d   : > { %v761_v11 = vpop.permute.xlu2 %760 }
 0x22e   : > { %v764_v12 = vsel %vm593_vm1, %v759_v10, %v761_v11 }
 0x235   : > { %v826_v13 = vpop.permute.xlu2 %825 }
 0x236   : > { %v830_v14 = vsel %vm597_vm2, %v826_v13, 0 }
 0x237   : > { %839 = vmatpush.bf16.xpose.msrb.mxu1 %v830_v14 }
 0x23d   : > { %v886_v26 = vpop.permute.xlu2 %885 }
 0x23e   : > { %v890_v28 = vsel %vm597_vm2, %v886_v26, 0 }
 0x242   : > { %v714_v15 = vpop.f32.mrf.mxu2 }
 0x243   : > { %v718_v16 = vsel %vm597_vm2, %v714_v15, -inf }
 0x244   : > { %719 = vmax.xlane.f32.xlu0 %v718_v16 }
 0x245   : > { %v879_v32 = vpop.permute.xlu2 %878 }
 0x24a   : > { %v716_v17 = vpop.f32.mrf.mxu2 }
 0x24d   : > { %v881_v33 = vpop.permute.xlu2 %880 }
 0x24e   : > { %v884_v34 = vsel %vm593_vm1, %v879_v32, %v881_v33 }
 0x258   : > { %818 = vrot.lane.b32.xlu0 %v757_v5, %s1639_s12 }
 0x2b7   : > { %v720_v18 = vpop.xlane.xlu0 %719 }
 0x2b8   : > { %v721_v19 = vsub.f32 %v714_v15, %v720_v18 }
 0x2ba   : > { %v722_v20 = vmul.f32 1.442695, %v721_v19 }
 0x2bc   : > { %1360 = vpow2.f32 %v722_v20 }
 0x2c2   : > { %v1361_v21 = vpop.eup %1360 }
 0x2c3   : > { %v724_v22 = vsel %vm597_vm2, %v1361_v21, 0.0 }
 0x2c4   : > { %725 = vadd.xlane.f32.xlu1 %v724_v22  ;;  %v1243_v22 = vld [vmem:[%s1956_s5 + $0x8] sm:$0xff] }
 0x2c5   : > { %985 = vmatpush.bf16.msra.mxu1 %v1243_v22 }
 0x2ca   : > { %v819_v29 = vpop.permute.xlu0 %818 }
 0x2dd   : > { %820 = vrot.lane.b32.xlu1 %v1859_v41, %s1647_s24 }
 0x337   : > { %v726_v23 = vpop.xlane.xlu1 %725 }
 0x338   : > { %1362 = vrcp.f32 %v726_v23  ;;  %v1242_v23 = vld [vmem:[%s1956_s5] sm:$0xff] }
 0x339   : > { %986 = vmatpush.bf16.msra.mxu1 %v1242_v23 }
 0x33e   : > { %v1363_v24 = vpop.eup %1362 }
 0x33f   : > { %v728_v25 = vmul.f32 %v1363_v24, %v1361_v21 }
 0x341   : > { %v729_v27 = vpack.c.bf16 %v728_v25, %v728_v25 }
 0x343   : > { %1220 = vmatmul.msk.bf16.vlgmr.msra.gmra.mxu3 %vm597_vm2, %v729_v27 }
 0x344   : > { %899 = vmatpush.bf16.xpose.msra.mxu3 %v890_v28 }
 0x34f   : > { %v821_v30 = vpop.permute.xlu1 %820 }
 0x350   : > { %v824_v31 = vsel %vm593_vm1, %v819_v29, %v821_v30 }
 0x351   : > { %1223 = vmatmul.msk.bf16.vlgmr.msrb.gmra.mxu1 %vm597_vm2, %v824_v31  ;;  %v1357_v31 = vld [vmem:[#allocation7] ss:$0 sm:$0xff] }
 0x353   : > { %1221 = vmatmul.msk.bf16.vlgmr.msrb.gmra.mxu3 %vm597_vm2, %v764_v12 }
 0x363   : > { %1225 = vmatmul.msk.bf16.vlgmr.msra.gmra.mxu3 %vm597_vm2, %v884_v34 }
 0x3c6   : > { %v1903_v35 = vpop.f32.mrf.mxu3 }
 0x3ce   : > { %v753_v36 = vpop.f32.mrf.mxu3  ;;  %v841_v37 = vpop.f32.mrf.mxu1 }
 0x3cf   : > { %v845_v38 = vsel %vm597_vm2, %v841_v37, -inf }
 0x3d0   : > { %846 = vmax.xlane.f32.xlu2 %v845_v38  ;;  %v1652_v38 = vmov 32.0  }
 0x3d6   : > { %v781_v39 = vpop.f32.mrf.mxu3  ;;  %v843_v40 = vpop.f32.mrf.mxu1 }
 0x3d7   : > { %v785_v41 = vsel %vm597_vm2, %v781_v39, -inf }
 0x3d8   : > { %786 = vmax.xlane.f32.xlu0 %v785_v41 }
 0x3de   : > { %v783_v42 = vpop.f32.mrf.mxu3 }
 0x3e6   : > { %v901_v43 = vpop.f32.mrf.mxu3 }
 0x3e7   : > { %v905_v44 = vsel %vm597_vm2, %v901_v43, -inf }
 0x3e8   : > { %797 = vrot.lane.b32.xlu2 %v1873_v63, %s1648_s23  ;;  %906 = vmax.xlane.f32.xlu1 %v905_v44 }
 0x3ee   : > { %v903_v45 = vpop.f32.mrf.mxu3 }
 0x443   : > { %v847_v46 = vpop.xlane.xlu2 %846 }
 0x444   : > { %v848_v47 = vsub.f32 %v841_v37, %v847_v46 }
 0x446   : > { %v849_v48 = vmul.f32 1.442695, %v848_v47 }
 0x448   : > { %1364 = vpow2.f32 %v849_v48 }
 0x44b   : > { %v787_v49 = vpop.xlane.xlu0 %786  ;;  %v798_v50 = vpop.permute.xlu2 %797 }
 0x44c   : > { %v788_v51 = vsub.f32 %v781_v39, %v787_v49  ;;  %v803_v52 = vsel %vm738_vm9, %v798_v50, 0 }
 0x44d   : > { %812 = vmatpush.bf16.msrb.mxu0 %v803_v52 }
 0x44e   : > { %v1365_v53 = vpop.eup %1364  ;;  %v789_v54 = vmul.f32 1.442695, %v788_v51 }
 0x44f   : > { %v851_v55 = vsel %vm597_vm2, %v1365_v53, 0.0 }
 0x450   : > { %1366 = vpow2.f32 %v789_v54  ;;  %852 = vadd.xlane.f32.xlu1 %v851_v55 }
 0x456   : > { %v1367_v56 = vpop.eup %1366 }
 0x457   : > { %v791_v57 = vsel %vm597_vm2, %v1367_v56, 0.0 }
 0x458   : > { %792 = vadd.xlane.f32.xlu0 %v791_v57  ;;  %v1358_v57 = vld [vmem:[#allocation8] ss:$0 sm:$0xff] }
 0x45b   : > { %v907_v58 = vpop.xlane.xlu1 %906 }
 0x45c   : > { %v908_v59 = vsub.f32 %v901_v43, %v907_v58 }
 0x45e   : > { %v909_v60 = vmul.f32 1.442695, %v908_v59  ;;  %v1359_v59 = vld [vmem:[#allocation10] ss:$0 sm:$0xff] }
 0x460   : > { %1368 = vpow2.f32 %v909_v60 }
 0x466   : > { %v1369_v61 = vpop.eup %1368 }
 0x467   : > { %v911_v62 = vsel %vm597_vm2, %v1369_v61, 0.0 }
 0x468   : > { %912 = vadd.xlane.f32.xlu0 %v911_v62 }
 0x469   : > { %857 = vrot.lane.b32.xlu1 %v1873_v63, %s1649_s28 }
 0x47c   : > { %917 = vrot.lane.b32.xlu0 %v1873_v63, %s1650_s29 }
 0x4c3   : > { %v853_v1 = vpop.xlane.xlu1 %852 }
 0x4cb   : > { %v793_v0 = vpop.xlane.xlu0 %792 }
 0x4cc   : > { %1370 = vrcp.f32 %v793_v0 }
 0x4cd   : > { %1372 = vrcp.f32 %v853_v1 }
 0x4d2   : > { %v1371_v2 = vpop.eup %1370 }
 0x4d3   : > { %v795_v3 = vmul.f32 %v1371_v2, %v1367_v56  ;;  %v1373_v6 = vpop.eup %1372 }
 0x4d4   : > { %v855_v7 = vmul.f32 %v1373_v6, %v1365_v53 }
 0x4d5   : > { %v796_v5 = vpack.c.bf16 %v795_v3, %v795_v3 }
 0x4d6   : > { %v856_v10 = vpack.c.bf16 %v855_v7, %v855_v7 }
 0x4d7   : > { %1222 = vmatmul.msk.bf16.vlgmr.msrb.gmra.mxu0 %vm597_vm2, %v796_v5 }
 0x4db   : > { %v858_v8 = vpop.permute.xlu1 %857  ;;  %v913_v11 = vpop.xlane.xlu0 %912 }
 0x4dc   : > { %v863_v9 = vsel %vm738_vm9, %v858_v8, 0  ;;  %1374 = vrcp.f32 %v913_v11 }
 0x4dd   : > { %872 = vmatpush.bf16.msrb.mxu2 %v863_v9  ;;  %1376 = vrcp.f32 %v1652_v38 }
 0x4e0   : > { %1224 = vmatmul.msk.bf16.vlgmr.msrb.gmra.mxu2 %vm597_vm2, %v856_v10 }
 0x4e2   : > { %v1375_v63 = vpop.eup %1374 }
 0x4e3   : > { %v915_v12 = vmul.f32 %v1375_v63, %v1369_v61 }
 0x4e5   : > { %v916_v15 = vpack.c.bf16 %v915_v12, %v915_v12 }
 0x4ee   : > { %v918_v13 = vpop.permute.xlu0 %917 }
 0x4ef   : > { %v923_v14 = vsel %vm738_vm9, %v918_v13, 0 }
 0x4f0   : > { %932 = vmatpush.bf16.msra.mxu0 %v923_v14 }
 0x4f3   : > { %1226 = vmatmul.msk.bf16.vlgmr.msra.gmra.mxu0 %vm597_vm2, %v916_v15 }
 0x554   : > { %v814_v16 = vpop.f32.mrf.mxu0 }
 0x555   : > { %939 = vrot.lane.b32.xlu2 %v814_v16, %s1642_s15 }
 0x55c   : > { %v816_v17 = vpop.f32.mrf.mxu0 }
 0x563   : > { %v874_v18 = vpop.f32.mrf.mxu2 }
 0x564   : > { %943 = vrot.lane.b32.xlu2 %v874_v18, %s1637_s16 }
 0x56b   : > { %v876_v19 = vpop.f32.mrf.mxu2 }
 0x570   : > { %v934_v20 = vpop.f32.mrf.mxu0 }
 0x571   : > { %947 = vrot.lane.b32.xlu0 %v934_v20, %s1651_s13 }
 0x578   : > { %v936_v21 = vpop.f32.mrf.mxu0 }
 0x5af   : > { %v940_v24 = vpop.permute.xlu2 %939 }
 0x5b0   : > { %v950_v26 = vsel %vm597_vm2, %v1903_v35, %v940_v24  ;;  %v1377_v35 = vpop.eup %1376 }
 0x5b1   : > { %v997_v39 = vmul.f32 32.0, %v1377_v35  ;;  %vm1001_vm10 = vweird.f32 %v1377_v35 }
 0x5b3   : > { %v998_v40 = vsub.f32 1.0, %v997_v39 }
 0x5b5   : > { %v999_v41 = vmul.f32 %v1377_v35, %v998_v40 }
 0x5b7   : > { %v1000_v42 = vadd.f32 %v1377_v35, %v999_v41 }
 0x5b9   : > { %v1002_v43 = vsel %vm1001_vm10, %v1377_v35, %v1000_v42 }
 0x5be   : > { %v944_v25 = vpop.permute.xlu2 %943 }
 0x5bf   : > { %v952_v27 = vsel %vm603_vm4, %v950_v26, %v944_v25 }
 0x5e3   : > { %v948_v28 = vpop.permute.xlu0 %947 }
 0x5e4   : > { %v954_v29 = vsel %vm609_vm6, %v952_v27, %v948_v28 }
 0x5e5   : > { %v955_v30 = vpack.c.bf16 %v954_v29, %v954_v29 }
 0x5e7   : > { %1235 = vmatmul.msk.bf16.vlgmr.msra.gmra.mxu1 %vm531_vm0, %v955_v30 }
 0x664   : > { %v988_v32 = vpop.f32.mrf.mxu1 }
 0x665   : > { %v989_v33 = vadd.f32 %v1357_v31, %v988_v32 }
 0x667   : > { %v992_v34 = vadd.f32 %v989_v33, %v1825_v4 }
 0x669   : > { %v993_v36 = vsel %vm531_vm0, %v992_v34, 0.0 }
 0x66a   : > { %994 = vadd.xlane.f32.xlu1 %v993_v36 }
 0x66c   : > { %v990_v37 = vpop.f32.mrf.mxu1 }
 0x6dd   : > { %v995_v44 = vpop.xlane.xlu1 %994 }
 0x6de   : > { %v1003_v45 = vmul.f32 %v1002_v43, %v995_v44 }
 0x6e0   : > { %v1004_v46 = vsub.f32 %v992_v34, %v1003_v45 }
 0x6e2   : > { %v1005_v47 = vmul.f32 %v1004_v46, %v1004_v46 }
 0x6e4   : > { %v1006_v48 = vsel %vm531_vm0, %v1005_v47, 0.0 }
 0x6e5   : > { %1007 = vadd.xlane.f32.xlu2 %v1006_v48 }
 0x758   : > { %v1008_v4 = vpop.xlane.xlu2 %1007 }
 0x759   : > { %v1009_v49 = vmul.f32 %v1008_v4, %v1002_v43 }
 0x75b   : > { %v1010_v50 = vadd.f32 1e-05, %v1009_v49 }
 0x75d   : > { %1378 = vrsqrt.f32 %v1010_v50  ;;  %vm1017_vm12 = vweird.f32 %v1010_v50 }
 0x763   : > { %v1379_v51 = vpop.eup %1378 }
 0x764   : > { %v1012_v52 = vmul.f32 %v1379_v51, %v1010_v50  ;;  %vm1018_vm11 = vweird.f32 %v1379_v51 }
 0x765   : > { %vm1019_vm13 = vmor %vm1017_vm12, %vm1018_vm11 }
 0x766   : > { %v1013_v53 = vmul.f32 %v1379_v51, %v1012_v52 }
 0x768   : > { %v1014_v54 = vmul.f32 0.5, %v1013_v53 }
 0x76a   : > { %v1015_v55 = vsub.f32 1.5, %v1014_v54 }
 0x76c   : > { %v1016_v56 = vmul.f32 %v1379_v51, %v1015_v55 }
 0x76e   : > { %v1020_v58 = vsel %vm1019_vm13, %v1379_v51, %v1016_v56 }
 0x76f   : > { %v1021_v60 = vmul.f32 %v1020_v58, %v1004_v46 }
 0x771   : > { %v1026_v61 = vmul.f32 %v1358_v57, %v1021_v60 }
 0x773   : > { %v1031_v62 = vadd.f32 %v1359_v59, %v1026_v61 }
 0x775   : > { %1032 = vst.msk [vmem:[%s503_s22] sm:$0xff] %vm531_vm0, %v1031_v62 }
 0x776 PF: > { %s25_s19 = sadd.s32 1, %s1628_s19   ;;  %s1968_s17 = smov %s1624_s18 }
 0x777   : > { %p22_p8 = scmp.ge.s32.totalorder %s25_s19, 4   ;;  %s1969_s18 = smov %s1971_s26 }
 0x779   :  { %24 = sbr.rel (!%p22_p8) target bundleno = 7 (0x7), region = 130 }
 0x77e   :  { %1058 = vsyncpa [#allocation4], 1 }
 0x77f   :  { %1060 = vsyncpa [#allocation4 + $0x1], 1 }
 0x780   :  { %1061 = vsyncpa [#allocation6], 1 }
 0x781   :  { %1062 = vsyncpa [#allocation9], 1 }
 0x782   :  { %1063 = vsyncpa [#allocation12], 1 }

// kernel: encoder_pallas.11
= control target key start
LH: loop header
LB: loop body
LE: loop exit
PB: predicated region body
PF: predicated region fallthrough
CT: control target
= control target key end

     0   :  { %9 = vsyncpa [#allocation3], 0  ;;  %s674_s0 = inlined_call_operand.vmem [shape: f32[2,8,32], index: 0, kind: input, shape index: {}]   ;;  %s675_s1 = inlined_call_operand.vmem [shape: f32[1,32], index: 1, kind: input, shape index: {}]   ;;  %s676_s2 = inlined_call_operand.vmem [shape: f32[1,32], index: 2, kind: input, shape index: {}]   ;;  %s677_s3 = inlined_call_operand.vmem [shape: f32[32,32], index: 3, kind: input, shape index: {}]   ;;  %s678_s4 = inlined_call_operand.hbm [shape: f32[2,8,32], index: 4, kind: output, shape index: {}]  }
   0x1   :  { %11 = vsyncpa [#allocation3 + $0x1], 0  ;;  %s555_s15 = smov 0   ;;  %s557_s16 = smov 0  }
   0x2   :  { %s559_s17 = smov 0   ;;  %s561_s18 = smov 0  }
   0x3   :  { %s563_s19 = smov 0   ;;  %s565_s20 = smov 0  }
   0x4 LB: > { %s375_s21 = sadd.s32 4294967295, %s527_s20   ;;  %s376_s22 = sadd.s32 4294967294, %s527_s20   ;;  %s527_s20 = sphi %s565_s20, %s17_s20   ;;  %s523_s19 = sphi %s563_s19, %s685_s19   ;;  %s519_s18 = sphi %s561_s18, %s684_s18   ;;  %s515_s17 = sphi %s559_s17, %s683_s17   ;;  %s511_s16 = sphi %s557_s16, %s682_s16   ;;  %s507_s15 = sphi %s555_s15, %s681_s15  }
   0x5   : > { %s29_s23 = sadd.s32 1, %s523_s19  ;;  %s129_s24 = sadd.s32 1, %s515_s17 }
   0x6   : > { %p31_p0 = scmp.ge.s32.totalorder %s29_s23, 2  ;;  %p139_p1 = scmp.ne.s32.totalorder %s515_s17, %s511_s16 }
   0x7   : > { %p140_p2 = scmp.eq.s32.totalorder %s375_s21, 1  ;;  %p145_p3 = scmp.ne.s32.totalorder %s511_s16, %s507_s15 }
   0x8   : > { %s687_s23 = smov (%p31_p0, %s29_s23), 0  ;;  %p146_p5 = scmp.eq.s32.totalorder %s376_s22, 1 }
   0x9   : > { %p595_p4 = por %p140_p2, %p139_p1  ;;  %s124_s26 = ssub.s32 %s523_s19, %s687_s23 }
   0xa   : > { %p379_p6 = scmp.ge.s32.totalorder %s527_s20, 1  ;;  %p127_p7 = scmp.eq.s32.totalorder %s124_s26, 0 }
   0xb   : > { %p602_p8 = por %p146_p5, %p145_p3  ;;  %p183_p9 = scmp.lt.s32.totalorder %s527_s20, 3 }
   0xc   : > { %s608_s28 = scalar_select %p127_p7, %s515_s17, %s129_s24  }
   0xd   : > { %p184_p10 = pnand %p379_p6, %p183_p9 }
   0xe   : > { %p211_p11 = scmp.lt.s32.totalorder (!%p184_p10), %s519_s18, 1  ;;  %s208_s22 = sand.u32 (!%p184_p10), 1, %s511_s16  }
   0xf   : > { %187 = sbr.rel (%p184_p10) target bundleno = 422 (0x1a6), region = 36  ;;  %s380_s24 = sshll.u32 (!%p184_p10), %s208_s22, 3 }
  0x10   : > { %s384_s26 = sshll.u32 (!%p184_p10), %s519_s18, 3  ;;  %s210_s10 = scalar_lea.vmem (!%p184_p10), [#allocation2], %s380_s24 }
  0x11   : > { %s301_s11 = sshll.u32 (!%p184_p10), %s210_s10, 4  ;;  %s469_s24 = scalar_lea.hbm (!%p184_p10), %s678_s4, 16  ;;  %s302_s11 = int_to_ptr.vmem [resolvable:$true] %s301_s11 }
  0x14   : > { %s212_s29 = scalar_select %p211_p11, %s519_s18, 1  ;;  %vm219_vm0 = vcmask 261120   ;;  %v529_v2 = vmov 32.0   ;;  %v252_v14 = vld [vmem:[%s677_s3 + $0x18] sm:$0xff]  ;;  %v251_v15 = vld [vmem:[%s677_s3 + $0x10] sm:$0xff]  ;;  %v250_v16 = vld [vmem:[%s677_s3 + $0x8] sm:$0xff] }
  0x15   : > { %445 = vrcp.f32 %v529_v2  ;;  %268 = vmatpush.msra.mxu0 %v252_v14  ;;  %v249_v17 = vld [vmem:[%s677_s3] sm:$0xff]  ;;  %s288_s18 = scalar_lea.sflag [#allocation3], %s208_s22 }
  0x16   : > { %s381_s30 = sshll.u32 %s212_s29, 3  ;;  %v443_v29 = vld [vmem:[%s675_s1] ss:$0 sm:$0xff] }
  0x17   : > { %s217_s7 = scalar_lea.vmem %s674_s0, %s381_s30  ;;  %269 = vmatpush.msra.mxu0 %v251_v15  ;;  %v444_v30 = vld [vmem:[%s676_s2] ss:$0 sm:$0xff] }
  0x18   : > { %v218_v0 = vld [vmem:[%s217_s7] sm:$0xff]  ;;  %s299_s7 = scalar_lea.hbm %s678_s4, %s384_s26 }
  0x19   : > { %v220_v1 = vsel %vm219_vm0, %v218_v0, 0.0  ;;  %270 = vmatpush.msra.mxu0 %v250_v16  ;;  %s303_s12 = sshll.u32 %s299_s7, 4  ;;  %s304_s12 = int_to_ptr.hbm [resolvable:$true] %s303_s12 }
  0x1a   : > { %221 = vadd.xlane.f32.xlu0 %v220_v1  ;;  %s463_s13 = sshra.s32 %s304_s12, 4  ;;  %s464_s13 = int_to_ptr.hbm [resolvable:$true] %s463_s13 }
  0x1b   : > { %v446_v3 = vpop.eup %445  ;;  %271 = vmatpush.msra.mxu0 %v249_v17  ;;  %s465_s14 = scalar_lea.hbm %s464_s13, 8  ;;  %p470_p1 = scmp.lt.s32.totalorder %s464_s13, %s678_s4 }
  0x1c   : > { %v224_v4 = vmul.f32 32.0, %v446_v3  ;;  %vm228_vm1 = vweird.f32 %v446_v3  ;;  %p466_p12 = scmp.ne.s32.totalorder %s464_s13, %s465_s14  ;;  %p471_p2 = scmp.lt.s32.totalorder %s469_s24, %s465_s14 }
  0x1e   : > { %v225_v5 = vsub.f32 1.0, %v224_v4  ;;  %p467_p13 = pnand %p466_p12, %p595_p4  ;;  %p472_p3 = por %p471_p2, %p470_p1 }
  0x20   : > { %v226_v6 = vmul.f32 %v446_v3, %v225_v5  ;;  %p468_p0 = pneg %p467_p13 }
  0x22   : > { %v227_v7 = vadd.f32 %v446_v3, %v226_v6  ;;  %p473_p5 = pnand %p472_p3, %p468_p0 }
  0x24   : > { %v229_v8 = vsel %vm228_vm1, %v446_v3, %v227_v7 }
  0x8d   : > { %v222_v9 = vpop.xlane.xlu0 %221 }
  0x8e   : > { %v230_v10 = vmul.f32 %v229_v8, %v222_v9 }
  0x90   : > { %v231_v11 = vsub.f32 %v218_v0, %v230_v10 }
  0x92   : > { %v232_v12 = vmul.f32 %v231_v11, %v231_v11 }
  0x94   : > { %v233_v13 = vsel %vm219_vm0, %v232_v12, 0.0 }
  0x95   : > { %234 = vadd.xlane.f32.xlu0 %v233_v13 }
 0x108   : > { %v235_v18 = vpop.xlane.xlu0 %234 }
 0x109   : > { %v236_v19 = vmul.f32 %v235_v18, %v229_v8 }
 0x10b   : > { %v237_v20 = vadd.f32 1e-05, %v236_v19 }
 0x10d   : > { %447 = vrsqrt.f32 %v237_v20  ;;  %vm244_vm3 = vweird.f32 %v237_v20 }
 0x113   : > { %v448_v21 = vpop.eup %447 }
 0x114   : > { %v239_v22 = vmul.f32 %v448_v21, %v237_v20  ;;  %vm245_vm2 = vweird.f32 %v448_v21 }
 0x115   : > { %vm246_vm4 = vmor %vm244_vm3, %vm245_vm2 }
 0x116   : > { %v240_v23 = vmul.f32 %v448_v21, %v239_v22 }
 0x118   : > { %v241_v24 = vmul.f32 0.5, %v240_v23 }
 0x11a   : > { %v242_v25 = vsub.f32 1.5, %v241_v24 }
 0x11c   : > { %v243_v26 = vmul.f32 %v448_v21, %v242_v25 }
 0x11e   : > { %v247_v27 = vsel %vm246_vm4, %v448_v21, %v243_v26 }
 0x11f   : > { %v248_v28 = vmul.f32 %v247_v27, %v231_v11 }
 0x121   : > { %382 = vmatmul.msk.f32.vlgmr.msra.gmra.mxu0 %vm219_vm0, %v248_v28 }
 0x19e   : > { %v273_v31 = vpop.f32.mrf.mxu0 }
 0x19f   : > { %v280_v32 = vmul.f32 %v443_v29, %v273_v31 }
 0x1a1   : > { %v285_v33 = vadd.f32 %v444_v30, %v280_v32 }
 0x1a3   : > { %286 = vst.msk [vmem:[%s210_s10] sm:$0xff] %vm219_vm0, %v285_v33 }
 0x1a4   : > { %476 = shalt.err (!%p473_p5)
}
 0x1a5   : > { %387 = dma.vmem_to_hbm [thread:$0]  (%p595_p4), %s302_s11, 128, %s304_s12, %s288_s18  }
 0x1a6 PF: > { %p393_p6 = scmp.ge.s32.totalorder %s527_s20, 2  ;;  %s315_s22 = sand.u32 1, %s507_s15  }
 0x1a7   : > { %s316_s5 = scalar_lea.sflag [#allocation3], %s315_s22 }
 0x1a8   : > { %p390_p7 = pnand %p393_p6, %p602_p8 }
 0x1aa   : > { %p391_p9 = pneg %p390_p7 }
 0x1ac   : > { %502 = dma.done.wait (%p391_p9), %s316_s5, 128  }
 0x1ad   : > { %504 = vsyncadd (%p391_p9), %s316_s5, 4294967168  ;;  %s17_s20 = sadd.s32 1, %s527_s20   ;;  %s681_s15 = smov %s511_s16 }
 0x1ae   : > { %p14_p10 = scmp.ge.s32.totalorder %s17_s20, 4   ;;  %s682_s16 = smov %s515_s17 }
 0x1af   : > { %s683_s17 = smov %s608_s28  ;;  %s684_s18 = smov %s523_s19 }
 0x1b0   : > { %s685_s19 = smov %s687_s23  ;;  %16 = sbr.rel (!%p14_p10) target bundleno = 4 (0x4), region = 71 }
 0x1b5   :  { %322 = vsyncpa [#allocation3], 1 }
 0x1b6   :  { %324 = vsyncpa [#allocation3 + $0x1], 1 }

// kernel: encoder_pallas.10
= control target key start
LH: loop header
LB: loop body
LE: loop exit
PB: predicated region body
PF: predicated region fallthrough
CT: control target
= control target key end

     0   :  { %s702_s24 = smov 0   ;;  %s704_s25 = smov 0   ;;  %s788_s0 = inlined_call_operand.vmem [shape: f32[2,8,32], index: 0, kind: input, shape index: {}]   ;;  %s789_s1 = inlined_call_operand.vmem [shape: bf16[32,128], index: 1, kind: input, shape index: {}]   ;;  %s790_s2 = inlined_call_operand.vmem [shape: f32[1,128], index: 2, kind: input, shape index: {}]   ;;  %s791_s3 = inlined_call_operand.vmem [shape: bf16[128,32], index: 3, kind: input, shape index: {}]   ;;  %s792_s4 = inlined_call_operand.vmem [shape: f32[1,32], index: 4, kind: input, shape index: {}]   ;;  %s793_s5 = inlined_call_operand.vmem [shape: f32[1,32], index: 5, kind: input, shape index: {}]   ;;  %s794_s6 = inlined_call_operand.vmem [shape: f32[1,32], index: 6, kind: input, shape index: {}]   ;;  %s795_s7 = inlined_call_operand.vmem [shape: f32[2,8,32], index: 7, kind: output, shape index: {}]  }
   0x1   :  { %s706_s26 = smov 0  }
   0x2 LB: > { %s29_s27 = sadd.s32 1, %s655_s25  ;;  %p548_p0 = scmp.ge.s32.totalorder %s659_s26, 1  ;;  %s659_s26 = sphi %s706_s26, %s17_s26   ;;  %s655_s25 = sphi %s704_s25, %s797_s25   ;;  %s651_s24 = sphi %s702_s24, %s796_s24  }
   0x3   : > { %p31_p1 = scmp.ge.s32.totalorder %s29_s27, 2  ;;  %p255_p2 = scmp.lt.s32.totalorder %s659_s26, 3 }
   0x5   : > { %s799_s27 = smov (%p31_p1, %s29_s27), 0  ;;  %p256_p3 = pnand %p548_p0, %p255_p2 }
   0x6   : > { %p291_p4 = scmp.lt.s32.totalorder (!%p256_p3), %s651_s24, 1 }
   0x7   : > { %259 = sbr.rel (%p256_p3) target bundleno = 551 (0x227), region = 48 }
   0xc   : > { %v595_v0 = vld [vmem:[%s789_s1 + $0x8] sm:$0xff]  ;;  %v603_v1 = vld [vmem:[%s791_s3 + $0x38] sm:$0xff]  ;;  %v594_v2 = vld [vmem:[%s789_s1] sm:$0xff]  ;;  %s801_s24 = smov (!%p291_p4, %s651_s24), 1  ;;  %vm328_vm0 = vcmask 261120   ;;  %v661_v24 = vmov 32.0  }
   0xd   : > { %338 = vmatpush.bf16.msra.mxu0 %v595_v0  ;;  %411 = vmatpush.bf16.msra.mxu1 %v603_v1  ;;  %v602_v3 = vld [vmem:[%s791_s3 + $0x30] sm:$0xff]  ;;  %s549_s13 = sshll.u32 %s801_s24, 3  ;;  %v601_v5 = vld [vmem:[%s791_s3 + $0x28] sm:$0xff]  ;;  %v600_v7 = vld [vmem:[%s791_s3 + $0x20] sm:$0xff]  ;;  %633 = vrcp.f32 %v661_v24 }
   0xe   : > { %s297_s16 = scalar_lea.vmem %s788_s0, %s549_s13  ;;  %v599_v8 = vld [vmem:[%s791_s3 + $0x18] sm:$0xff]  ;;  %v598_v9 = vld [vmem:[%s791_s3 + $0x10] sm:$0xff]  ;;  %v597_v10 = vld [vmem:[%s791_s3 + $0x8] sm:$0xff]  ;;  %s304_s21 = scalar_lea.vmem %s795_s7, %s549_s13 }
   0xf   : > { %v306_v4 = vld [vmem:[%s297_s16] sm:$0xff] }
  0x10   : > { %v307_v6 = vpack.c.bf16 %v306_v4, %v306_v4  ;;  %v596_v11 = vld [vmem:[%s791_s3] sm:$0xff] }
  0x11   : > { %339 = vmatpush.bf16.msra.mxu0 %v594_v2  ;;  %412 = vmatpush.bf16.msra.mxu1 %v602_v3  ;;  %v629_v12 = vld [vmem:[%s790_s2] ss:$0 sm:$0xff] }
  0x12   : > { %v630_v18 = vld [vmem:[%s792_s4] ss:$0 sm:$0xff] }
  0x13   : > { %v634_v25 = vpop.eup %633  ;;  %v631_v45 = vld [vmem:[%s793_s5] ss:$0 sm:$0xff] }
  0x14   : > { %559 = vmatmul.msk.bf16.vlgmr.msra.gmra.mxu0 %vm328_vm0, %v307_v6  ;;  %v434_v26 = vmul.f32 32.0, %v634_v25  ;;  %vm438_vm1 = vweird.f32 %v634_v25  ;;  %v632_v47 = vld [vmem:[%s794_s6] ss:$0 sm:$0xff] }
  0x15   : > { %413 = vmatpush.bf16.msra.mxu1 %v601_v5 }
  0x16   : > { %v435_v27 = vsub.f32 1.0, %v434_v26 }
  0x18   : > { %v436_v28 = vmul.f32 %v634_v25, %v435_v27 }
  0x19   : > { %414 = vmatpush.bf16.msra.mxu1 %v600_v7 }
  0x1a   : > { %v437_v29 = vadd.f32 %v634_v25, %v436_v28 }
  0x1c   : > { %v439_v30 = vsel %vm438_vm1, %v634_v25, %v437_v29 }
  0x1d   : > { %415 = vmatpush.bf16.msra.mxu1 %v599_v8 }
  0x21   : > { %416 = vmatpush.bf16.msra.mxu1 %v598_v9 }
  0x25   : > { %417 = vmatpush.bf16.msra.mxu1 %v597_v10 }
  0x29   : > { %418 = vmatpush.bf16.msra.mxu1 %v596_v11 }
  0x91   : > { %v341_v13 = vpop.f32.mrf.mxu0 }
  0x92   : > { %v342_v14 = vadd.f32 %v629_v12, %v341_v13 }
  0x94   : > { %v345_v15 = vmax.f32 %v342_v14, 0.0 }
  0x96   : > { %v346_v16 = vpack.c.bf16 %v345_v15, %v345_v15 }
  0x98   : > { %419 = vmatmul.bf16.vlgmr.msra.gmra.mxu1 %v346_v16 }
  0x99   : > { %v343_v17 = vpop.f32.mrf.mxu0 }
 0x115   : > { %v420_v19 = vpop.f32.mrf.mxu1 }
 0x116   : > { %v424_v20 = vadd.f32 %v420_v19, %v306_v4 }
 0x118   : > { %v429_v21 = vadd.f32 %v630_v18, %v424_v20 }
 0x11a   : > { %v430_v22 = vsel %vm328_vm0, %v429_v21, 0.0 }
 0x11b   : > { %431 = vadd.xlane.f32.xlu0 %v430_v22 }
 0x11d   : > { %v422_v23 = vpop.f32.mrf.mxu1 }
 0x18e   : > { %v432_v31 = vpop.xlane.xlu0 %431 }
 0x18f   : > { %v440_v32 = vmul.f32 %v439_v30, %v432_v31 }
 0x191   : > { %v441_v33 = vsub.f32 %v429_v21, %v440_v32 }
 0x193   : > { %v442_v34 = vmul.f32 %v441_v33, %v441_v33 }
 0x195   : > { %v443_v35 = vsel %vm328_vm0, %v442_v34, 0.0 }
 0x196   : > { %444 = vadd.xlane.f32.xlu0 %v443_v35 }
 0x209   : > { %v445_v36 = vpop.xlane.xlu0 %444 }
 0x20a   : > { %v446_v37 = vmul.f32 %v445_v36, %v439_v30 }
 0x20c   : > { %v447_v38 = vadd.f32 1e-05, %v446_v37 }
 0x20e   : > { %635 = vrsqrt.f32 %v447_v38  ;;  %vm454_vm3 = vweird.f32 %v447_v38 }
 0x214   : > { %v636_v39 = vpop.eup %635 }
 0x215   : > { %v449_v40 = vmul.f32 %v636_v39, %v447_v38  ;;  %vm455_vm2 = vweird.f32 %v636_v39 }
 0x216   : > { %vm456_vm4 = vmor %vm454_vm3, %vm455_vm2 }
 0x217   : > { %v450_v41 = vmul.f32 %v636_v39, %v449_v40 }
 0x219   : > { %v451_v42 = vmul.f32 0.5, %v450_v41 }
 0x21b   : > { %v452_v43 = vsub.f32 1.5, %v451_v42 }
 0x21d   : > { %v453_v44 = vmul.f32 %v636_v39, %v452_v43 }
 0x21f   : > { %v457_v46 = vsel %vm456_vm4, %v636_v39, %v453_v44 }
 0x220   : > { %v458_v48 = vmul.f32 %v457_v46, %v441_v33 }
 0x222   : > { %v463_v49 = vmul.f32 %v631_v45, %v458_v48 }
 0x224   : > { %v468_v50 = vadd.f32 %v632_v47, %v463_v49 }
 0x226   : > { %469 = vst.msk [vmem:[%s304_s21] sm:$0xff] %vm328_vm0, %v468_v50 }
 0x227 PF: > { %s17_s26 = sadd.s32 1, %s659_s26   ;;  %s796_s24 = smov %s655_s25 }
 0x228   : > { %p14_p5 = scmp.ge.s32.totalorder %s17_s26, 4   ;;  %s797_s25 = smov %s799_s27 }
 0x22a   :  { %16 = sbr.rel (!%p14_p5) target bundleno = 2 (0x2), region = 78 }

</bundles_post_ra>
